<compile_context>
chip_gen: v7x
topology: tpu7x:2x2x1
jax: 0.10.0
libtpu: 0.0.40
codegen_flags: <defaults>
</compile_context>

<pallas_src>
import jax
import jax.numpy as jnp
import numpy as np
from jax.experimental import pallas as pl
from jax.experimental.pallas import tpu as pltpu

# ---------------- model dimensions (small runnable example) ----------------
B = 2            # batch
T = 8            # mfcc sequence length (scaled down)
F_MFCC = 13      # GRU input_size=13 (matches module)
H = 32           # GRU hidden size (scaled down from 256)
D_VIDEO = 2048   # video_linear in_features (matches module)
D_SPEC = 9216    # spec_linear  in_features (matches module)
D_BRANCH = 128   # per-modality embedding (matches module)
D_FUSED = 3 * D_BRANCH
N_CLASSES = 8

NK = 2                      # K-tiles streamed over the grid axis
TK_SPEC = D_SPEC // NK      # 4608 (multiple of 128)
TK_VID = D_VIDEO // NK      # 1024 (multiple of 128)


# ---------------- fused bidirectional GRU layer (traced in-kernel) ----------------
def _fused_bigru(gi_all, whh_blk, bhn, step_fn):
    """Run forward+backward GRU directions in ONE serial loop of T steps.

    gi_all  : [T*B, 6H] hoisted input projections; row block t holds the
              projection of input(t) for BOTH directions (biases folded:
              b_ir+b_hr / b_iz+b_hz in r/z columns, b_in in n columns).
              Column layout: [r_f r_b | z_f z_b | n_f n_b].
    whh_blk : [2H, 6H] block-diagonal hidden weight (rows 0:H act on h_fwd,
              rows H:2H on h_bwd).
    bhn     : [1, 2H] hidden bias of the n gate, [b_hn_f | b_hn_b].
    step_fn(s, h): called after each update; h = [h_fwd(s) | h_bwd(T-1-s)].
    """
    lane = jax.lax.broadcasted_iota(jnp.int32, (B, 6 * H), 1)
    fwd_cols = (lane % (2 * H)) < H                 # fwd-direction columns mask
    bhn_b = jnp.broadcast_to(bhn, (B, 2 * H))       # hoisted broadcast
    h = jnp.zeros((B, 2 * H), jnp.float32)
    for s in range(T):
        sf, sb = s * B, (T - 1 - s) * B
        # pair fwd timestep s with bwd timestep T-1-s (cheap VPU select,
        # off the recurrent critical path).
        gi = jnp.where(fwd_cols, gi_all[sf:sf + B], gi_all[sb:sb + B])
        gh = jnp.dot(h, whh_blk, preferred_element_type=jnp.float32)   # [B, 6H]
        rz = jax.nn.sigmoid(gi[:, :4 * H] + gh[:, :4 * H])
        r, z = rz[:, :2 * H], rz[:, 2 * H:]
        n = jnp.tanh(gi[:, 4 * H:] + r * (gh[:, 4 * H:] + bhn_b))
        h = (1.0 - z) * n + z * h
        step_fn(s, h)


# ---------------- Pallas kernel ----------------
def msaf_kernel(mfcc_ref, video_ref, spec_ref,
                wi1_ref, whh1_ref, bi1_ref, bhn1_ref,
                wi2a_ref, wi2b_ref, whh2_ref, bi2_ref, bhn2_ref,
                wm_ref, bm_ref, wv_ref, bv_ref, ws_ref, bs_ref,
                wf_ref, bf_ref,
                out_ref,
                video_acc, spec_acc, audio_sc, l1f_sc, l1b_sc):
    k = pl.program_id(0)
    nk = pl.num_programs(0)

    # ---- step 0: init accumulators + the full audio branch (hides the ----
    # ---- streaming DMA of the remaining spec/video weight tiles)      ----
    @pl.when(k == 0)
    def _prologue():
        video_acc[...] = jnp.zeros_like(video_acc)
        spec_acc[...] = jnp.zeros_like(spec_acc)

        # F.normalize(p=2, dim=1): L2 over the time axis
        mfcc = mfcc_ref[...]                                  # [B, T, F]
        ss = jnp.sum(mfcc * mfcc, axis=1, keepdims=True)      # [B, 1, F]
        x0 = mfcc * jax.lax.rsqrt(jnp.maximum(ss, 1e-24))     # == x / max(||x||, 1e-12)

        # time-major row stacking: [T*B, F] (tiny [2,13] pieces, one-time)
        x0_all = jnp.concatenate([x0[:, tt, :] for tt in range(T)], axis=0)

        # ---- layer 1: hoisted packed input projection + fused fwd/bwd loop
        gi1_all = (jnp.dot(x0_all, wi1_ref[...],
                           preferred_element_type=jnp.float32)
                   + bi1_ref[...])                            # [T*B, 6H]

        def store_l1(s, h):
            # h = [h_fwd(s) | h_bwd(T-1-s)]; scatter halves to their timestep row.
            l1f_sc[s * B:(s + 1) * B, :] = h[:, :H]
            l1b_sc[(T - 1 - s) * B:(T - s) * B, :] = h[:, H:]

        _fused_bigru(gi1_all, whh1_ref[...], bhn1_ref[...], store_l1)
        # (inter-layer dropout p=0.5 is identity in eval mode)

        # ---- layer 2: input is [h_f(t) | h_b(t)]; hoisted projection from scratch
        gi2_all = (jnp.dot(l1f_sc[...], wi2a_ref[...],
                           preferred_element_type=jnp.float32)
                   + jnp.dot(l1b_sc[...], wi2b_ref[...],
                             preferred_element_type=jnp.float32)
                   + bi2_ref[...])                            # [T*B, 6H]

        # mfcc_linear(torch.flatten(gru_out, 1)) fused into the layer-2 loop
        # (fp32 throughout); mfcc_dropout (p=0.1) is identity in eval.
        acc = [jnp.broadcast_to(bm_ref[...], (B, D_BRANCH))]

        def accum_l2(s, h):
            # wm_ref[s] rows 0:H = (time s, fwd), rows H:2H = (time T-1-s, bwd)
            acc[0] = acc[0] + jnp.dot(h, wm_ref[s],
                                      preferred_element_type=jnp.float32)

        _fused_bigru(gi2_all, whh2_ref[...], bhn2_ref[...], accum_l2)
        audio_sc[...] = jnp.maximum(acc[0], 0.0)              # [B, 128]

    # ---- every step: stream one K-tile of the big (bf16) linears ----
    video_acc[...] += jnp.dot(video_ref[...], wv_ref[...],
                              preferred_element_type=jnp.float32)
    spec_acc[...] += jnp.dot(spec_ref[...], ws_ref[...],
                             preferred_element_type=jnp.float32)

    # ---- last step: bias + relu + fused fc (single matmul) ----
    @pl.when(k == nk - 1)
    def _epilogue():
        video = jnp.maximum(video_acc[...] + bv_ref[...], 0.0)
        spec = jnp.maximum(spec_acc[...] + bs_ref[...], 0.0)
        # torch.cat([video, audio, spec], 1): 128-aligned lane concat -> one matmul
        fused = jnp.concatenate([video, audio_sc[...], spec], axis=1)   # [B, 384]
        out_ref[...] = (jnp.dot(fused, wf_ref[...],
                                preferred_element_type=jnp.float32)
                        + bf_ref[...])


# ---------------- wrapper ----------------
def _full_spec(x):
    nd = x.ndim
    return pl.BlockSpec(x.shape, lambda k, _nd=nd: (0,) * _nd)


def msafnet_forward(video_feat, mfcc, spec_feat, kp):
    bsz = mfcc.shape[0]
    # pre-cast the big activations to bf16 (halves DMA bytes, no in-kernel casts)
    video_bf = video_feat.astype(jnp.bfloat16)
    spec_bf = spec_feat.astype(jnp.bfloat16)

    args = (mfcc, video_bf, spec_bf,
            kp["wi1"], kp["whh1"], kp["bi1"], kp["bhn1"],
            kp["wi2a"], kp["wi2b"], kp["whh2"], kp["bi2"], kp["bhn2"],
            kp["wm"], kp["bm"], kp["wv"], kp["bv"], kp["ws"], kp["bs"],
            kp["wf"], kp["bf"])

    in_specs = [
        _full_spec(mfcc),
        pl.BlockSpec((bsz, TK_VID), lambda k: (0, k)),        # video feats (bf16), K-tiled
        pl.BlockSpec((bsz, TK_SPEC), lambda k: (0, k)),       # spec feats  (bf16), K-tiled
        _full_spec(kp["wi1"]), _full_spec(kp["whh1"]),
        _full_spec(kp["bi1"]), _full_spec(kp["bhn1"]),
        _full_spec(kp["wi2a"]), _full_spec(kp["wi2b"]),
        _full_spec(kp["whh2"]), _full_spec(kp["bi2"]), _full_spec(kp["bhn2"]),
        _full_spec(kp["wm"]), _full_spec(kp["bm"]),
        pl.BlockSpec((TK_VID, D_BRANCH), lambda k: (k, 0)),   # wv (bf16), K-tiled
        _full_spec(kp["bv"]),
        pl.BlockSpec((TK_SPEC, D_BRANCH), lambda k: (k, 0)),  # ws (bf16), K-tiled
        _full_spec(kp["bs"]),
        _full_spec(kp["wf"]), _full_spec(kp["bf"]),
    ]

    return pl.pallas_call(
        msaf_kernel,
        out_shape=jax.ShapeDtypeStruct((bsz, N_CLASSES), jnp.float32),
        grid_spec=pltpu.PrefetchScalarGridSpec(
            num_scalar_prefetch=0,
            grid=(NK,),
            in_specs=in_specs,
            out_specs=pl.BlockSpec((bsz, N_CLASSES), lambda k: (0, 0)),
            scratch_shapes=[
                pltpu.VMEM((bsz, D_BRANCH), jnp.float32),     # video_acc
                pltpu.VMEM((bsz, D_BRANCH), jnp.float32),     # spec_acc
                pltpu.VMEM((bsz, D_BRANCH), jnp.float32),     # audio_sc
                pltpu.VMEM((T * bsz, H), jnp.float32),        # l1f_sc (layer-1 fwd outs)
                pltpu.VMEM((T * bsz, H), jnp.float32),        # l1b_sc (layer-1 bwd outs)
            ],
        ),
        compiler_params=pltpu.CompilerParams(
            dimension_semantics=("arbitrary",)),
    )(*args)


# ---------------- deterministic parameter init (PyTorch shape conventions) ----------------
def init_params(key):
    ks = jax.random.split(key, 16)

    def w(k, shape, scale):
        return scale * jax.random.normal(k, shape, dtype=jnp.float32)

    p = {}
    # GRU: stacked [fwd, bwd] along axis 0, gate order (r, z, n) along rows.
    p["w_ih0"] = w(ks[0], (2, 3 * H, F_MFCC), 0.08)
    p["w_hh0"] = w(ks[1], (2, 3 * H, H), 0.08)
    p["b_ih0"] = w(ks[2], (2, 3 * H), 0.05)
    p["b_hh0"] = w(ks[3], (2, 3 * H), 0.05)
    p["w_ih1"] = w(ks[4], (2, 3 * H, 2 * H), 0.08)
    p["w_hh1"] = w(ks[5], (2, 3 * H, H), 0.08)
    p["b_ih1"] = w(ks[6], (2, 3 * H), 0.05)
    p["b_hh1"] = w(ks[7], (2, 3 * H), 0.05)
    # Linear layers: weight [out, in], bias [out]
    p["wm"] = w(ks[8], (D_BRANCH, T * 2 * H), 0.02)
    p["bm"] = w(ks[9], (D_BRANCH,), 0.02)
    p["wv"] = w(ks[10], (D_BRANCH, D_VIDEO), 0.02)
    p["bv"] = w(ks[11], (D_BRANCH,), 0.02)
    p["ws"] = w(ks[12], (D_BRANCH, D_SPEC), 0.01)
    p["bs"] = w(ks[13], (D_BRANCH,), 0.02)
    p["wf"] = w(ks[14], (N_CLASSES, D_FUSED), 0.05)
    p["bf"] = w(ks[15], (N_CLASSES,), 0.05)
    return p


def prepare_kernel_params(p):
    """One-time host repack of PyTorch-convention params into the kernel layout:
    packed-gate [in, 6H] input projections, block-diagonal [2H, 6H] hidden
    weights, per-step [T, 2H, 128] mfcc_linear slices, bf16 storage for the
    large HBM-bound weights.  Runs OUTSIDE the jitted forward."""
    H2, H6 = 2 * H, 6 * H

    def pack_wih(w, din):
        # [2, 3H, din] -> [din, 6H], cols = [r_f r_b z_f z_b n_f n_b]
        w = np.asarray(w).reshape(2, 3, H, din)       # [dir, gate, out, in]
        w = np.transpose(w, (3, 1, 0, 2))             # [in, gate, dir, out]
        return w.reshape(din, H6)

    def pack_wih_l2(w):
        # [2, 3H, 2H] -> (wa [H,6H] acting on h_fwd half, wb [H,6H] on h_bwd half)
        w = np.asarray(w).reshape(2, 3, H, 2, H)      # [dir, gate, out, in_half, in]
        wa = np.transpose(w[:, :, :, 0, :], (3, 1, 0, 2)).reshape(H, H6)
        wb = np.transpose(w[:, :, :, 1, :], (3, 1, 0, 2)).reshape(H, H6)
        return wa, wb

    def pack_whh_blockdiag(w):
        # [2, 3H, H] -> block-diagonal [2H, 6H]
        w = np.asarray(w).reshape(2, 3, H, H)         # [dir, gate, out, in]
        blk = np.zeros((H2, H6), np.float32)
        for d in range(2):
            for g in range(3):
                blk[d * H:(d + 1) * H,
                    g * H2 + d * H: g * H2 + (d + 1) * H] = w[d, g].T
        return blk

    def pack_bi(bi, bh):
        # folded input bias [1, 6H]: r,z get b_i+b_h; n gets b_i only
        bi = np.asarray(bi).reshape(2, 3, H)
        bh = np.asarray(bh).reshape(2, 3, H)
        out = np.zeros((1, H6), np.float32)
        for g in range(3):
            for d in range(2):
                v = bi[d, g] + (bh[d, g] if g < 2 else 0.0)
                out[0, g * H2 + d * H: g * H2 + (d + 1) * H] = v
        return out

    def pack_bhn(bh):
        bh = np.asarray(bh).reshape(2, 3, H)
        return np.concatenate([bh[0, 2], bh[1, 2]])[None, :]   # [1, 2H]

    # mfcc_linear over torch.flatten([B,T,2H],1): [128, T*2H] -> per fused step s
    # a [2H, 128] slab: rows 0:H = (time s, fwd), rows H:2H = (time T-1-s, bwd).
    wm = np.asarray(p["wm"]).reshape(D_BRANCH, T, 2, H)        # [128, T, dir, H]
    wm = np.transpose(wm, (1, 2, 3, 0))                        # [T, dir, H, 128]
    wm_pair = np.concatenate([wm[:, 0], wm[::-1, 1]], axis=1)  # [T, 2H, 128]

    wi2a, wi2b = pack_wih_l2(p["w_ih1"])

    kp = {
        "wi1": jnp.asarray(pack_wih(p["w_ih0"], F_MFCC)),
        "whh1": jnp.asarray(pack_whh_blockdiag(p["w_hh0"])),
        "bi1": jnp.asarray(pack_bi(p["b_ih0"], p["b_hh0"])),
        "bhn1": jnp.asarray(pack_bhn(p["b_hh0"])),
        "wi2a": jnp.asarray(wi2a),
        "wi2b": jnp.asarray(wi2b),
        "whh2": jnp.asarray(pack_whh_blockdiag(p["w_hh1"])),
        "bi2": jnp.asarray(pack_bi(p["b_ih1"], p["b_hh1"])),
        "bhn2": jnp.asarray(pack_bhn(p["b_hh1"])),
        "wm": jnp.asarray(wm_pair),                            # fp32 (fidelity)
        "bm": jnp.asarray(np.asarray(p["bm"])[None, :]),
        "wv": jnp.asarray(np.asarray(p["wv"]).T, dtype=jnp.bfloat16),  # [2048, 128]
        "bv": jnp.asarray(np.asarray(p["bv"])[None, :]),
        "ws": jnp.asarray(np.asarray(p["ws"]).T, dtype=jnp.bfloat16),  # [9216, 128]
        "bs": jnp.asarray(np.asarray(p["bs"])[None, :]),
        "wf": jnp.asarray(np.asarray(p["wf"]).T),              # [384, 8]
        "bf": jnp.asarray(np.asarray(p["bf"])[None, :]),
    }
    return kp


# ---------------- pure-JAX reference (mirrors PyTorch fp32 semantics) ----------------
def reference_forward(video_feat, mfcc, spec_feat, p):
    def gru_layer(x, w_ih, w_hh, b_ih, b_hh):
        bb, tt, _ = x.shape
        outs = []
        for d in range(2):
            h = jnp.zeros((bb, H), jnp.float32)
            hs = [None] * tt
            order = range(tt) if d == 0 else range(tt - 1, -1, -1)
            for s in order:
                x_t = x[:, s, :]
                gi = x_t @ w_ih[d].T + b_ih[d]
                gh = h @ w_hh[d].T + b_hh[d]
                r = jax.nn.sigmoid(gi[:, :H] + gh[:, :H])
                z = jax.nn.sigmoid(gi[:, H:2 * H] + gh[:, H:2 * H])
                n = jnp.tanh(gi[:, 2 * H:] + r * gh[:, 2 * H:])
                h = (1.0 - z) * n + z * h
                hs[s] = h
            outs.append(jnp.stack(hs, axis=1))     # [B, T, H]
        return jnp.concatenate(outs, axis=2)       # [B, T, 2H]

    nrm = jnp.sqrt(jnp.sum(mfcc ** 2, axis=1, keepdims=True))
    mf = mfcc / jnp.maximum(nrm, 1e-12)
    l1 = gru_layer(mf, p["w_ih0"], p["w_hh0"], p["b_ih0"], p["b_hh0"])
    l2 = gru_layer(l1, p["w_ih1"], p["w_hh1"], p["b_ih1"], p["b_hh1"])
    audio = jax.nn.relu(l2.reshape(l2.shape[0], -1) @ p["wm"].T + p["bm"])
    video = jax.nn.relu(video_feat @ p["wv"].T + p["bv"])
    spec = jax.nn.relu(spec_feat @ p["ws"].T + p["bs"])
    fused = jnp.concatenate([video, audio, spec], axis=1)
    return fused @ p["wf"].T + p["bf"]


if __name__ == "__main__":
    key = jax.random.PRNGKey(0)
    k_in, k_par = jax.random.split(key)
    k_v, k_a, k_s = jax.random.split(k_in, 3)

    # stand-in inputs: video backbone features, raw mfcc sequence, AlexNet features
    video_feat = jax.random.normal(k_v, (B, D_VIDEO), dtype=jnp.float32)
    mfcc = jax.random.normal(k_a, (B, T, F_MFCC), dtype=jnp.float32)
    spec_feat = jax.random.normal(k_s, (B, D_SPEC), dtype=jnp.float32)

    params = init_params(k_par)
    kparams = prepare_kernel_params(params)      # one-time host-side repack

    fwd = jax.jit(msafnet_forward)
    out = jax.block_until_ready(fwd(video_feat, mfcc, spec_feat, kparams))

    ref = reference_forward(video_feat, mfcc, spec_feat, params)
    np.testing.assert_allclose(np.asarray(out), np.asarray(ref),
                               rtol=2e-2, atol=2e-2)

    assert out.shape == (B, N_CLASSES) and out.dtype == jnp.float32
    print("KERNEL_OK")
</pallas_src>

<mosaic_0001>
module attributes {stable_mosaic.version = 11 : i64} {
  func.func @msaf_kernel(%arg0: i32, %arg1: memref<2x8x13xf32, #tpu.memory_space<vmem>>, %arg2: memref<2x1024xbf16, #tpu.memory_space<vmem>>, %arg3: memref<2x4608xbf16, #tpu.memory_space<vmem>>, %arg4: memref<13x192xf32, #tpu.memory_space<vmem>>, %arg5: memref<64x192xf32, #tpu.memory_space<vmem>>, %arg6: memref<1x192xf32, #tpu.memory_space<vmem>>, %arg7: memref<1x64xf32, #tpu.memory_space<vmem>>, %arg8: memref<32x192xf32, #tpu.memory_space<vmem>>, %arg9: memref<32x192xf32, #tpu.memory_space<vmem>>, %arg10: memref<64x192xf32, #tpu.memory_space<vmem>>, %arg11: memref<1x192xf32, #tpu.memory_space<vmem>>, %arg12: memref<1x64xf32, #tpu.memory_space<vmem>>, %arg13: memref<8x64x128xf32, #tpu.memory_space<vmem>>, %arg14: memref<1x128xf32, #tpu.memory_space<vmem>>, %arg15: memref<1024x128xbf16, #tpu.memory_space<vmem>>, %arg16: memref<1x128xf32, #tpu.memory_space<vmem>>, %arg17: memref<4608x128xbf16, #tpu.memory_space<vmem>>, %arg18: memref<1x128xf32, #tpu.memory_space<vmem>>, %arg19: memref<384x8xf32, #tpu.memory_space<vmem>>, %arg20: memref<1x8xf32, #tpu.memory_space<vmem>>, %arg21: memref<2x8xf32, #tpu.memory_space<vmem>>, %arg22: memref<2x128xf32, #tpu.memory_space<vmem>>, %arg23: memref<2x128xf32, #tpu.memory_space<vmem>>, %arg24: memref<2x128xf32, #tpu.memory_space<vmem>>, %arg25: memref<16x32xf32, #tpu.memory_space<vmem>>, %arg26: memref<16x32xf32, #tpu.memory_space<vmem>>) attributes {dimension_semantics = [#tpu.dimension_semantics<arbitrary>], iteration_bounds = array<i64: 2>, scalar_prefetch = 0 : i64, scratch_operands = 5 : i64, tpu.core_type = #tpu.core_type<tc>, window_params = [{pipeline_mode = #tpu.pipeline_mode<synchronous>, transform_indices = @transform_0, window_bounds = array<i64: 2, 8, 13>}, {transform_indices = @transform_1, window_bounds = array<i64: 2, 1024>}, {transform_indices = @transform_2, window_bounds = array<i64: 2, 4608>}, {pipeline_mode = #tpu.pipeline_mode<synchronous>, transform_indices = @transform_3, window_bounds = array<i64: 13, 192>}, {pipeline_mode = #tpu.pipeline_mode<synchronous>, transform_indices = @transform_4, window_bounds = array<i64: 64, 192>}, {pipeline_mode = #tpu.pipeline_mode<synchronous>, transform_indices = @transform_5, window_bounds = array<i64: 1, 192>}, {pipeline_mode = #tpu.pipeline_mode<synchronous>, transform_indices = @transform_6, window_bounds = array<i64: 1, 64>}, {pipeline_mode = #tpu.pipeline_mode<synchronous>, transform_indices = @transform_7, window_bounds = array<i64: 32, 192>}, {pipeline_mode = #tpu.pipeline_mode<synchronous>, transform_indices = @transform_8, window_bounds = array<i64: 32, 192>}, {pipeline_mode = #tpu.pipeline_mode<synchronous>, transform_indices = @transform_9, window_bounds = array<i64: 64, 192>}, {pipeline_mode = #tpu.pipeline_mode<synchronous>, transform_indices = @transform_10, window_bounds = array<i64: 1, 192>}, {pipeline_mode = #tpu.pipeline_mode<synchronous>, transform_indices = @transform_11, window_bounds = array<i64: 1, 64>}, {pipeline_mode = #tpu.pipeline_mode<synchronous>, transform_indices = @transform_12, window_bounds = array<i64: 8, 64, 128>}, {pipeline_mode = #tpu.pipeline_mode<synchronous>, transform_indices = @transform_13, window_bounds = array<i64: 1, 128>}, {transform_indices = @transform_14, window_bounds = array<i64: 1024, 128>}, {pipeline_mode = #tpu.pipeline_mode<synchronous>, transform_indices = @transform_15, window_bounds = array<i64: 1, 128>}, {transform_indices = @transform_16, window_bounds = array<i64: 4608, 128>}, {pipeline_mode = #tpu.pipeline_mode<synchronous>, transform_indices = @transform_17, window_bounds = array<i64: 1, 128>}, {pipeline_mode = #tpu.pipeline_mode<synchronous>, transform_indices = @transform_18, window_bounds = array<i64: 384, 8>}, {pipeline_mode = #tpu.pipeline_mode<synchronous>, transform_indices = @transform_19, window_bounds = array<i64: 1, 8>}, {pipeline_mode = #tpu.pipeline_mode<synchronous>, transform_indices = @transform_20, window_bounds = array<i64: 2, 8>}]} {
    %c0_i32 = arith.constant 0 : i32
    %0 = arith.cmpi eq, %arg0, %c0_i32 : i32
    %1 = arith.extui %0 : i1 to i32
    %c0_i32_0 = arith.constant 0 : i32
    %2 = arith.cmpi ne, %1, %c0_i32_0 : i32
    scf.if %2 {
      %cst_18 = arith.constant 0.000000e+00 : f32
      %18 = vector.broadcast %cst_18 : f32 to vector<2x128xf32>
      %c0_19 = arith.constant 0 : index
      %c0_20 = arith.constant 0 : index
      %19 = vector.load %arg22[%c0_19, %c0_20] : memref<2x128xf32, #tpu.memory_space<vmem>>, vector<2x128xf32>
      tpu.vector_store %arg22[%c0_19, %c0_20], %18 {strides = array<i32>} : memref<2x128xf32, #tpu.memory_space<vmem>>, vector<2x128xf32>,
      %cst_21 = arith.constant 0.000000e+00 : f32
      %20 = vector.broadcast %cst_21 : f32 to vector<2x128xf32>
      %c0_22 = arith.constant 0 : index
      %c0_23 = arith.constant 0 : index
      %21 = vector.load %arg23[%c0_22, %c0_23] : memref<2x128xf32, #tpu.memory_space<vmem>>, vector<2x128xf32>
      tpu.vector_store %arg23[%c0_22, %c0_23], %20 {strides = array<i32>} : memref<2x128xf32, #tpu.memory_space<vmem>>, vector<2x128xf32>,
      %c0_24 = arith.constant 0 : index
      %c0_25 = arith.constant 0 : index
      %c0_26 = arith.constant 0 : index
      %22 = vector.load %arg1[%c0_24, %c0_25, %c0_26] : memref<2x8x13xf32, #tpu.memory_space<vmem>>, vector<2x8x13xf32>
      %23 = arith.mulf %22, %22 : vector<2x8x13xf32>
      %cst_27 = arith.constant dense<0.000000e+00> : vector<2x13xf32>
      %24 = vector.multi_reduction <add>, %23, %cst_27 [1] : vector<2x8x13xf32> to vector<2x13xf32>
      %25 = vector.shape_cast %24 : vector<2x13xf32> to vector<2x1x13xf32>
      %cst_28 = arith.constant 1.000000e-24 : f32
      %26 = vector.broadcast %cst_28 : f32 to vector<2x1x13xf32>
      %27 = arith.maximumf %25, %26 : vector<2x1x13xf32>
      %28 = math.rsqrt %27 : vector<2x1x13xf32>
      %29 = vector.broadcast %28 : vector<2x1x13xf32> to vector<2x8x13xf32>
      %30 = arith.mulf %22, %29 : vector<2x8x13xf32>
      %31 = vector.extract_strided_slice %30 {offsets = [0, 0, 0], sizes = [2, 1, 13], strides = [1, 1, 1]} : vector<2x8x13xf32> to vector<2x1x13xf32>
      %32 = vector.shape_cast %31 : vector<2x1x13xf32> to vector<2x13xf32>
      %33 = vector.extract_strided_slice %30 {offsets = [0, 1, 0], sizes = [2, 1, 13], strides = [1, 1, 1]} : vector<2x8x13xf32> to vector<2x1x13xf32>
      %34 = vector.shape_cast %33 : vector<2x1x13xf32> to vector<2x13xf32>
      %35 = vector.extract_strided_slice %30 {offsets = [0, 2, 0], sizes = [2, 1, 13], strides = [1, 1, 1]} : vector<2x8x13xf32> to vector<2x1x13xf32>
      %36 = vector.shape_cast %35 : vector<2x1x13xf32> to vector<2x13xf32>
      %37 = vector.extract_strided_slice %30 {offsets = [0, 3, 0], sizes = [2, 1, 13], strides = [1, 1, 1]} : vector<2x8x13xf32> to vector<2x1x13xf32>
      %38 = vector.shape_cast %37 : vector<2x1x13xf32> to vector<2x13xf32>
      %39 = vector.extract_strided_slice %30 {offsets = [0, 4, 0], sizes = [2, 1, 13], strides = [1, 1, 1]} : vector<2x8x13xf32> to vector<2x1x13xf32>
      %40 = vector.shape_cast %39 : vector<2x1x13xf32> to vector<2x13xf32>
      %41 = vector.extract_strided_slice %30 {offsets = [0, 5, 0], sizes = [2, 1, 13], strides = [1, 1, 1]} : vector<2x8x13xf32> to vector<2x1x13xf32>
      %42 = vector.shape_cast %41 : vector<2x1x13xf32> to vector<2x13xf32>
      %43 = vector.extract_strided_slice %30 {offsets = [0, 6, 0], sizes = [2, 1, 13], strides = [1, 1, 1]} : vector<2x8x13xf32> to vector<2x1x13xf32>
      %44 = vector.shape_cast %43 : vector<2x1x13xf32> to vector<2x13xf32>
      %45 = vector.extract_strided_slice %30 {offsets = [0, 7, 0], sizes = [2, 1, 13], strides = [1, 1, 1]} : vector<2x8x13xf32> to vector<2x1x13xf32>
      %46 = vector.shape_cast %45 : vector<2x1x13xf32> to vector<2x13xf32>
      %47 = tpu.concatenate %32, %34, %36, %38, %40, %42, %44, %46 in 0 : vector<2x13xf32>, vector<2x13xf32>, vector<2x13xf32>, vector<2x13xf32>, vector<2x13xf32>, vector<2x13xf32>, vector<2x13xf32>, vector<2x13xf32> -> vector<16x13xf32>
      %c0_29 = arith.constant 0 : index
      %c0_30 = arith.constant 0 : index
      %48 = vector.load %arg4[%c0_29, %c0_30] : memref<13x192xf32, #tpu.memory_space<vmem>>, vector<13x192xf32>
      %cst_31 = arith.constant dense<0.000000e+00> : vector<16x192xf32>
      %49 = tpu.matmul %47, %48, %cst_31 {dimension_numbers = #tpu.dot_dimension_numbers<[1], [0], [0], [1], [0, 0, 1, 1], [], []>} : vector<16x13xf32>, vector<13x192xf32>, vector<16x192xf32> -> vector<16x192xf32>
      %c0_32 = arith.constant 0 : index
      %c0_33 = arith.constant 0 : index
      %50 = vector.load %arg6[%c0_32, %c0_33] : memref<1x192xf32, #tpu.memory_space<vmem>>, vector<1x192xf32>
      %51 = vector.broadcast %50 : vector<1x192xf32> to vector<16x192xf32>
      %52 = arith.addf %49, %51 : vector<16x192xf32>
      %c0_34 = arith.constant 0 : index
      %c0_35 = arith.constant 0 : index
      %53 = vector.load %arg5[%c0_34, %c0_35] : memref<64x192xf32, #tpu.memory_space<vmem>>, vector<64x192xf32>
      %c0_36 = arith.constant 0 : index
      %c0_37 = arith.constant 0 : index
      %54 = vector.load %arg7[%c0_36, %c0_37] : memref<1x64xf32, #tpu.memory_space<vmem>>, vector<1x64xf32>
      %55 = tpu.iota {dimensions = array<i32: 1>} : vector<2x192xi32>
      %c64_i32 = arith.constant 64 : i32
      %c0_i32_38 = arith.constant 0 : i32
      %56 = arith.cmpi eq, %c64_i32, %c0_i32_38 : i32
      %c1_i32_39 = arith.constant 1 : i32
      %57 = arith.select %56, %c1_i32_39, %c64_i32 : i32
      %58 = vector.broadcast %57 : i32 to vector<2x192xi32>
      %59 = arith.remsi %55, %58 : vector<2x192xi32>
      %c0_i32_40 = arith.constant 0 : i32
      %60 = vector.broadcast %c0_i32_40 : i32 to vector<2x192xi32>
      %61 = arith.cmpi ne, %59, %60 : vector<2x192xi32>
      %c0_i32_41 = arith.constant 0 : i32
      %62 = vector.broadcast %c0_i32_41 : i32 to vector<2x192xi32>
      %63 = arith.cmpi slt, %59, %62 : vector<2x192xi32>
      %c0_i32_42 = arith.constant 0 : i32
      %64 = arith.cmpi slt, %57, %c0_i32_42 : i32
      %65 = vector.broadcast %64 : i1 to vector<2x192xi1>
      %66 = vector.broadcast %65 : vector<2x192xi1> to vector<2x192xi1>
      %67 = arith.xori %63, %66 : vector<2x192xi1>
      %68 = arith.andi %67, %61 : vector<2x192xi1>
      %69 = vector.broadcast %57 : i32 to vector<2x192xi32>
      %70 = arith.addi %59, %69 : vector<2x192xi32>
      %71 = arith.select %68, %70, %59 : vector<2x192xi1>, vector<2x192xi32>
      %c32_i32 = arith.constant 32 : i32
      %72 = vector.broadcast %c32_i32 : i32 to vector<2x192xi32>
      %73 = arith.cmpi slt, %71, %72 : vector<2x192xi32>
      %74 = vector.shape_cast %54 : vector<1x64xf32> to vector<1x64xf32>
      %75 = vector.broadcast %74 : vector<1x64xf32> to vector<2x64xf32>
      %cst_43 = arith.constant 0.000000e+00 : f32
      %76 = vector.broadcast %cst_43 : f32 to vector<2x64xf32>
      %77 = vector.extract_strided_slice %52 {offsets = [0, 0], sizes = [2, 192], strides = [1, 1]} : vector<16x192xf32> to vector<2x192xf32>
      %78 = vector.extract_strided_slice %52 {offsets = [14, 0], sizes = [2, 192], strides = [1, 1]} : vector<16x192xf32> to vector<2x192xf32>
      %79 = arith.select %73, %77, %78 : vector<2x192xi1>, vector<2x192xf32>
      %cst_44 = arith.constant dense<0.000000e+00> : vector<2x192xf32>
      %80 = tpu.matmul %76, %53, %cst_44 {dimension_numbers = #tpu.dot_dimension_numbers<[1], [0], [0], [1], [0, 0, 1, 1], [], []>} : vector<2x64xf32>, vector<64x192xf32>, vector<2x192xf32> -> vector<2x192xf32>
      %81 = vector.extract_strided_slice %79 {offsets = [0, 0], sizes = [2, 128], strides = [1, 1]} : vector<2x192xf32> to vector<2x128xf32>
      %82 = vector.extract_strided_slice %80 {offsets = [0, 0], sizes = [2, 128], strides = [1, 1]} : vector<2x192xf32> to vector<2x128xf32>
      %83 = arith.addf %81, %82 : vector<2x128xf32>
      %84 = arith.negf %83 : vector<2x128xf32>
      %85 = math.exp %84 : vector<2x128xf32>
      %cst_45 = arith.constant 1.000000e+00 : f32
      %86 = vector.broadcast %cst_45 : f32 to vector<2x128xf32>
      %87 = arith.addf %86, %85 : vector<2x128xf32>
      %88 = arith.divf %86, %87 : vector<2x128xf32>
      %89 = vector.extract_strided_slice %88 {offsets = [0, 0], sizes = [2, 64], strides = [1, 1]} : vector<2x128xf32> to vector<2x64xf32>
      %90 = vector.extract_strided_slice %88 {offsets = [0, 64], sizes = [2, 64], strides = [1, 1]} : vector<2x128xf32> to vector<2x64xf32>
      %91 = vector.extract_strided_slice %79 {offsets = [0, 128], sizes = [2, 64], strides = [1, 1]} : vector<2x192xf32> to vector<2x64xf32>
      %92 = vector.extract_strided_slice %80 {offsets = [0, 128], sizes = [2, 64], strides = [1, 1]} : vector<2x192xf32> to vector<2x64xf32>
      %93 = arith.addf %92, %75 : vector<2x64xf32>
      %94 = arith.mulf %89, %93 : vector<2x64xf32>
      %95 = arith.addf %91, %94 : vector<2x64xf32>
      %96 = math.tanh %95 : vector<2x64xf32>
      %cst_46 = arith.constant 1.000000e+00 : f32
      %97 = vector.broadcast %cst_46 : f32 to vector<2x64xf32>
      %98 = arith.subf %97, %90 : vector<2x64xf32>
      %99 = arith.mulf %98, %96 : vector<2x64xf32>
      %100 = arith.mulf %90, %76 : vector<2x64xf32>
      %101 = arith.addf %99, %100 : vector<2x64xf32>
      %102 = vector.extract_strided_slice %101 {offsets = [0, 0], sizes = [2, 32], strides = [1, 1]} : vector<2x64xf32> to vector<2x32xf32>
      %c0_47 = arith.constant 0 : index
      %c0_48 = arith.constant 0 : index
      %103 = vector.load %arg25[%c0_47, %c0_48] : memref<16x32xf32, #tpu.memory_space<vmem>>, vector<2x32xf32>
      tpu.vector_store %arg25[%c0_47, %c0_48], %102 {strides = array<i32>} : memref<16x32xf32, #tpu.memory_space<vmem>>, vector<2x32xf32>,
      %104 = vector.extract_strided_slice %101 {offsets = [0, 32], sizes = [2, 32], strides = [1, 1]} : vector<2x64xf32> to vector<2x32xf32>
      %c14 = arith.constant 14 : index
      %c0_49 = arith.constant 0 : index
      %105 = vector.load %arg26[%c14, %c0_49] : memref<16x32xf32, #tpu.memory_space<vmem>>, vector<2x32xf32>
      tpu.vector_store %arg26[%c14, %c0_49], %104 {strides = array<i32>} : memref<16x32xf32, #tpu.memory_space<vmem>>, vector<2x32xf32>,
      %106 = vector.extract_strided_slice %52 {offsets = [2, 0], sizes = [2, 192], strides = [1, 1]} : vector<16x192xf32> to vector<2x192xf32>
      %107 = vector.extract_strided_slice %52 {offsets = [12, 0], sizes = [2, 192], strides = [1, 1]} : vector<16x192xf32> to vector<2x192xf32>
      %108 = arith.select %73, %106, %107 : vector<2x192xi1>, vector<2x192xf32>
      %cst_50 = arith.constant dense<0.000000e+00> : vector<2x192xf32>
      %109 = tpu.matmul %101, %53, %cst_50 {dimension_numbers = #tpu.dot_dimension_numbers<[1], [0], [0], [1], [0, 0, 1, 1], [], []>} : vector<2x64xf32>, vector<64x192xf32>, vector<2x192xf32> -> vector<2x192xf32>
      %110 = vector.extract_strided_slice %108 {offsets = [0, 0], sizes = [2, 128], strides = [1, 1]} : vector<2x192xf32> to vector<2x128xf32>
      %111 = vector.extract_strided_slice %109 {offsets = [0, 0], sizes = [2, 128], strides = [1, 1]} : vector<2x192xf32> to vector<2x128xf32>
      %112 = arith.addf %110, %111 : vector<2x128xf32>
      %113 = arith.negf %112 : vector<2x128xf32>
      %114 = math.exp %113 : vector<2x128xf32>
      %cst_51 = arith.constant 1.000000e+00 : f32
      %115 = vector.broadcast %cst_51 : f32 to vector<2x128xf32>
      %116 = arith.addf %115, %114 : vector<2x128xf32>
      %117 = arith.divf %115, %116 : vector<2x128xf32>
      %118 = vector.extract_strided_slice %117 {offsets = [0, 0], sizes = [2, 64], strides = [1, 1]} : vector<2x128xf32> to vector<2x64xf32>
      %119 = vector.extract_strided_slice %117 {offsets = [0, 64], sizes = [2, 64], strides = [1, 1]} : vector<2x128xf32> to vector<2x64xf32>
      %120 = vector.extract_strided_slice %108 {offsets = [0, 128], sizes = [2, 64], strides = [1, 1]} : vector<2x192xf32> to vector<2x64xf32>
      %121 = vector.extract_strided_slice %109 {offsets = [0, 128], sizes = [2, 64], strides = [1, 1]} : vector<2x192xf32> to vector<2x64xf32>
      %122 = arith.addf %121, %75 : vector<2x64xf32>
      %123 = arith.mulf %118, %122 : vector<2x64xf32>
      %124 = arith.addf %120, %123 : vector<2x64xf32>
      %125 = math.tanh %124 : vector<2x64xf32>
      %cst_52 = arith.constant 1.000000e+00 : f32
      %126 = vector.broadcast %cst_52 : f32 to vector<2x64xf32>
      %127 = arith.subf %126, %119 : vector<2x64xf32>
      %128 = arith.mulf %127, %125 : vector<2x64xf32>
      %129 = arith.mulf %119, %101 : vector<2x64xf32>
      %130 = arith.addf %128, %129 : vector<2x64xf32>
      %131 = vector.extract_strided_slice %130 {offsets = [0, 0], sizes = [2, 32], strides = [1, 1]} : vector<2x64xf32> to vector<2x32xf32>
      %c2 = arith.constant 2 : index
      %c0_53 = arith.constant 0 : index
      %132 = vector.load %arg25[%c2, %c0_53] : memref<16x32xf32, #tpu.memory_space<vmem>>, vector<2x32xf32>
      tpu.vector_store %arg25[%c2, %c0_53], %131 {strides = array<i32>} : memref<16x32xf32, #tpu.memory_space<vmem>>, vector<2x32xf32>,
      %133 = vector.extract_strided_slice %130 {offsets = [0, 32], sizes = [2, 32], strides = [1, 1]} : vector<2x64xf32> to vector<2x32xf32>
      %c12 = arith.constant 12 : index
      %c0_54 = arith.constant 0 : index
      %134 = vector.load %arg26[%c12, %c0_54] : memref<16x32xf32, #tpu.memory_space<vmem>>, vector<2x32xf32>
      tpu.vector_store %arg26[%c12, %c0_54], %133 {strides = array<i32>} : memref<16x32xf32, #tpu.memory_space<vmem>>, vector<2x32xf32>,
      %135 = vector.extract_strided_slice %52 {offsets = [4, 0], sizes = [2, 192], strides = [1, 1]} : vector<16x192xf32> to vector<2x192xf32>
      %136 = vector.extract_strided_slice %52 {offsets = [10, 0], sizes = [2, 192], strides = [1, 1]} : vector<16x192xf32> to vector<2x192xf32>
      %137 = arith.select %73, %135, %136 : vector<2x192xi1>, vector<2x192xf32>
      %cst_55 = arith.constant dense<0.000000e+00> : vector<2x192xf32>
      %138 = tpu.matmul %130, %53, %cst_55 {dimension_numbers = #tpu.dot_dimension_numbers<[1], [0], [0], [1], [0, 0, 1, 1], [], []>} : vector<2x64xf32>, vector<64x192xf32>, vector<2x192xf32> -> vector<2x192xf32>
      %139 = vector.extract_strided_slice %137 {offsets = [0, 0], sizes = [2, 128], strides = [1, 1]} : vector<2x192xf32> to vector<2x128xf32>
      %140 = vector.extract_strided_slice %138 {offsets = [0, 0], sizes = [2, 128], strides = [1, 1]} : vector<2x192xf32> to vector<2x128xf32>
      %141 = arith.addf %139, %140 : vector<2x128xf32>
      %142 = arith.negf %141 : vector<2x128xf32>
      %143 = math.exp %142 : vector<2x128xf32>
      %cst_56 = arith.constant 1.000000e+00 : f32
      %144 = vector.broadcast %cst_56 : f32 to vector<2x128xf32>
      %145 = arith.addf %144, %143 : vector<2x128xf32>
      %146 = arith.divf %144, %145 : vector<2x128xf32>
      %147 = vector.extract_strided_slice %146 {offsets = [0, 0], sizes = [2, 64], strides = [1, 1]} : vector<2x128xf32> to vector<2x64xf32>
      %148 = vector.extract_strided_slice %146 {offsets = [0, 64], sizes = [2, 64], strides = [1, 1]} : vector<2x128xf32> to vector<2x64xf32>
      %149 = vector.extract_strided_slice %137 {offsets = [0, 128], sizes = [2, 64], strides = [1, 1]} : vector<2x192xf32> to vector<2x64xf32>
      %150 = vector.extract_strided_slice %138 {offsets = [0, 128], sizes = [2, 64], strides = [1, 1]} : vector<2x192xf32> to vector<2x64xf32>
      %151 = arith.addf %150, %75 : vector<2x64xf32>
      %152 = arith.mulf %147, %151 : vector<2x64xf32>
      %153 = arith.addf %149, %152 : vector<2x64xf32>
      %154 = math.tanh %153 : vector<2x64xf32>
      %cst_57 = arith.constant 1.000000e+00 : f32
      %155 = vector.broadcast %cst_57 : f32 to vector<2x64xf32>
      %156 = arith.subf %155, %148 : vector<2x64xf32>
      %157 = arith.mulf %156, %154 : vector<2x64xf32>
      %158 = arith.mulf %148, %130 : vector<2x64xf32>
      %159 = arith.addf %157, %158 : vector<2x64xf32>
      %160 = vector.extract_strided_slice %159 {offsets = [0, 0], sizes = [2, 32], strides = [1, 1]} : vector<2x64xf32> to vector<2x32xf32>
      %c4 = arith.constant 4 : index
      %c0_58 = arith.constant 0 : index
      %161 = vector.load %arg25[%c4, %c0_58] : memref<16x32xf32, #tpu.memory_space<vmem>>, vector<2x32xf32>
      tpu.vector_store %arg25[%c4, %c0_58], %160 {strides = array<i32>} : memref<16x32xf32, #tpu.memory_space<vmem>>, vector<2x32xf32>,
      %162 = vector.extract_strided_slice %159 {offsets = [0, 32], sizes = [2, 32], strides = [1, 1]} : vector<2x64xf32> to vector<2x32xf32>
      %c10 = arith.constant 10 : index
      %c0_59 = arith.constant 0 : index
      %163 = vector.load %arg26[%c10, %c0_59] : memref<16x32xf32, #tpu.memory_space<vmem>>, vector<2x32xf32>
      tpu.vector_store %arg26[%c10, %c0_59], %162 {strides = array<i32>} : memref<16x32xf32, #tpu.memory_space<vmem>>, vector<2x32xf32>,
      %164 = vector.extract_strided_slice %52 {offsets = [6, 0], sizes = [2, 192], strides = [1, 1]} : vector<16x192xf32> to vector<2x192xf32>
      %165 = vector.extract_strided_slice %52 {offsets = [8, 0], sizes = [2, 192], strides = [1, 1]} : vector<16x192xf32> to vector<2x192xf32>
      %166 = arith.select %73, %164, %165 : vector<2x192xi1>, vector<2x192xf32>
      %cst_60 = arith.constant dense<0.000000e+00> : vector<2x192xf32>
      %167 = tpu.matmul %159, %53, %cst_60 {dimension_numbers = #tpu.dot_dimension_numbers<[1], [0], [0], [1], [0, 0, 1, 1], [], []>} : vector<2x64xf32>, vector<64x192xf32>, vector<2x192xf32> -> vector<2x192xf32>
      %168 = vector.extract_strided_slice %166 {offsets = [0, 0], sizes = [2, 128], strides = [1, 1]} : vector<2x192xf32> to vector<2x128xf32>
      %169 = vector.extract_strided_slice %167 {offsets = [0, 0], sizes = [2, 128], strides = [1, 1]} : vector<2x192xf32> to vector<2x128xf32>
      %170 = arith.addf %168, %169 : vector<2x128xf32>
      %171 = arith.negf %170 : vector<2x128xf32>
      %172 = math.exp %171 : vector<2x128xf32>
      %cst_61 = arith.constant 1.000000e+00 : f32
      %173 = vector.broadcast %cst_61 : f32 to vector<2x128xf32>
      %174 = arith.addf %173, %172 : vector<2x128xf32>
      %175 = arith.divf %173, %174 : vector<2x128xf32>
      %176 = vector.extract_strided_slice %175 {offsets = [0, 0], sizes = [2, 64], strides = [1, 1]} : vector<2x128xf32> to vector<2x64xf32>
      %177 = vector.extract_strided_slice %175 {offsets = [0, 64], sizes = [2, 64], strides = [1, 1]} : vector<2x128xf32> to vector<2x64xf32>
      %178 = vector.extract_strided_slice %166 {offsets = [0, 128], sizes = [2, 64], strides = [1, 1]} : vector<2x192xf32> to vector<2x64xf32>
      %179 = vector.extract_strided_slice %167 {offsets = [0, 128], sizes = [2, 64], strides = [1, 1]} : vector<2x192xf32> to vector<2x64xf32>
      %180 = arith.addf %179, %75 : vector<2x64xf32>
      %181 = arith.mulf %176, %180 : vector<2x64xf32>
      %182 = arith.addf %178, %181 : vector<2x64xf32>
      %183 = math.tanh %182 : vector<2x64xf32>
      %cst_62 = arith.constant 1.000000e+00 : f32
      %184 = vector.broadcast %cst_62 : f32 to vector<2x64xf32>
      %185 = arith.subf %184, %177 : vector<2x64xf32>
      %186 = arith.mulf %185, %183 : vector<2x64xf32>
      %187 = arith.mulf %177, %159 : vector<2x64xf32>
      %188 = arith.addf %186, %187 : vector<2x64xf32>
      %189 = vector.extract_strided_slice %188 {offsets = [0, 0], sizes = [2, 32], strides = [1, 1]} : vector<2x64xf32> to vector<2x32xf32>
      %c6 = arith.constant 6 : index
      %c0_63 = arith.constant 0 : index
      %190 = vector.load %arg25[%c6, %c0_63] : memref<16x32xf32, #tpu.memory_space<vmem>>, vector<2x32xf32>
      tpu.vector_store %arg25[%c6, %c0_63], %189 {strides = array<i32>} : memref<16x32xf32, #tpu.memory_space<vmem>>, vector<2x32xf32>,
      %191 = vector.extract_strided_slice %188 {offsets = [0, 32], sizes = [2, 32], strides = [1, 1]} : vector<2x64xf32> to vector<2x32xf32>
      %c8 = arith.constant 8 : index
      %c0_64 = arith.constant 0 : index
      %192 = vector.load %arg26[%c8, %c0_64] : memref<16x32xf32, #tpu.memory_space<vmem>>, vector<2x32xf32>
      tpu.vector_store %arg26[%c8, %c0_64], %191 {strides = array<i32>} : memref<16x32xf32, #tpu.memory_space<vmem>>, vector<2x32xf32>,
      %193 = vector.extract_strided_slice %52 {offsets = [8, 0], sizes = [2, 192], strides = [1, 1]} : vector<16x192xf32> to vector<2x192xf32>
      %194 = vector.extract_strided_slice %52 {offsets = [6, 0], sizes = [2, 192], strides = [1, 1]} : vector<16x192xf32> to vector<2x192xf32>
      %195 = arith.select %73, %193, %194 : vector<2x192xi1>, vector<2x192xf32>
      %cst_65 = arith.constant dense<0.000000e+00> : vector<2x192xf32>
      %196 = tpu.matmul %188, %53, %cst_65 {dimension_numbers = #tpu.dot_dimension_numbers<[1], [0], [0], [1], [0, 0, 1, 1], [], []>} : vector<2x64xf32>, vector<64x192xf32>, vector<2x192xf32> -> vector<2x192xf32>
      %197 = vector.extract_strided_slice %195 {offsets = [0, 0], sizes = [2, 128], strides = [1, 1]} : vector<2x192xf32> to vector<2x128xf32>
      %198 = vector.extract_strided_slice %196 {offsets = [0, 0], sizes = [2, 128], strides = [1, 1]} : vector<2x192xf32> to vector<2x128xf32>
      %199 = arith.addf %197, %198 : vector<2x128xf32>
      %200 = arith.negf %199 : vector<2x128xf32>
      %201 = math.exp %200 : vector<2x128xf32>
      %cst_66 = arith.constant 1.000000e+00 : f32
      %202 = vector.broadcast %cst_66 : f32 to vector<2x128xf32>
      %203 = arith.addf %202, %201 : vector<2x128xf32>
      %204 = arith.divf %202, %203 : vector<2x128xf32>
      %205 = vector.extract_strided_slice %204 {offsets = [0, 0], sizes = [2, 64], strides = [1, 1]} : vector<2x128xf32> to vector<2x64xf32>
      %206 = vector.extract_strided_slice %204 {offsets = [0, 64], sizes = [2, 64], strides = [1, 1]} : vector<2x128xf32> to vector<2x64xf32>
      %207 = vector.extract_strided_slice %195 {offsets = [0, 128], sizes = [2, 64], strides = [1, 1]} : vector<2x192xf32> to vector<2x64xf32>
      %208 = vector.extract_strided_slice %196 {offsets = [0, 128], sizes = [2, 64], strides = [1, 1]} : vector<2x192xf32> to vector<2x64xf32>
      %209 = arith.addf %208, %75 : vector<2x64xf32>
      %210 = arith.mulf %205, %209 : vector<2x64xf32>
      %211 = arith.addf %207, %210 : vector<2x64xf32>
      %212 = math.tanh %211 : vector<2x64xf32>
      %cst_67 = arith.constant 1.000000e+00 : f32
      %213 = vector.broadcast %cst_67 : f32 to vector<2x64xf32>
      %214 = arith.subf %213, %206 : vector<2x64xf32>
      %215 = arith.mulf %214, %212 : vector<2x64xf32>
      %216 = arith.mulf %206, %188 : vector<2x64xf32>
      %217 = arith.addf %215, %216 : vector<2x64xf32>
      %218 = vector.extract_strided_slice %217 {offsets = [0, 0], sizes = [2, 32], strides = [1, 1]} : vector<2x64xf32> to vector<2x32xf32>
      %c8_68 = arith.constant 8 : index
      %c0_69 = arith.constant 0 : index
      %219 = vector.load %arg25[%c8_68, %c0_69] : memref<16x32xf32, #tpu.memory_space<vmem>>, vector<2x32xf32>
      tpu.vector_store %arg25[%c8_68, %c0_69], %218 {strides = array<i32>} : memref<16x32xf32, #tpu.memory_space<vmem>>, vector<2x32xf32>,
      %220 = vector.extract_strided_slice %217 {offsets = [0, 32], sizes = [2, 32], strides = [1, 1]} : vector<2x64xf32> to vector<2x32xf32>
      %c6_70 = arith.constant 6 : index
      %c0_71 = arith.constant 0 : index
      %221 = vector.load %arg26[%c6_70, %c0_71] : memref<16x32xf32, #tpu.memory_space<vmem>>, vector<2x32xf32>
      tpu.vector_store %arg26[%c6_70, %c0_71], %220 {strides = array<i32>} : memref<16x32xf32, #tpu.memory_space<vmem>>, vector<2x32xf32>,
      %222 = vector.extract_strided_slice %52 {offsets = [10, 0], sizes = [2, 192], strides = [1, 1]} : vector<16x192xf32> to vector<2x192xf32>
      %223 = vector.extract_strided_slice %52 {offsets = [4, 0], sizes = [2, 192], strides = [1, 1]} : vector<16x192xf32> to vector<2x192xf32>
      %224 = arith.select %73, %222, %223 : vector<2x192xi1>, vector<2x192xf32>
      %cst_72 = arith.constant dense<0.000000e+00> : vector<2x192xf32>
      %225 = tpu.matmul %217, %53, %cst_72 {dimension_numbers = #tpu.dot_dimension_numbers<[1], [0], [0], [1], [0, 0, 1, 1], [], []>} : vector<2x64xf32>, vector<64x192xf32>, vector<2x192xf32> -> vector<2x192xf32>
      %226 = vector.extract_strided_slice %224 {offsets = [0, 0], sizes = [2, 128], strides = [1, 1]} : vector<2x192xf32> to vector<2x128xf32>
      %227 = vector.extract_strided_slice %225 {offsets = [0, 0], sizes = [2, 128], strides = [1, 1]} : vector<2x192xf32> to vector<2x128xf32>
      %228 = arith.addf %226, %227 : vector<2x128xf32>
      %229 = arith.negf %228 : vector<2x128xf32>
      %230 = math.exp %229 : vector<2x128xf32>
      %cst_73 = arith.constant 1.000000e+00 : f32
      %231 = vector.broadcast %cst_73 : f32 to vector<2x128xf32>
      %232 = arith.addf %231, %230 : vector<2x128xf32>
      %233 = arith.divf %231, %232 : vector<2x128xf32>
      %234 = vector.extract_strided_slice %233 {offsets = [0, 0], sizes = [2, 64], strides = [1, 1]} : vector<2x128xf32> to vector<2x64xf32>
      %235 = vector.extract_strided_slice %233 {offsets = [0, 64], sizes = [2, 64], strides = [1, 1]} : vector<2x128xf32> to vector<2x64xf32>
      %236 = vector.extract_strided_slice %224 {offsets = [0, 128], sizes = [2, 64], strides = [1, 1]} : vector<2x192xf32> to vector<2x64xf32>
      %237 = vector.extract_strided_slice %225 {offsets = [0, 128], sizes = [2, 64], strides = [1, 1]} : vector<2x192xf32> to vector<2x64xf32>
      %238 = arith.addf %237, %75 : vector<2x64xf32>
      %239 = arith.mulf %234, %238 : vector<2x64xf32>
      %240 = arith.addf %236, %239 : vector<2x64xf32>
      %241 = math.tanh %240 : vector<2x64xf32>
      %cst_74 = arith.constant 1.000000e+00 : f32
      %242 = vector.broadcast %cst_74 : f32 to vector<2x64xf32>
      %243 = arith.subf %242, %235 : vector<2x64xf32>
      %244 = arith.mulf %243, %241 : vector<2x64xf32>
      %245 = arith.mulf %235, %217 : vector<2x64xf32>
      %246 = arith.addf %244, %245 : vector<2x64xf32>
      %247 = vector.extract_strided_slice %246 {offsets = [0, 0], sizes = [2, 32], strides = [1, 1]} : vector<2x64xf32> to vector<2x32xf32>
      %c10_75 = arith.constant 10 : index
      %c0_76 = arith.constant 0 : index
      %248 = vector.load %arg25[%c10_75, %c0_76] : memref<16x32xf32, #tpu.memory_space<vmem>>, vector<2x32xf32>
      tpu.vector_store %arg25[%c10_75, %c0_76], %247 {strides = array<i32>} : memref<16x32xf32, #tpu.memory_space<vmem>>, vector<2x32xf32>,
      %249 = vector.extract_strided_slice %246 {offsets = [0, 32], sizes = [2, 32], strides = [1, 1]} : vector<2x64xf32> to vector<2x32xf32>
      %c4_77 = arith.constant 4 : index
      %c0_78 = arith.constant 0 : index
      %250 = vector.load %arg26[%c4_77, %c0_78] : memref<16x32xf32, #tpu.memory_space<vmem>>, vector<2x32xf32>
      tpu.vector_store %arg26[%c4_77, %c0_78], %249 {strides = array<i32>} : memref<16x32xf32, #tpu.memory_space<vmem>>, vector<2x32xf32>,
      %251 = vector.extract_strided_slice %52 {offsets = [12, 0], sizes = [2, 192], strides = [1, 1]} : vector<16x192xf32> to vector<2x192xf32>
      %252 = vector.extract_strided_slice %52 {offsets = [2, 0], sizes = [2, 192], strides = [1, 1]} : vector<16x192xf32> to vector<2x192xf32>
      %253 = arith.select %73, %251, %252 : vector<2x192xi1>, vector<2x192xf32>
      %cst_79 = arith.constant dense<0.000000e+00> : vector<2x192xf32>
      %254 = tpu.matmul %246, %53, %cst_79 {dimension_numbers = #tpu.dot_dimension_numbers<[1], [0], [0], [1], [0, 0, 1, 1], [], []>} : vector<2x64xf32>, vector<64x192xf32>, vector<2x192xf32> -> vector<2x192xf32>
      %255 = vector.extract_strided_slice %253 {offsets = [0, 0], sizes = [2, 128], strides = [1, 1]} : vector<2x192xf32> to vector<2x128xf32>
      %256 = vector.extract_strided_slice %254 {offsets = [0, 0], sizes = [2, 128], strides = [1, 1]} : vector<2x192xf32> to vector<2x128xf32>
      %257 = arith.addf %255, %256 : vector<2x128xf32>
      %258 = arith.negf %257 : vector<2x128xf32>
      %259 = math.exp %258 : vector<2x128xf32>
      %cst_80 = arith.constant 1.000000e+00 : f32
      %260 = vector.broadcast %cst_80 : f32 to vector<2x128xf32>
      %261 = arith.addf %260, %259 : vector<2x128xf32>
      %262 = arith.divf %260, %261 : vector<2x128xf32>
      %263 = vector.extract_strided_slice %262 {offsets = [0, 0], sizes = [2, 64], strides = [1, 1]} : vector<2x128xf32> to vector<2x64xf32>
      %264 = vector.extract_strided_slice %262 {offsets = [0, 64], sizes = [2, 64], strides = [1, 1]} : vector<2x128xf32> to vector<2x64xf32>
      %265 = vector.extract_strided_slice %253 {offsets = [0, 128], sizes = [2, 64], strides = [1, 1]} : vector<2x192xf32> to vector<2x64xf32>
      %266 = vector.extract_strided_slice %254 {offsets = [0, 128], sizes = [2, 64], strides = [1, 1]} : vector<2x192xf32> to vector<2x64xf32>
      %267 = arith.addf %266, %75 : vector<2x64xf32>
      %268 = arith.mulf %263, %267 : vector<2x64xf32>
      %269 = arith.addf %265, %268 : vector<2x64xf32>
      %270 = math.tanh %269 : vector<2x64xf32>
      %cst_81 = arith.constant 1.000000e+00 : f32
      %271 = vector.broadcast %cst_81 : f32 to vector<2x64xf32>
      %272 = arith.subf %271, %264 : vector<2x64xf32>
      %273 = arith.mulf %272, %270 : vector<2x64xf32>
      %274 = arith.mulf %264, %246 : vector<2x64xf32>
      %275 = arith.addf %273, %274 : vector<2x64xf32>
      %276 = vector.extract_strided_slice %275 {offsets = [0, 0], sizes = [2, 32], strides = [1, 1]} : vector<2x64xf32> to vector<2x32xf32>
      %c12_82 = arith.constant 12 : index
      %c0_83 = arith.constant 0 : index
      %277 = vector.load %arg25[%c12_82, %c0_83] : memref<16x32xf32, #tpu.memory_space<vmem>>, vector<2x32xf32>
      tpu.vector_store %arg25[%c12_82, %c0_83], %276 {strides = array<i32>} : memref<16x32xf32, #tpu.memory_space<vmem>>, vector<2x32xf32>,
      %278 = vector.extract_strided_slice %275 {offsets = [0, 32], sizes = [2, 32], strides = [1, 1]} : vector<2x64xf32> to vector<2x32xf32>
      %c2_84 = arith.constant 2 : index
      %c0_85 = arith.constant 0 : index
      %279 = vector.load %arg26[%c2_84, %c0_85] : memref<16x32xf32, #tpu.memory_space<vmem>>, vector<2x32xf32>
      tpu.vector_store %arg26[%c2_84, %c0_85], %278 {strides = array<i32>} : memref<16x32xf32, #tpu.memory_space<vmem>>, vector<2x32xf32>,
      %280 = vector.extract_strided_slice %52 {offsets = [14, 0], sizes = [2, 192], strides = [1, 1]} : vector<16x192xf32> to vector<2x192xf32>
      %281 = vector.extract_strided_slice %52 {offsets = [0, 0], sizes = [2, 192], strides = [1, 1]} : vector<16x192xf32> to vector<2x192xf32>
      %282 = arith.select %73, %280, %281 : vector<2x192xi1>, vector<2x192xf32>
      %cst_86 = arith.constant dense<0.000000e+00> : vector<2x192xf32>
      %283 = tpu.matmul %275, %53, %cst_86 {dimension_numbers = #tpu.dot_dimension_numbers<[1], [0], [0], [1], [0, 0, 1, 1], [], []>} : vector<2x64xf32>, vector<64x192xf32>, vector<2x192xf32> -> vector<2x192xf32>
      %284 = vector.extract_strided_slice %282 {offsets = [0, 0], sizes = [2, 128], strides = [1, 1]} : vector<2x192xf32> to vector<2x128xf32>
      %285 = vector.extract_strided_slice %283 {offsets = [0, 0], sizes = [2, 128], strides = [1, 1]} : vector<2x192xf32> to vector<2x128xf32>
      %286 = arith.addf %284, %285 : vector<2x128xf32>
      %287 = arith.negf %286 : vector<2x128xf32>
      %288 = math.exp %287 : vector<2x128xf32>
      %cst_87 = arith.constant 1.000000e+00 : f32
      %289 = vector.broadcast %cst_87 : f32 to vector<2x128xf32>
      %290 = arith.addf %289, %288 : vector<2x128xf32>
      %291 = arith.divf %289, %290 : vector<2x128xf32>
      %292 = vector.extract_strided_slice %291 {offsets = [0, 0], sizes = [2, 64], strides = [1, 1]} : vector<2x128xf32> to vector<2x64xf32>
      %293 = vector.extract_strided_slice %291 {offsets = [0, 64], sizes = [2, 64], strides = [1, 1]} : vector<2x128xf32> to vector<2x64xf32>
      %294 = vector.extract_strided_slice %282 {offsets = [0, 128], sizes = [2, 64], strides = [1, 1]} : vector<2x192xf32> to vector<2x64xf32>
      %295 = vector.extract_strided_slice %283 {offsets = [0, 128], sizes = [2, 64], strides = [1, 1]} : vector<2x192xf32> to vector<2x64xf32>
      %296 = arith.addf %295, %75 : vector<2x64xf32>
      %297 = arith.mulf %292, %296 : vector<2x64xf32>
      %298 = arith.addf %294, %297 : vector<2x64xf32>
      %299 = math.tanh %298 : vector<2x64xf32>
      %cst_88 = arith.constant 1.000000e+00 : f32
      %300 = vector.broadcast %cst_88 : f32 to vector<2x64xf32>
      %301 = arith.subf %300, %293 : vector<2x64xf32>
      %302 = arith.mulf %301, %299 : vector<2x64xf32>
      %303 = arith.mulf %293, %275 : vector<2x64xf32>
      %304 = arith.addf %302, %303 : vector<2x64xf32>
      %305 = vector.extract_strided_slice %304 {offsets = [0, 0], sizes = [2, 32], strides = [1, 1]} : vector<2x64xf32> to vector<2x32xf32>
      %c14_89 = arith.constant 14 : index
      %c0_90 = arith.constant 0 : index
      %306 = vector.load %arg25[%c14_89, %c0_90] : memref<16x32xf32, #tpu.memory_space<vmem>>, vector<2x32xf32>
      tpu.vector_store %arg25[%c14_89, %c0_90], %305 {strides = array<i32>} : memref<16x32xf32, #tpu.memory_space<vmem>>, vector<2x32xf32>,
      %307 = vector.extract_strided_slice %304 {offsets = [0, 32], sizes = [2, 32], strides = [1, 1]} : vector<2x64xf32> to vector<2x32xf32>
      %c0_91 = arith.constant 0 : index
      %c0_92 = arith.constant 0 : index
      %308 = vector.load %arg26[%c0_91, %c0_92] : memref<16x32xf32, #tpu.memory_space<vmem>>, vector<2x32xf32>
      tpu.vector_store %arg26[%c0_91, %c0_92], %307 {strides = array<i32>} : memref<16x32xf32, #tpu.memory_space<vmem>>, vector<2x32xf32>,
      %c0_93 = arith.constant 0 : index
      %c0_94 = arith.constant 0 : index
      %309 = vector.load %arg25[%c0_93, %c0_94] : memref<16x32xf32, #tpu.memory_space<vmem>>, vector<16x32xf32>
      %c0_95 = arith.constant 0 : index
      %c0_96 = arith.constant 0 : index
      %310 = vector.load %arg8[%c0_95, %c0_96] : memref<32x192xf32, #tpu.memory_space<vmem>>, vector<32x192xf32>
      %cst_97 = arith.constant dense<0.000000e+00> : vector<16x192xf32>
      %311 = tpu.matmul %309, %310, %cst_97 {dimension_numbers = #tpu.dot_dimension_numbers<[1], [0], [0], [1], [0, 0, 1, 1], [], []>} : vector<16x32xf32>, vector<32x192xf32>, vector<16x192xf32> -> vector<16x192xf32>
      %c0_98 = arith.constant 0 : index
      %c0_99 = arith.constant 0 : index
      %312 = vector.load %arg26[%c0_98, %c0_99] : memref<16x32xf32, #tpu.memory_space<vmem>>, vector<16x32xf32>
      %c0_100 = arith.constant 0 : index
      %c0_101 = arith.constant 0 : index
      %313 = vector.load %arg9[%c0_100, %c0_101] : memref<32x192xf32, #tpu.memory_space<vmem>>, vector<32x192xf32>
      %cst_102 = arith.constant dense<0.000000e+00> : vector<16x192xf32>
      %314 = tpu.matmul %312, %313, %cst_102 {dimension_numbers = #tpu.dot_dimension_numbers<[1], [0], [0], [1], [0, 0, 1, 1], [], []>} : vector<16x32xf32>, vector<32x192xf32>, vector<16x192xf32> -> vector<16x192xf32>
      %315 = arith.addf %311, %314 : vector<16x192xf32>
      %c0_103 = arith.constant 0 : index
      %c0_104 = arith.constant 0 : index
      %316 = vector.load %arg11[%c0_103, %c0_104] : memref<1x192xf32, #tpu.memory_space<vmem>>, vector<1x192xf32>
      %317 = vector.broadcast %316 : vector<1x192xf32> to vector<16x192xf32>
      %318 = arith.addf %315, %317 : vector<16x192xf32>
      %c0_105 = arith.constant 0 : index
      %c0_106 = arith.constant 0 : index
      %319 = vector.load %arg14[%c0_105, %c0_106] : memref<1x128xf32, #tpu.memory_space<vmem>>, vector<1x128xf32>
      %320 = vector.shape_cast %319 : vector<1x128xf32> to vector<1x128xf32>
      %321 = vector.broadcast %320 : vector<1x128xf32> to vector<2x128xf32>
      %c0_107 = arith.constant 0 : index
      %c0_108 = arith.constant 0 : index
      %322 = vector.load %arg10[%c0_107, %c0_108] : memref<64x192xf32, #tpu.memory_space<vmem>>, vector<64x192xf32>
      %c0_109 = arith.constant 0 : index
      %c0_110 = arith.constant 0 : index
      %323 = vector.load %arg12[%c0_109, %c0_110] : memref<1x64xf32, #tpu.memory_space<vmem>>, vector<1x64xf32>
      %324 = tpu.iota {dimensions = array<i32: 1>} : vector<2x192xi32>
      %c64_i32_111 = arith.constant 64 : i32
      %c0_i32_112 = arith.constant 0 : i32
      %325 = arith.cmpi eq, %c64_i32_111, %c0_i32_112 : i32
      %c1_i32_113 = arith.constant 1 : i32
      %326 = arith.select %325, %c1_i32_113, %c64_i32_111 : i32
      %327 = vector.broadcast %326 : i32 to vector<2x192xi32>
      %328 = arith.remsi %324, %327 : vector<2x192xi32>
      %c0_i32_114 = arith.constant 0 : i32
      %329 = vector.broadcast %c0_i32_114 : i32 to vector<2x192xi32>
      %330 = arith.cmpi ne, %328, %329 : vector<2x192xi32>
      %c0_i32_115 = arith.constant 0 : i32
      %331 = vector.broadcast %c0_i32_115 : i32 to vector<2x192xi32>
      %332 = arith.cmpi slt, %328, %331 : vector<2x192xi32>
      %c0_i32_116 = arith.constant 0 : i32
      %333 = arith.cmpi slt, %326, %c0_i32_116 : i32
      %334 = vector.broadcast %333 : i1 to vector<2x192xi1>
      %335 = vector.broadcast %334 : vector<2x192xi1> to vector<2x192xi1>
      %336 = arith.xori %332, %335 : vector<2x192xi1>
      %337 = arith.andi %336, %330 : vector<2x192xi1>
      %338 = vector.broadcast %326 : i32 to vector<2x192xi32>
      %339 = arith.addi %328, %338 : vector<2x192xi32>
      %340 = arith.select %337, %339, %328 : vector<2x192xi1>, vector<2x192xi32>
      %c32_i32_117 = arith.constant 32 : i32
      %341 = vector.broadcast %c32_i32_117 : i32 to vector<2x192xi32>
      %342 = arith.cmpi slt, %340, %341 : vector<2x192xi32>
      %343 = vector.shape_cast %323 : vector<1x64xf32> to vector<1x64xf32>
      %344 = vector.broadcast %343 : vector<1x64xf32> to vector<2x64xf32>
      %cst_118 = arith.constant 0.000000e+00 : f32
      %345 = vector.broadcast %cst_118 : f32 to vector<2x64xf32>
      %346 = vector.extract_strided_slice %318 {offsets = [0, 0], sizes = [2, 192], strides = [1, 1]} : vector<16x192xf32> to vector<2x192xf32>
      %347 = vector.extract_strided_slice %318 {offsets = [14, 0], sizes = [2, 192], strides = [1, 1]} : vector<16x192xf32> to vector<2x192xf32>
      %348 = arith.select %342, %346, %347 : vector<2x192xi1>, vector<2x192xf32>
      %cst_119 = arith.constant dense<0.000000e+00> : vector<2x192xf32>
      %349 = tpu.matmul %345, %322, %cst_119 {dimension_numbers = #tpu.dot_dimension_numbers<[1], [0], [0], [1], [0, 0, 1, 1], [], []>} : vector<2x64xf32>, vector<64x192xf32>, vector<2x192xf32> -> vector<2x192xf32>
      %350 = vector.extract_strided_slice %348 {offsets = [0, 0], sizes = [2, 128], strides = [1, 1]} : vector<2x192xf32> to vector<2x128xf32>
      %351 = vector.extract_strided_slice %349 {offsets = [0, 0], sizes = [2, 128], strides = [1, 1]} : vector<2x192xf32> to vector<2x128xf32>
      %352 = arith.addf %350, %351 : vector<2x128xf32>
      %353 = arith.negf %352 : vector<2x128xf32>
      %354 = math.exp %353 : vector<2x128xf32>
      %cst_120 = arith.constant 1.000000e+00 : f32
      %355 = vector.broadcast %cst_120 : f32 to vector<2x128xf32>
      %356 = arith.addf %355, %354 : vector<2x128xf32>
      %357 = arith.divf %355, %356 : vector<2x128xf32>
      %358 = vector.extract_strided_slice %357 {offsets = [0, 0], sizes = [2, 64], strides = [1, 1]} : vector<2x128xf32> to vector<2x64xf32>
      %359 = vector.extract_strided_slice %357 {offsets = [0, 64], sizes = [2, 64], strides = [1, 1]} : vector<2x128xf32> to vector<2x64xf32>
      %360 = vector.extract_strided_slice %348 {offsets = [0, 128], sizes = [2, 64], strides = [1, 1]} : vector<2x192xf32> to vector<2x64xf32>
      %361 = vector.extract_strided_slice %349 {offsets = [0, 128], sizes = [2, 64], strides = [1, 1]} : vector<2x192xf32> to vector<2x64xf32>
      %362 = arith.addf %361, %344 : vector<2x64xf32>
      %363 = arith.mulf %358, %362 : vector<2x64xf32>
      %364 = arith.addf %360, %363 : vector<2x64xf32>
      %365 = math.tanh %364 : vector<2x64xf32>
      %cst_121 = arith.constant 1.000000e+00 : f32
      %366 = vector.broadcast %cst_121 : f32 to vector<2x64xf32>
      %367 = arith.subf %366, %359 : vector<2x64xf32>
      %368 = arith.mulf %367, %365 : vector<2x64xf32>
      %369 = arith.mulf %359, %345 : vector<2x64xf32>
      %370 = arith.addf %368, %369 : vector<2x64xf32>
      %c0_122 = arith.constant 0 : index
      %c0_123 = arith.constant 0 : index
      %c0_124 = arith.constant 0 : index
      %371 = vector.load %arg13[%c0_122, %c0_123, %c0_124] : memref<8x64x128xf32, #tpu.memory_space<vmem>>, vector<1x64x128xf32>
      %372 = vector.shape_cast %371 : vector<1x64x128xf32> to vector<64x128xf32>
      %cst_125 = arith.constant dense<0.000000e+00> : vector<2x128xf32>
      %373 = tpu.matmul %370, %372, %cst_125 {dimension_numbers = #tpu.dot_dimension_numbers<[1], [0], [0], [1], [0, 0, 1, 1], [], []>} : vector<2x64xf32>, vector<64x128xf32>, vector<2x128xf32> -> vector<2x128xf32>
      %374 = arith.addf %321, %373 : vector<2x128xf32>
      %375 = vector.extract_strided_slice %318 {offsets = [2, 0], sizes = [2, 192], strides = [1, 1]} : vector<16x192xf32> to vector<2x192xf32>
      %376 = vector.extract_strided_slice %318 {offsets = [12, 0], sizes = [2, 192], strides = [1, 1]} : vector<16x192xf32> to vector<2x192xf32>
      %377 = arith.select %342, %375, %376 : vector<2x192xi1>, vector<2x192xf32>
      %cst_126 = arith.constant dense<0.000000e+00> : vector<2x192xf32>
      %378 = tpu.matmul %370, %322, %cst_126 {dimension_numbers = #tpu.dot_dimension_numbers<[1], [0], [0], [1], [0, 0, 1, 1], [], []>} : vector<2x64xf32>, vector<64x192xf32>, vector<2x192xf32> -> vector<2x192xf32>
      %379 = vector.extract_strided_slice %377 {offsets = [0, 0], sizes = [2, 128], strides = [1, 1]} : vector<2x192xf32> to vector<2x128xf32>
      %380 = vector.extract_strided_slice %378 {offsets = [0, 0], sizes = [2, 128], strides = [1, 1]} : vector<2x192xf32> to vector<2x128xf32>
      %381 = arith.addf %379, %380 : vector<2x128xf32>
      %382 = arith.negf %381 : vector<2x128xf32>
      %383 = math.exp %382 : vector<2x128xf32>
      %cst_127 = arith.constant 1.000000e+00 : f32
      %384 = vector.broadcast %cst_127 : f32 to vector<2x128xf32>
      %385 = arith.addf %384, %383 : vector<2x128xf32>
      %386 = arith.divf %384, %385 : vector<2x128xf32>
      %387 = vector.extract_strided_slice %386 {offsets = [0, 0], sizes = [2, 64], strides = [1, 1]} : vector<2x128xf32> to vector<2x64xf32>
      %388 = vector.extract_strided_slice %386 {offsets = [0, 64], sizes = [2, 64], strides = [1, 1]} : vector<2x128xf32> to vector<2x64xf32>
      %389 = vector.extract_strided_slice %377 {offsets = [0, 128], sizes = [2, 64], strides = [1, 1]} : vector<2x192xf32> to vector<2x64xf32>
      %390 = vector.extract_strided_slice %378 {offsets = [0, 128], sizes = [2, 64], strides = [1, 1]} : vector<2x192xf32> to vector<2x64xf32>
      %391 = arith.addf %390, %344 : vector<2x64xf32>
      %392 = arith.mulf %387, %391 : vector<2x64xf32>
      %393 = arith.addf %389, %392 : vector<2x64xf32>
      %394 = math.tanh %393 : vector<2x64xf32>
      %cst_128 = arith.constant 1.000000e+00 : f32
      %395 = vector.broadcast %cst_128 : f32 to vector<2x64xf32>
      %396 = arith.subf %395, %388 : vector<2x64xf32>
      %397 = arith.mulf %396, %394 : vector<2x64xf32>
      %398 = arith.mulf %388, %370 : vector<2x64xf32>
      %399 = arith.addf %397, %398 : vector<2x64xf32>
      %c1 = arith.constant 1 : index
      %c0_129 = arith.constant 0 : index
      %c0_130 = arith.constant 0 : index
      %400 = vector.load %arg13[%c1, %c0_129, %c0_130] : memref<8x64x128xf32, #tpu.memory_space<vmem>>, vector<1x64x128xf32>
      %401 = vector.shape_cast %400 : vector<1x64x128xf32> to vector<64x128xf32>
      %cst_131 = arith.constant dense<0.000000e+00> : vector<2x128xf32>
      %402 = tpu.matmul %399, %401, %cst_131 {dimension_numbers = #tpu.dot_dimension_numbers<[1], [0], [0], [1], [0, 0, 1, 1], [], []>} : vector<2x64xf32>, vector<64x128xf32>, vector<2x128xf32> -> vector<2x128xf32>
      %403 = arith.addf %374, %402 : vector<2x128xf32>
      %404 = vector.extract_strided_slice %318 {offsets = [4, 0], sizes = [2, 192], strides = [1, 1]} : vector<16x192xf32> to vector<2x192xf32>
      %405 = vector.extract_strided_slice %318 {offsets = [10, 0], sizes = [2, 192], strides = [1, 1]} : vector<16x192xf32> to vector<2x192xf32>
      %406 = arith.select %342, %404, %405 : vector<2x192xi1>, vector<2x192xf32>
      %cst_132 = arith.constant dense<0.000000e+00> : vector<2x192xf32>
      %407 = tpu.matmul %399, %322, %cst_132 {dimension_numbers = #tpu.dot_dimension_numbers<[1], [0], [0], [1], [0, 0, 1, 1], [], []>} : vector<2x64xf32>, vector<64x192xf32>, vector<2x192xf32> -> vector<2x192xf32>
      %408 = vector.extract_strided_slice %406 {offsets = [0, 0], sizes = [2, 128], strides = [1, 1]} : vector<2x192xf32> to vector<2x128xf32>
      %409 = vector.extract_strided_slice %407 {offsets = [0, 0], sizes = [2, 128], strides = [1, 1]} : vector<2x192xf32> to vector<2x128xf32>
      %410 = arith.addf %408, %409 : vector<2x128xf32>
      %411 = arith.negf %410 : vector<2x128xf32>
      %412 = math.exp %411 : vector<2x128xf32>
      %cst_133 = arith.constant 1.000000e+00 : f32
      %413 = vector.broadcast %cst_133 : f32 to vector<2x128xf32>
      %414 = arith.addf %413, %412 : vector<2x128xf32>
      %415 = arith.divf %413, %414 : vector<2x128xf32>
      %416 = vector.extract_strided_slice %415 {offsets = [0, 0], sizes = [2, 64], strides = [1, 1]} : vector<2x128xf32> to vector<2x64xf32>
      %417 = vector.extract_strided_slice %415 {offsets = [0, 64], sizes = [2, 64], strides = [1, 1]} : vector<2x128xf32> to vector<2x64xf32>
      %418 = vector.extract_strided_slice %406 {offsets = [0, 128], sizes = [2, 64], strides = [1, 1]} : vector<2x192xf32> to vector<2x64xf32>
      %419 = vector.extract_strided_slice %407 {offsets = [0, 128], sizes = [2, 64], strides = [1, 1]} : vector<2x192xf32> to vector<2x64xf32>
      %420 = arith.addf %419, %344 : vector<2x64xf32>
      %421 = arith.mulf %416, %420 : vector<2x64xf32>
      %422 = arith.addf %418, %421 : vector<2x64xf32>
      %423 = math.tanh %422 : vector<2x64xf32>
      %cst_134 = arith.constant 1.000000e+00 : f32
      %424 = vector.broadcast %cst_134 : f32 to vector<2x64xf32>
      %425 = arith.subf %424, %417 : vector<2x64xf32>
      %426 = arith.mulf %425, %423 : vector<2x64xf32>
      %427 = arith.mulf %417, %399 : vector<2x64xf32>
      %428 = arith.addf %426, %427 : vector<2x64xf32>
      %c2_135 = arith.constant 2 : index
      %c0_136 = arith.constant 0 : index
      %c0_137 = arith.constant 0 : index
      %429 = vector.load %arg13[%c2_135, %c0_136, %c0_137] : memref<8x64x128xf32, #tpu.memory_space<vmem>>, vector<1x64x128xf32>
      %430 = vector.shape_cast %429 : vector<1x64x128xf32> to vector<64x128xf32>
      %cst_138 = arith.constant dense<0.000000e+00> : vector<2x128xf32>
      %431 = tpu.matmul %428, %430, %cst_138 {dimension_numbers = #tpu.dot_dimension_numbers<[1], [0], [0], [1], [0, 0, 1, 1], [], []>} : vector<2x64xf32>, vector<64x128xf32>, vector<2x128xf32> -> vector<2x128xf32>
      %432 = arith.addf %403, %431 : vector<2x128xf32>
      %433 = vector.extract_strided_slice %318 {offsets = [6, 0], sizes = [2, 192], strides = [1, 1]} : vector<16x192xf32> to vector<2x192xf32>
      %434 = vector.extract_strided_slice %318 {offsets = [8, 0], sizes = [2, 192], strides = [1, 1]} : vector<16x192xf32> to vector<2x192xf32>
      %435 = arith.select %342, %433, %434 : vector<2x192xi1>, vector<2x192xf32>
      %cst_139 = arith.constant dense<0.000000e+00> : vector<2x192xf32>
      %436 = tpu.matmul %428, %322, %cst_139 {dimension_numbers = #tpu.dot_dimension_numbers<[1], [0], [0], [1], [0, 0, 1, 1], [], []>} : vector<2x64xf32>, vector<64x192xf32>, vector<2x192xf32> -> vector<2x192xf32>
      %437 = vector.extract_strided_slice %435 {offsets = [0, 0], sizes = [2, 128], strides = [1, 1]} : vector<2x192xf32> to vector<2x128xf32>
      %438 = vector.extract_strided_slice %436 {offsets = [0, 0], sizes = [2, 128], strides = [1, 1]} : vector<2x192xf32> to vector<2x128xf32>
      %439 = arith.addf %437, %438 : vector<2x128xf32>
      %440 = arith.negf %439 : vector<2x128xf32>
      %441 = math.exp %440 : vector<2x128xf32>
      %cst_140 = arith.constant 1.000000e+00 : f32
      %442 = vector.broadcast %cst_140 : f32 to vector<2x128xf32>
      %443 = arith.addf %442, %441 : vector<2x128xf32>
      %444 = arith.divf %442, %443 : vector<2x128xf32>
      %445 = vector.extract_strided_slice %444 {offsets = [0, 0], sizes = [2, 64], strides = [1, 1]} : vector<2x128xf32> to vector<2x64xf32>
      %446 = vector.extract_strided_slice %444 {offsets = [0, 64], sizes = [2, 64], strides = [1, 1]} : vector<2x128xf32> to vector<2x64xf32>
      %447 = vector.extract_strided_slice %435 {offsets = [0, 128], sizes = [2, 64], strides = [1, 1]} : vector<2x192xf32> to vector<2x64xf32>
      %448 = vector.extract_strided_slice %436 {offsets = [0, 128], sizes = [2, 64], strides = [1, 1]} : vector<2x192xf32> to vector<2x64xf32>
      %449 = arith.addf %448, %344 : vector<2x64xf32>
      %450 = arith.mulf %445, %449 : vector<2x64xf32>
      %451 = arith.addf %447, %450 : vector<2x64xf32>
      %452 = math.tanh %451 : vector<2x64xf32>
      %cst_141 = arith.constant 1.000000e+00 : f32
      %453 = vector.broadcast %cst_141 : f32 to vector<2x64xf32>
      %454 = arith.subf %453, %446 : vector<2x64xf32>
      %455 = arith.mulf %454, %452 : vector<2x64xf32>
      %456 = arith.mulf %446, %428 : vector<2x64xf32>
      %457 = arith.addf %455, %456 : vector<2x64xf32>
      %c3 = arith.constant 3 : index
      %c0_142 = arith.constant 0 : index
      %c0_143 = arith.constant 0 : index
      %458 = vector.load %arg13[%c3, %c0_142, %c0_143] : memref<8x64x128xf32, #tpu.memory_space<vmem>>, vector<1x64x128xf32>
      %459 = vector.shape_cast %458 : vector<1x64x128xf32> to vector<64x128xf32>
      %cst_144 = arith.constant dense<0.000000e+00> : vector<2x128xf32>
      %460 = tpu.matmul %457, %459, %cst_144 {dimension_numbers = #tpu.dot_dimension_numbers<[1], [0], [0], [1], [0, 0, 1, 1], [], []>} : vector<2x64xf32>, vector<64x128xf32>, vector<2x128xf32> -> vector<2x128xf32>
      %461 = arith.addf %432, %460 : vector<2x128xf32>
      %462 = vector.extract_strided_slice %318 {offsets = [8, 0], sizes = [2, 192], strides = [1, 1]} : vector<16x192xf32> to vector<2x192xf32>
      %463 = vector.extract_strided_slice %318 {offsets = [6, 0], sizes = [2, 192], strides = [1, 1]} : vector<16x192xf32> to vector<2x192xf32>
      %464 = arith.select %342, %462, %463 : vector<2x192xi1>, vector<2x192xf32>
      %cst_145 = arith.constant dense<0.000000e+00> : vector<2x192xf32>
      %465 = tpu.matmul %457, %322, %cst_145 {dimension_numbers = #tpu.dot_dimension_numbers<[1], [0], [0], [1], [0, 0, 1, 1], [], []>} : vector<2x64xf32>, vector<64x192xf32>, vector<2x192xf32> -> vector<2x192xf32>
      %466 = vector.extract_strided_slice %464 {offsets = [0, 0], sizes = [2, 128], strides = [1, 1]} : vector<2x192xf32> to vector<2x128xf32>
      %467 = vector.extract_strided_slice %465 {offsets = [0, 0], sizes = [2, 128], strides = [1, 1]} : vector<2x192xf32> to vector<2x128xf32>
      %468 = arith.addf %466, %467 : vector<2x128xf32>
      %469 = arith.negf %468 : vector<2x128xf32>
      %470 = math.exp %469 : vector<2x128xf32>
      %cst_146 = arith.constant 1.000000e+00 : f32
      %471 = vector.broadcast %cst_146 : f32 to vector<2x128xf32>
      %472 = arith.addf %471, %470 : vector<2x128xf32>
      %473 = arith.divf %471, %472 : vector<2x128xf32>
      %474 = vector.extract_strided_slice %473 {offsets = [0, 0], sizes = [2, 64], strides = [1, 1]} : vector<2x128xf32> to vector<2x64xf32>
      %475 = vector.extract_strided_slice %473 {offsets = [0, 64], sizes = [2, 64], strides = [1, 1]} : vector<2x128xf32> to vector<2x64xf32>
      %476 = vector.extract_strided_slice %464 {offsets = [0, 128], sizes = [2, 64], strides = [1, 1]} : vector<2x192xf32> to vector<2x64xf32>
      %477 = vector.extract_strided_slice %465 {offsets = [0, 128], sizes = [2, 64], strides = [1, 1]} : vector<2x192xf32> to vector<2x64xf32>
      %478 = arith.addf %477, %344 : vector<2x64xf32>
      %479 = arith.mulf %474, %478 : vector<2x64xf32>
      %480 = arith.addf %476, %479 : vector<2x64xf32>
      %481 = math.tanh %480 : vector<2x64xf32>
      %cst_147 = arith.constant 1.000000e+00 : f32
      %482 = vector.broadcast %cst_147 : f32 to vector<2x64xf32>
      %483 = arith.subf %482, %475 : vector<2x64xf32>
      %484 = arith.mulf %483, %481 : vector<2x64xf32>
      %485 = arith.mulf %475, %457 : vector<2x64xf32>
      %486 = arith.addf %484, %485 : vector<2x64xf32>
      %c4_148 = arith.constant 4 : index
      %c0_149 = arith.constant 0 : index
      %c0_150 = arith.constant 0 : index
      %487 = vector.load %arg13[%c4_148, %c0_149, %c0_150] : memref<8x64x128xf32, #tpu.memory_space<vmem>>, vector<1x64x128xf32>
      %488 = vector.shape_cast %487 : vector<1x64x128xf32> to vector<64x128xf32>
      %cst_151 = arith.constant dense<0.000000e+00> : vector<2x128xf32>
      %489 = tpu.matmul %486, %488, %cst_151 {dimension_numbers = #tpu.dot_dimension_numbers<[1], [0], [0], [1], [0, 0, 1, 1], [], []>} : vector<2x64xf32>, vector<64x128xf32>, vector<2x128xf32> -> vector<2x128xf32>
      %490 = arith.addf %461, %489 : vector<2x128xf32>
      %491 = vector.extract_strided_slice %318 {offsets = [10, 0], sizes = [2, 192], strides = [1, 1]} : vector<16x192xf32> to vector<2x192xf32>
      %492 = vector.extract_strided_slice %318 {offsets = [4, 0], sizes = [2, 192], strides = [1, 1]} : vector<16x192xf32> to vector<2x192xf32>
      %493 = arith.select %342, %491, %492 : vector<2x192xi1>, vector<2x192xf32>
      %cst_152 = arith.constant dense<0.000000e+00> : vector<2x192xf32>
      %494 = tpu.matmul %486, %322, %cst_152 {dimension_numbers = #tpu.dot_dimension_numbers<[1], [0], [0], [1], [0, 0, 1, 1], [], []>} : vector<2x64xf32>, vector<64x192xf32>, vector<2x192xf32> -> vector<2x192xf32>
      %495 = vector.extract_strided_slice %493 {offsets = [0, 0], sizes = [2, 128], strides = [1, 1]} : vector<2x192xf32> to vector<2x128xf32>
      %496 = vector.extract_strided_slice %494 {offsets = [0, 0], sizes = [2, 128], strides = [1, 1]} : vector<2x192xf32> to vector<2x128xf32>
      %497 = arith.addf %495, %496 : vector<2x128xf32>
      %498 = arith.negf %497 : vector<2x128xf32>
      %499 = math.exp %498 : vector<2x128xf32>
      %cst_153 = arith.constant 1.000000e+00 : f32
      %500 = vector.broadcast %cst_153 : f32 to vector<2x128xf32>
      %501 = arith.addf %500, %499 : vector<2x128xf32>
      %502 = arith.divf %500, %501 : vector<2x128xf32>
      %503 = vector.extract_strided_slice %502 {offsets = [0, 0], sizes = [2, 64], strides = [1, 1]} : vector<2x128xf32> to vector<2x64xf32>
      %504 = vector.extract_strided_slice %502 {offsets = [0, 64], sizes = [2, 64], strides = [1, 1]} : vector<2x128xf32> to vector<2x64xf32>
      %505 = vector.extract_strided_slice %493 {offsets = [0, 128], sizes = [2, 64], strides = [1, 1]} : vector<2x192xf32> to vector<2x64xf32>
      %506 = vector.extract_strided_slice %494 {offsets = [0, 128], sizes = [2, 64], strides = [1, 1]} : vector<2x192xf32> to vector<2x64xf32>
      %507 = arith.addf %506, %344 : vector<2x64xf32>
      %508 = arith.mulf %503, %507 : vector<2x64xf32>
      %509 = arith.addf %505, %508 : vector<2x64xf32>
      %510 = math.tanh %509 : vector<2x64xf32>
      %cst_154 = arith.constant 1.000000e+00 : f32
      %511 = vector.broadcast %cst_154 : f32 to vector<2x64xf32>
      %512 = arith.subf %511, %504 : vector<2x64xf32>
      %513 = arith.mulf %512, %510 : vector<2x64xf32>
      %514 = arith.mulf %504, %486 : vector<2x64xf32>
      %515 = arith.addf %513, %514 : vector<2x64xf32>
      %c5 = arith.constant 5 : index
      %c0_155 = arith.constant 0 : index
      %c0_156 = arith.constant 0 : index
      %516 = vector.load %arg13[%c5, %c0_155, %c0_156] : memref<8x64x128xf32, #tpu.memory_space<vmem>>, vector<1x64x128xf32>
      %517 = vector.shape_cast %516 : vector<1x64x128xf32> to vector<64x128xf32>
      %cst_157 = arith.constant dense<0.000000e+00> : vector<2x128xf32>
      %518 = tpu.matmul %515, %517, %cst_157 {dimension_numbers = #tpu.dot_dimension_numbers<[1], [0], [0], [1], [0, 0, 1, 1], [], []>} : vector<2x64xf32>, vector<64x128xf32>, vector<2x128xf32> -> vector<2x128xf32>
      %519 = arith.addf %490, %518 : vector<2x128xf32>
      %520 = vector.extract_strided_slice %318 {offsets = [12, 0], sizes = [2, 192], strides = [1, 1]} : vector<16x192xf32> to vector<2x192xf32>
      %521 = vector.extract_strided_slice %318 {offsets = [2, 0], sizes = [2, 192], strides = [1, 1]} : vector<16x192xf32> to vector<2x192xf32>
      %522 = arith.select %342, %520, %521 : vector<2x192xi1>, vector<2x192xf32>
      %cst_158 = arith.constant dense<0.000000e+00> : vector<2x192xf32>
      %523 = tpu.matmul %515, %322, %cst_158 {dimension_numbers = #tpu.dot_dimension_numbers<[1], [0], [0], [1], [0, 0, 1, 1], [], []>} : vector<2x64xf32>, vector<64x192xf32>, vector<2x192xf32> -> vector<2x192xf32>
      %524 = vector.extract_strided_slice %522 {offsets = [0, 0], sizes = [2, 128], strides = [1, 1]} : vector<2x192xf32> to vector<2x128xf32>
      %525 = vector.extract_strided_slice %523 {offsets = [0, 0], sizes = [2, 128], strides = [1, 1]} : vector<2x192xf32> to vector<2x128xf32>
      %526 = arith.addf %524, %525 : vector<2x128xf32>
      %527 = arith.negf %526 : vector<2x128xf32>
      %528 = math.exp %527 : vector<2x128xf32>
      %cst_159 = arith.constant 1.000000e+00 : f32
      %529 = vector.broadcast %cst_159 : f32 to vector<2x128xf32>
      %530 = arith.addf %529, %528 : vector<2x128xf32>
      %531 = arith.divf %529, %530 : vector<2x128xf32>
      %532 = vector.extract_strided_slice %531 {offsets = [0, 0], sizes = [2, 64], strides = [1, 1]} : vector<2x128xf32> to vector<2x64xf32>
      %533 = vector.extract_strided_slice %531 {offsets = [0, 64], sizes = [2, 64], strides = [1, 1]} : vector<2x128xf32> to vector<2x64xf32>
      %534 = vector.extract_strided_slice %522 {offsets = [0, 128], sizes = [2, 64], strides = [1, 1]} : vector<2x192xf32> to vector<2x64xf32>
      %535 = vector.extract_strided_slice %523 {offsets = [0, 128], sizes = [2, 64], strides = [1, 1]} : vector<2x192xf32> to vector<2x64xf32>
      %536 = arith.addf %535, %344 : vector<2x64xf32>
      %537 = arith.mulf %532, %536 : vector<2x64xf32>
      %538 = arith.addf %534, %537 : vector<2x64xf32>
      %539 = math.tanh %538 : vector<2x64xf32>
      %cst_160 = arith.constant 1.000000e+00 : f32
      %540 = vector.broadcast %cst_160 : f32 to vector<2x64xf32>
      %541 = arith.subf %540, %533 : vector<2x64xf32>
      %542 = arith.mulf %541, %539 : vector<2x64xf32>
      %543 = arith.mulf %533, %515 : vector<2x64xf32>
      %544 = arith.addf %542, %543 : vector<2x64xf32>
      %c6_161 = arith.constant 6 : index
      %c0_162 = arith.constant 0 : index
      %c0_163 = arith.constant 0 : index
      %545 = vector.load %arg13[%c6_161, %c0_162, %c0_163] : memref<8x64x128xf32, #tpu.memory_space<vmem>>, vector<1x64x128xf32>
      %546 = vector.shape_cast %545 : vector<1x64x128xf32> to vector<64x128xf32>
      %cst_164 = arith.constant dense<0.000000e+00> : vector<2x128xf32>
      %547 = tpu.matmul %544, %546, %cst_164 {dimension_numbers = #tpu.dot_dimension_numbers<[1], [0], [0], [1], [0, 0, 1, 1], [], []>} : vector<2x64xf32>, vector<64x128xf32>, vector<2x128xf32> -> vector<2x128xf32>
      %548 = arith.addf %519, %547 : vector<2x128xf32>
      %549 = vector.extract_strided_slice %318 {offsets = [14, 0], sizes = [2, 192], strides = [1, 1]} : vector<16x192xf32> to vector<2x192xf32>
      %550 = vector.extract_strided_slice %318 {offsets = [0, 0], sizes = [2, 192], strides = [1, 1]} : vector<16x192xf32> to vector<2x192xf32>
      %551 = arith.select %342, %549, %550 : vector<2x192xi1>, vector<2x192xf32>
      %cst_165 = arith.constant dense<0.000000e+00> : vector<2x192xf32>
      %552 = tpu.matmul %544, %322, %cst_165 {dimension_numbers = #tpu.dot_dimension_numbers<[1], [0], [0], [1], [0, 0, 1, 1], [], []>} : vector<2x64xf32>, vector<64x192xf32>, vector<2x192xf32> -> vector<2x192xf32>
      %553 = vector.extract_strided_slice %551 {offsets = [0, 0], sizes = [2, 128], strides = [1, 1]} : vector<2x192xf32> to vector<2x128xf32>
      %554 = vector.extract_strided_slice %552 {offsets = [0, 0], sizes = [2, 128], strides = [1, 1]} : vector<2x192xf32> to vector<2x128xf32>
      %555 = arith.addf %553, %554 : vector<2x128xf32>
      %556 = arith.negf %555 : vector<2x128xf32>
      %557 = math.exp %556 : vector<2x128xf32>
      %cst_166 = arith.constant 1.000000e+00 : f32
      %558 = vector.broadcast %cst_166 : f32 to vector<2x128xf32>
      %559 = arith.addf %558, %557 : vector<2x128xf32>
      %560 = arith.divf %558, %559 : vector<2x128xf32>
      %561 = vector.extract_strided_slice %560 {offsets = [0, 0], sizes = [2, 64], strides = [1, 1]} : vector<2x128xf32> to vector<2x64xf32>
      %562 = vector.extract_strided_slice %560 {offsets = [0, 64], sizes = [2, 64], strides = [1, 1]} : vector<2x128xf32> to vector<2x64xf32>
      %563 = vector.extract_strided_slice %551 {offsets = [0, 128], sizes = [2, 64], strides = [1, 1]} : vector<2x192xf32> to vector<2x64xf32>
      %564 = vector.extract_strided_slice %552 {offsets = [0, 128], sizes = [2, 64], strides = [1, 1]} : vector<2x192xf32> to vector<2x64xf32>
      %565 = arith.addf %564, %344 : vector<2x64xf32>
      %566 = arith.mulf %561, %565 : vector<2x64xf32>
      %567 = arith.addf %563, %566 : vector<2x64xf32>
      %568 = math.tanh %567 : vector<2x64xf32>
      %cst_167 = arith.constant 1.000000e+00 : f32
      %569 = vector.broadcast %cst_167 : f32 to vector<2x64xf32>
      %570 = arith.subf %569, %562 : vector<2x64xf32>
      %571 = arith.mulf %570, %568 : vector<2x64xf32>
      %572 = arith.mulf %562, %544 : vector<2x64xf32>
      %573 = arith.addf %571, %572 : vector<2x64xf32>
      %c7 = arith.constant 7 : index
      %c0_168 = arith.constant 0 : index
      %c0_169 = arith.constant 0 : index
      %574 = vector.load %arg13[%c7, %c0_168, %c0_169] : memref<8x64x128xf32, #tpu.memory_space<vmem>>, vector<1x64x128xf32>
      %575 = vector.shape_cast %574 : vector<1x64x128xf32> to vector<64x128xf32>
      %cst_170 = arith.constant dense<0.000000e+00> : vector<2x128xf32>
      %576 = tpu.matmul %573, %575, %cst_170 {dimension_numbers = #tpu.dot_dimension_numbers<[1], [0], [0], [1], [0, 0, 1, 1], [], []>} : vector<2x64xf32>, vector<64x128xf32>, vector<2x128xf32> -> vector<2x128xf32>
      %577 = arith.addf %548, %576 : vector<2x128xf32>
      %cst_171 = arith.constant 0.000000e+00 : f32
      %578 = vector.broadcast %cst_171 : f32 to vector<2x128xf32>
      %579 = arith.maximumf %577, %578 : vector<2x128xf32>
      %c0_172 = arith.constant 0 : index
      %c0_173 = arith.constant 0 : index
      %580 = vector.load %arg24[%c0_172, %c0_173] : memref<2x128xf32, #tpu.memory_space<vmem>>, vector<2x128xf32>
      tpu.vector_store %arg24[%c0_172, %c0_173], %579 {strides = array<i32>} : memref<2x128xf32, #tpu.memory_space<vmem>>, vector<2x128xf32>,
    } else {
    }
    %c0 = arith.constant 0 : index
    %c0_1 = arith.constant 0 : index
    %3 = vector.load %arg22[%c0, %c0_1] : memref<2x128xf32, #tpu.memory_space<vmem>>, vector<2x128xf32>
    %c0_2 = arith.constant 0 : index
    %c0_3 = arith.constant 0 : index
    %4 = vector.load %arg2[%c0_2, %c0_3] : memref<2x1024xbf16, #tpu.memory_space<vmem>>, vector<2x1024xbf16>
    %c0_4 = arith.constant 0 : index
    %c0_5 = arith.constant 0 : index
    %5 = vector.load %arg15[%c0_4, %c0_5] : memref<1024x128xbf16, #tpu.memory_space<vmem>>, vector<1024x128xbf16>
    %cst = arith.constant dense<0.000000e+00> : vector<2x128xf32>
    %6 = tpu.matmul %4, %5, %cst {dimension_numbers = #tpu.dot_dimension_numbers<[1], [0], [0], [1], [0, 0, 1, 1], [], []>} : vector<2x1024xbf16>, vector<1024x128xbf16>, vector<2x128xf32> -> vector<2x128xf32>
    %7 = arith.addf %3, %6 : vector<2x128xf32>
    %c0_6 = arith.constant 0 : index
    %c0_7 = arith.constant 0 : index
    %8 = vector.load %arg22[%c0_6, %c0_7] : memref<2x128xf32, #tpu.memory_space<vmem>>, vector<2x128xf32>
    tpu.vector_store %arg22[%c0_6, %c0_7], %7 {strides = array<i32>} : memref<2x128xf32, #tpu.memory_space<vmem>>, vector<2x128xf32>,
    %c0_8 = arith.constant 0 : index
    %c0_9 = arith.constant 0 : index
    %9 = vector.load %arg23[%c0_8, %c0_9] : memref<2x128xf32, #tpu.memory_space<vmem>>, vector<2x128xf32>
    %c0_10 = arith.constant 0 : index
    %c0_11 = arith.constant 0 : index
    %10 = vector.load %arg3[%c0_10, %c0_11] : memref<2x4608xbf16, #tpu.memory_space<vmem>>, vector<2x4608xbf16>
    %c0_12 = arith.constant 0 : index
    %c0_13 = arith.constant 0 : index
    %11 = vector.load %arg17[%c0_12, %c0_13] : memref<4608x128xbf16, #tpu.memory_space<vmem>>, vector<4608x128xbf16>
    %cst_14 = arith.constant dense<0.000000e+00> : vector<2x128xf32>
    %12 = tpu.matmul %10, %11, %cst_14 {dimension_numbers = #tpu.dot_dimension_numbers<[1], [0], [0], [1], [0, 0, 1, 1], [], []>} : vector<2x4608xbf16>, vector<4608x128xbf16>, vector<2x128xf32> -> vector<2x128xf32>
    %13 = arith.addf %9, %12 : vector<2x128xf32>
    %c0_15 = arith.constant 0 : index
    %c0_16 = arith.constant 0 : index
    %14 = vector.load %arg23[%c0_15, %c0_16] : memref<2x128xf32, #tpu.memory_space<vmem>>, vector<2x128xf32>
    tpu.vector_store %arg23[%c0_15, %c0_16], %13 {strides = array<i32>} : memref<2x128xf32, #tpu.memory_space<vmem>>, vector<2x128xf32>,
    %c1_i32 = arith.constant 1 : i32
    %15 = arith.cmpi eq, %arg0, %c1_i32 : i32
    %16 = arith.extui %15 : i1 to i32
    %c0_i32_17 = arith.constant 0 : i32
    %17 = arith.cmpi ne, %16, %c0_i32_17 : i32
    scf.if %17 {
      %c0_18 = arith.constant 0 : index
      %c0_19 = arith.constant 0 : index
      %18 = vector.load %arg22[%c0_18, %c0_19] : memref<2x128xf32, #tpu.memory_space<vmem>>, vector<2x128xf32>
      %c0_20 = arith.constant 0 : index
      %c0_21 = arith.constant 0 : index
      %19 = vector.load %arg16[%c0_20, %c0_21] : memref<1x128xf32, #tpu.memory_space<vmem>>, vector<1x128xf32>
      %20 = vector.broadcast %19 : vector<1x128xf32> to vector<2x128xf32>
      %21 = arith.addf %18, %20 : vector<2x128xf32>
      %cst_22 = arith.constant 0.000000e+00 : f32
      %22 = vector.broadcast %cst_22 : f32 to vector<2x128xf32>
      %23 = arith.maximumf %21, %22 : vector<2x128xf32>
      %c0_23 = arith.constant 0 : index
      %c0_24 = arith.constant 0 : index
      %24 = vector.load %arg23[%c0_23, %c0_24] : memref<2x128xf32, #tpu.memory_space<vmem>>, vector<2x128xf32>
      %c0_25 = arith.constant 0 : index
      %c0_26 = arith.constant 0 : index
      %25 = vector.load %arg18[%c0_25, %c0_26] : memref<1x128xf32, #tpu.memory_space<vmem>>, vector<1x128xf32>
      %26 = vector.broadcast %25 : vector<1x128xf32> to vector<2x128xf32>
      %27 = arith.addf %24, %26 : vector<2x128xf32>
      %cst_27 = arith.constant 0.000000e+00 : f32
      %28 = vector.broadcast %cst_27 : f32 to vector<2x128xf32>
      %29 = arith.maximumf %27, %28 : vector<2x128xf32>
      %c0_28 = arith.constant 0 : index
      %c0_29 = arith.constant 0 : index
      %30 = vector.load %arg24[%c0_28, %c0_29] : memref<2x128xf32, #tpu.memory_space<vmem>>, vector<2x128xf32>
      %31 = tpu.concatenate %23, %30, %29 in 1 : vector<2x128xf32>, vector<2x128xf32>, vector<2x128xf32> -> vector<2x384xf32>
      %c0_30 = arith.constant 0 : index
      %c0_31 = arith.constant 0 : index
      %32 = vector.load %arg19[%c0_30, %c0_31] : memref<384x8xf32, #tpu.memory_space<vmem>>, vector<384x8xf32>
      %cst_32 = arith.constant dense<0.000000e+00> : vector<2x8xf32>
      %33 = tpu.matmul %31, %32, %cst_32 {dimension_numbers = #tpu.dot_dimension_numbers<[1], [0], [0], [1], [0, 0, 1, 1], [], []>} : vector<2x384xf32>, vector<384x8xf32>, vector<2x8xf32> -> vector<2x8xf32>
      %c0_33 = arith.constant 0 : index
      %c0_34 = arith.constant 0 : index
      %34 = vector.load %arg20[%c0_33, %c0_34] : memref<1x8xf32, #tpu.memory_space<vmem>>, vector<1x8xf32>
      %35 = vector.broadcast %34 : vector<1x8xf32> to vector<2x8xf32>
      %36 = arith.addf %33, %35 : vector<2x8xf32>
      %c0_35 = arith.constant 0 : index
      %c0_36 = arith.constant 0 : index
      %37 = vector.load %arg21[%c0_35, %c0_36] : memref<2x8xf32, #tpu.memory_space<vmem>>, vector<2x8xf32>
      tpu.vector_store %arg21[%c0_35, %c0_36], %36 {strides = array<i32>} : memref<2x8xf32, #tpu.memory_space<vmem>>, vector<2x8xf32>,
    } else {
    }
    return
  }
  func.func @transform_0(%arg0: i32) -> (i32, i32, i32) {
    %c0_i32 = arith.constant 0 : i32
    %c0_i32_0 = arith.constant 0 : i32
    %c0_i32_1 = arith.constant 0 : i32
    %c0_i32_2 = arith.constant 0 : i32
    return %c0_i32, %c0_i32_0, %c0_i32_1 : i32, i32, i32
  }
  func.func @transform_1(%arg0: i32) -> (i32, i32) {
    %c0_i32 = arith.constant 0 : i32
    %c0_i32_0 = arith.constant 0 : i32
    return %c0_i32, %arg0 : i32, i32
  }
  func.func @transform_2(%arg0: i32) -> (i32, i32) {
    %c0_i32 = arith.constant 0 : i32
    %c0_i32_0 = arith.constant 0 : i32
    return %c0_i32, %arg0 : i32, i32
  }
  func.func @transform_3(%arg0: i32) -> (i32, i32) {
    %c0_i32 = arith.constant 0 : i32
    %c0_i32_0 = arith.constant 0 : i32
    %c0_i32_1 = arith.constant 0 : i32
    return %c0_i32, %c0_i32_0 : i32, i32
  }
  func.func @transform_4(%arg0: i32) -> (i32, i32) {
    %c0_i32 = arith.constant 0 : i32
    %c0_i32_0 = arith.constant 0 : i32
    %c0_i32_1 = arith.constant 0 : i32
    return %c0_i32, %c0_i32_0 : i32, i32
  }
  func.func @transform_5(%arg0: i32) -> (i32, i32) {
    %c0_i32 = arith.constant 0 : i32
    %c0_i32_0 = arith.constant 0 : i32
    %c0_i32_1 = arith.constant 0 : i32
    return %c0_i32, %c0_i32_0 : i32, i32
  }
  func.func @transform_6(%arg0: i32) -> (i32, i32) {
    %c0_i32 = arith.constant 0 : i32
    %c0_i32_0 = arith.constant 0 : i32
    %c0_i32_1 = arith.constant 0 : i32
    return %c0_i32, %c0_i32_0 : i32, i32
  }
  func.func @transform_7(%arg0: i32) -> (i32, i32) {
    %c0_i32 = arith.constant 0 : i32
    %c0_i32_0 = arith.constant 0 : i32
    %c0_i32_1 = arith.constant 0 : i32
    return %c0_i32, %c0_i32_0 : i32, i32
  }
  func.func @transform_8(%arg0: i32) -> (i32, i32) {
    %c0_i32 = arith.constant 0 : i32
    %c0_i32_0 = arith.constant 0 : i32
    %c0_i32_1 = arith.constant 0 : i32
    return %c0_i32, %c0_i32_0 : i32, i32
  }
  func.func @transform_9(%arg0: i32) -> (i32, i32) {
    %c0_i32 = arith.constant 0 : i32
    %c0_i32_0 = arith.constant 0 : i32
    %c0_i32_1 = arith.constant 0 : i32
    return %c0_i32, %c0_i32_0 : i32, i32
  }
  func.func @transform_10(%arg0: i32) -> (i32, i32) {
    %c0_i32 = arith.constant 0 : i32
    %c0_i32_0 = arith.constant 0 : i32
    %c0_i32_1 = arith.constant 0 : i32
    return %c0_i32, %c0_i32_0 : i32, i32
  }
  func.func @transform_11(%arg0: i32) -> (i32, i32) {
    %c0_i32 = arith.constant 0 : i32
    %c0_i32_0 = arith.constant 0 : i32
    %c0_i32_1 = arith.constant 0 : i32
    return %c0_i32, %c0_i32_0 : i32, i32
  }
  func.func @transform_12(%arg0: i32) -> (i32, i32, i32) {
    %c0_i32 = arith.constant 0 : i32
    %c0_i32_0 = arith.constant 0 : i32
    %c0_i32_1 = arith.constant 0 : i32
    %c0_i32_2 = arith.constant 0 : i32
    return %c0_i32, %c0_i32_0, %c0_i32_1 : i32, i32, i32
  }
  func.func @transform_13(%arg0: i32) -> (i32, i32) {
    %c0_i32 = arith.constant 0 : i32
    %c0_i32_0 = arith.constant 0 : i32
    %c0_i32_1 = arith.constant 0 : i32
    return %c0_i32, %c0_i32_0 : i32, i32
  }
  func.func @transform_14(%arg0: i32) -> (i32, i32) {
    %c0_i32 = arith.constant 0 : i32
    %c0_i32_0 = arith.constant 0 : i32
    return %arg0, %c0_i32 : i32, i32
  }
  func.func @transform_15(%arg0: i32) -> (i32, i32) {
    %c0_i32 = arith.constant 0 : i32
    %c0_i32_0 = arith.constant 0 : i32
    %c0_i32_1 = arith.constant 0 : i32
    return %c0_i32, %c0_i32_0 : i32, i32
  }
  func.func @transform_16(%arg0: i32) -> (i32, i32) {
    %c0_i32 = arith.constant 0 : i32
    %c0_i32_0 = arith.constant 0 : i32
    return %arg0, %c0_i32 : i32, i32
  }
  func.func @transform_17(%arg0: i32) -> (i32, i32) {
    %c0_i32 = arith.constant 0 : i32
    %c0_i32_0 = arith.constant 0 : i32
    %c0_i32_1 = arith.constant 0 : i32
    return %c0_i32, %c0_i32_0 : i32, i32
  }
  func.func @transform_18(%arg0: i32) -> (i32, i32) {
    %c0_i32 = arith.constant 0 : i32
    %c0_i32_0 = arith.constant 0 : i32
    %c0_i32_1 = arith.constant 0 : i32
    return %c0_i32, %c0_i32_0 : i32, i32
  }
  func.func @transform_19(%arg0: i32) -> (i32, i32) {
    %c0_i32 = arith.constant 0 : i32
    %c0_i32_0 = arith.constant 0 : i32
    %c0_i32_1 = arith.constant 0 : i32
    return %c0_i32, %c0_i32_0 : i32, i32
  }
  func.func @transform_20(%arg0: i32) -> (i32, i32) {
    %c0_i32 = arith.constant 0 : i32
    %c0_i32_0 = arith.constant 0 : i32
    %c0_i32_1 = arith.constant 0 : i32
    return %c0_i32, %c0_i32_0 : i32, i32
  }
}

</mosaic_0001>

<bundles_post_ra>
// kernel: msafnet_forward.1
= control target key start
LH: loop header
LB: loop body
LE: loop exit
PB: predicated region body
PF: predicated region fallthrough
CT: control target
= control target key end

     0   :  { %s13041_s0 = inlined_call_operand.hbm [shape: f32[2,8,13], index: 0, kind: input, shape index: {}]   ;;  %s13042_s1 = inlined_call_operand.vmem [shape: bf16[2,2048], index: 1, kind: input, shape index: {}]   ;;  %s13043_s2 = inlined_call_operand.vmem [shape: bf16[2,9216], index: 2, kind: input, shape index: {}]   ;;  %s13044_s3 = inlined_call_operand.hbm [shape: f32[13,192], index: 3, kind: input, shape index: {}]   ;;  %s13045_s4 = inlined_call_operand.hbm [shape: f32[64,192], index: 4, kind: input, shape index: {}]   ;;  %s13046_s5 = inlined_call_operand.hbm [shape: f32[1,192], index: 5, kind: input, shape index: {}]   ;;  %s13047_s6 = inlined_call_operand.hbm [shape: f32[1,64], index: 6, kind: input, shape index: {}]   ;;  %s13048_s7 = inlined_call_operand.hbm [shape: f32[32,192], index: 7, kind: input, shape index: {}]   ;;  %s13049_s8 = inlined_call_operand.hbm [shape: f32[32,192], index: 8, kind: input, shape index: {}]   ;;  %s13050_s9 = inlined_call_operand.hbm [shape: f32[64,192], index: 9, kind: input, shape index: {}]   ;;  %s13051_s10 = inlined_call_operand.hbm [shape: f32[1,192], index: 10, kind: input, shape index: {}]   ;;  %s13052_s11 = inlined_call_operand.hbm [shape: f32[1,64], index: 11, kind: input, shape index: {}]   ;;  %s13053_s12 = inlined_call_operand.hbm [shape: f32[8,64,128], index: 12, kind: input, shape index: {}]   ;;  %s13054_s13 = inlined_call_operand.hbm [shape: f32[1,128], index: 13, kind: input, shape index: {}]   ;;  %s13055_s14 = inlined_call_operand.hbm [shape: bf16[2048,128], index: 14, kind: input, shape index: {}]   ;;  %s13056_s15 = inlined_call_operand.hbm [shape: f32[1,128], index: 15, kind: input, shape index: {}]   ;;  %s13057_s16 = inlined_call_operand.hbm [shape: bf16[9216,128], index: 16, kind: input, shape index: {}]   ;;  %s13058_s17 = inlined_call_operand.hbm [shape: f32[1,128], index: 17, kind: input, shape index: {}]   ;;  %s13059_s18 = inlined_call_operand.vmem [shape: f32[384,8], index: 18, kind: input, shape index: {}]   ;;  %s13060_s19 = inlined_call_operand.hbm [shape: f32[1,8], index: 19, kind: input, shape index: {}]   ;;  %s13061_s20 = inlined_call_operand.hbm [shape: f32[2,8], index: 20, kind: output, shape index: {}]  }
   0x1   :  { %13093 = sst [smem:[#allocation47_spill]] %s13041_s0 }
   0x2   :  { %13094 = sst [smem:[#allocation48_spill]] %s13042_s1 }
   0x3   :  { %13095 = sst [smem:[#allocation49_spill]] %s13043_s2 }
   0x4   :  { %13096 = sst [smem:[#allocation50_spill]] %s13044_s3 }
   0x5   :  { %13097 = sst [smem:[#allocation51_spill]] %s13045_s4 }
   0x6   :  { %13098 = sst [smem:[#allocation52_spill]] %s13046_s5 }
   0x7   :  { %13099 = sst [smem:[#allocation53_spill]] %s13047_s6 }
   0x8   :  { %13100 = sst [smem:[#allocation54_spill]] %s13048_s7 }
   0x9   :  { %13101 = sst [smem:[#allocation55_spill]] %s13050_s9 }
   0xa   :  { %13102 = sst [smem:[#allocation56_spill]] %s13051_s10 }
   0xb   :  { %13103 = sst [smem:[#allocation57_spill]] %s13052_s11 }
   0xc   :  { %13104 = sst [smem:[#allocation58_spill]] %s13053_s12 }
   0xd   :  { %13105 = sst [smem:[#allocation59_spill]] %s13054_s13 }
   0xe   :  { %13106 = sst [smem:[#allocation60_spill]] %s13057_s16 }
   0xf   :  { %13107 = sst [smem:[#allocation61_spill]] %s13058_s17 }
  0x10   :  { %13108 = sst [smem:[#allocation62_spill]] %s13059_s18 }
  0x11   :  { %13109 = sst [smem:[#allocation63_spill]] %s13060_s19 }
  0x12   :  { %13110 = sst [smem:[#allocation64_spill]] %s13061_s20 }
  0x13   :  { %25 = vsyncpa [#allocation8], 0 }
  0x14   :  { %26 = vsyncpa [#allocation11], 0 }
  0x15   :  { %27 = vsyncpa [#allocation14], 0 }
  0x16   :  { %28 = vsyncpa [#allocation17], 0 }
  0x17   :  { %29 = vsyncpa [#allocation20], 0 }
  0x18   :  { %30 = vsyncpa [#allocation23], 0 }
  0x19   :  { %31 = vsyncpa [#allocation26], 0 }
  0x1a   :  { %32 = vsyncpa [#allocation9], 0  ;;  %s11357_s1 = smov 0   ;;  %s11359_s22 = smov 0  }
  0x1b   :  { %s11361_s23 = smov 0   ;;  %s11363_s24 = smov 0  }
  0x1c LB: > { %s11218_s2 = smov [#allocation10]   ;;  %s11378_s3 = sadd.s32 4294967295, %s11216_s24   ;;  %s11216_s24 = sphi %s11363_s24, %s13181_s24   ;;  %s11212_s23 = sphi %s11361_s23, %s13180_s23   ;;  %s11208_s22 = sphi %s11359_s22, %s13179_s22   ;;  %s11204_s1 = sphi %s11357_s1, %s13178_s1  }
  0x1d   : > { %s529_s25 = sshll.u32 %s11218_s2, 4  ;;  %p8255_p0 = scmp.ge.s32.totalorder %s11216_s24, 1  ;;  %s11384_s25 = int_to_ptr.vmem [resolvable:$true] %s529_s25 }
  0x1e   : > { %p13078_p1 = scmp.eq.s32.totalorder %s11378_s3, 0  ;;  %p504_p2 = scmp.lt.s32.totalorder %s11216_s24, 3 }
  0x1f   : > { %s11219_s27 = smov [#allocation7]   ;;  %s11220_s29 = smov [#allocation12]  }
  0x20   : > { %p11386_p4 = pnand %p8255_p0, %p504_p2  ;;  %s516_s28 = sshll.u32 %s11219_s27, 4  ;;  %s11398_s28 = int_to_ptr.vmem [resolvable:$true] %s516_s28 }
  0x21   : > { %s11400_s30 = sshll.u32 %s11220_s29, 4  ;;  %s13114_s2 = sld [smem:[#allocation50_spill]]  ;;  %s543_s30 = int_to_ptr.vmem [resolvable:$true] %s11400_s30 }
  0x22   : > { %s13111_s26 = scalar_select %p11386_p4, 1, 0 }
  0x23   : > { %p10021_p5 = pneg %p11386_p4 }
  0x24   : > { %13112 = sst [smem:[#allocation46_spill]] %s13111_s26 }
  0x25   : > { %p11394_p6 = pnand %p10021_p5, %p13078_p1 }
  0x27   : > { %s13113_s4 = scalar_select %p11394_p6, 1, 0 }
  0x28   : > { %s10628_s20 = scalar_lea.hbm %s13114_s2, 512  ;;  %p11410_p8 = pneg %p11394_p6 }
  0x29   : > { %p10629_p7 = scmp.ne.s32.totalorder %s13114_s2, %s10628_s20  ;;  %p10635_p11 = scmp.lt.u32.totalorder %s10628_s20, %s13114_s2 }
  0x2b   : > { %p10631_p9 = pnand %p11410_p8, %p10629_p7 }
  0x2d   : > { %p10632_p10 = pneg %p10631_p9 }
  0x2f   : > { %p10637_p12 = pnand %p10635_p11, %p10632_p10 }
  0x31   : > { %10640 = shalt.err (!%p10637_p12)
}
  0x32   : > { %s10641_s18 = scalar_lea.vmem %s11384_s25, 512  ;;  %p10649_p5 = scmp.lt.s32.totalorder %s11384_s25, %s11384_s25 }
  0x33   : > { %p10642_p13 = scmp.ne.s32.totalorder %s11384_s25, %s10641_s18  ;;  %p10650_p3 = scmp.lt.s32.totalorder %s10641_s18, %s10641_s18 }
  0x35   : > { %p10644_p0 = pnand %p10642_p13, %p11410_p8  ;;  %p10651_p7 = por %p10650_p3, %p10649_p5 }
  0x37   : > { %p10645_p2 = pneg %p10644_p0 }
  0x39   : > { %p10652_p9 = pnand %p10651_p7, %p10645_p2 }
  0x3b   : > { %10655 = shalt.err (!%p10652_p9)
}
  0x3c   : > { %s13074_s26 = smov 256   ;;  %s13076_s16 = smov 16  }
  0x3d   : > { %10027 = dma.hbm_to_vmem [thread:$0]  (!%p11394_p6), %s13114_s2, 512, %s11384_s25, [#allocation11], %s13074_s26, %s13074_s26, %s13076_s16  }
  0x3e   : > { %s13116_s19 = sld [smem:[#allocation47_spill]] }
  0x44   : > { %s10656_s18 = scalar_lea.hbm %s13116_s19, 256 }
  0x45   : > { %p10657_p3 = scmp.ne.s32.totalorder %s13116_s19, %s10656_s18  ;;  %p10663_p12 = scmp.lt.u32.totalorder %s10656_s18, %s13116_s19 }
  0x47   : > { %p10659_p10 = pnand %p10657_p3, %p11410_p8 }
  0x49   : > { %p10660_p11 = pneg %p10659_p10 }
  0x4b   : > { %p10665_p13 = pnand %p10663_p12, %p10660_p11 }
  0x4d   : > { %10668 = shalt.err (!%p10665_p13)
}
  0x4e   : > { %s10669_s25 = scalar_lea.vmem %s11398_s28, 256  ;;  %p10677_p7 = scmp.lt.s32.totalorder %s11398_s28, %s11398_s28 }
  0x4f   : > { %p10670_p0 = scmp.ne.s32.totalorder %s11398_s28, %s10669_s25  ;;  %p10678_p9 = scmp.lt.s32.totalorder %s10669_s25, %s10669_s25 }
  0x51   : > { %p10672_p2 = pnand %p10670_p0, %p11410_p8  ;;  %p10679_p3 = por %p10678_p9, %p10677_p7 }
  0x53   : > { %p10673_p5 = pneg %p10672_p2 }
  0x55   : > { %p10680_p10 = pnand %p10679_p3, %p10673_p5 }
  0x57   : > { %10683 = shalt.err (!%p10680_p10)
}
  0x58   : > { %s13080_s13 = smov 128   ;;  %s13081_s10 = smov 8  }
  0x59   : > { %10024 = dma.hbm_to_vmem [thread:$0]  (!%p11394_p6), %s13116_s19, 256, %s11398_s28, [#allocation8], %s13080_s13, %s13080_s13, %s13081_s10  }
  0x5a   : > { %s13117_s21 = sld [smem:[#allocation51_spill]] }
  0x60   : > { %s10684_s29 = scalar_lea.hbm %s13117_s21, 2048 }
  0x61   : > { %p10685_p11 = scmp.ne.s32.totalorder %s13117_s21, %s10684_s29  ;;  %p10691_p0 = scmp.lt.u32.totalorder %s10684_s29, %s13117_s21 }
  0x63   : > { %p10687_p12 = pnand %p10685_p11, %p11410_p8 }
  0x65   : > { %p10688_p13 = pneg %p10687_p12 }
  0x67   : > { %p10693_p2 = pnand %p10691_p0, %p10688_p13 }
  0x69   : > { %10696 = shalt.err (!%p10693_p2)
}
  0x6a   : > { %s10697_s12 = scalar_lea.vmem %s543_s30, 2048  ;;  %p10705_p3 = scmp.lt.s32.totalorder %s543_s30, %s543_s30 }
  0x6b   : > { %p10698_p5 = scmp.ne.s32.totalorder %s543_s30, %s10697_s12  ;;  %p10706_p10 = scmp.lt.s32.totalorder %s10697_s12, %s10697_s12 }
  0x6d   : > { %p10700_p7 = pnand %p10698_p5, %p11410_p8  ;;  %p10707_p1 = por %p10706_p10, %p10705_p3 }
  0x6f   : > { %p10701_p9 = pneg %p10700_p7 }
  0x71   : > { %p10708_p4 = pnand %p10707_p1, %p10701_p9 }
  0x73   : > { %10711 = shalt.err (!%p10708_p4)
}
  0x74   : > { %s13118_s28 = smov 16   ;;  %s13119_s17 = smov 256  }
  0x75   : > { %10030 = dma.hbm_to_vmem [thread:$0]  (!%p11394_p6), %s13117_s21, 2048, %s543_s30, [#allocation11], %s13119_s17, %s13119_s17, %s13118_s28  }
  0x76   : > { %s11225_s20 = smov [#allocation13]   ;;  %s11226_s29 = smov [#allocation15]  }
  0x77   : > { %s556_s0 = sshll.u32 %s11225_s20, 4  ;;  %s567_s18 = sshll.u32 %s11226_s29, 4  ;;  %s557_s0 = int_to_ptr.vmem [resolvable:$true] %s556_s0  ;;  %s568_s18 = int_to_ptr.vmem [resolvable:$true] %s567_s18 }
  0x78   : > { %s13120_s5 = sld [smem:[#allocation52_spill]] }
  0x7e   : > { %s10712_s13 = scalar_lea.hbm %s13120_s5, 32 }
  0x7f   : > { %p10713_p1 = scmp.ne.s32.totalorder %s13120_s5, %s10712_s13  ;;  %p10719_p12 = scmp.lt.u32.totalorder %s10712_s13, %s13120_s5 }
  0x81   : > { %p10715_p4 = pnand %p10713_p1, %p11410_p8 }
  0x83   : > { %p10716_p11 = pneg %p10715_p4 }
  0x85   : > { %p10721_p13 = pnand %p10719_p12, %p10716_p11 }
  0x87   : > { %10724 = shalt.err (!%p10721_p13)
}
  0x88   : > { %s10725_s30 = scalar_lea.vmem %s557_s0, 32  ;;  %p10733_p7 = scmp.lt.s32.totalorder %s557_s0, %s557_s0 }
  0x89   : > { %p10726_p0 = scmp.ne.s32.totalorder %s557_s0, %s10725_s30  ;;  %p10734_p9 = scmp.lt.s32.totalorder %s10725_s30, %s10725_s30 }
  0x8b   : > { %p10728_p2 = pnand %p10726_p0, %p11410_p8  ;;  %p10735_p3 = por %p10734_p9, %p10733_p7 }
  0x8d   : > { %p10729_p5 = pneg %p10728_p2 }
  0x8f   : > { %p10736_p10 = pnand %p10735_p3, %p10729_p5 }
  0x91   : > { %10739 = shalt.err (!%p10736_p10)
}
  0x92   : > { %10033 = dma.hbm_to_vmem [thread:$0]  (!%p11394_p6), %s13120_s5, 32, %s557_s0, [#allocation14]  }
  0x93   : > { %s13121_s6 = sld [smem:[#allocation53_spill]] }
  0x99   : > { %s10740_s16 = scalar_lea.hbm %s13121_s6, 16 }
  0x9a   : > { %p10741_p1 = scmp.ne.s32.totalorder %s13121_s6, %s10740_s16  ;;  %p10747_p12 = scmp.lt.u32.totalorder %s10740_s16, %s13121_s6 }
  0x9c   : > { %p10743_p4 = pnand %p10741_p1, %p11410_p8 }
  0x9e   : > { %p10744_p11 = pneg %p10743_p4 }
  0xa0   : > { %p10749_p13 = pnand %p10747_p12, %p10744_p11 }
  0xa2   : > { %10752 = shalt.err (!%p10749_p13)
}
  0xa3   : > { %s10753_s26 = scalar_lea.vmem %s568_s18, 16  ;;  %s10760_s0 = scalar_lea.vmem %s568_s18, 32 }
  0xa4   : > { %p10754_p0 = scmp.ne.s32.totalorder %s568_s18, %s10753_s26  ;;  %p10761_p7 = scmp.lt.s32.totalorder %s568_s18, %s568_s18 }
  0xa5   : > { %p10762_p9 = scmp.lt.s32.totalorder %s10760_s0, %s10753_s26 }
  0xa6   : > { %p10756_p2 = pnand %p10754_p0, %p11410_p8 }
  0xa7   : > { %p10763_p3 = por %p10762_p9, %p10761_p7 }
  0xa8   : > { %p10757_p5 = pneg %p10756_p2 }
  0xaa   : > { %p10764_p10 = pnand %p10763_p3, %p10757_p5 }
  0xac   : > { %10767 = shalt.err (!%p10764_p10)
}
  0xad   : > { %10036 = dma.hbm_to_vmem [thread:$0]  (!%p11394_p6), %s13121_s6, 16, %s568_s18, [#allocation14]  }
  0xae   : > { %s11227_s10 = smov [#allocation16]   ;;  %s11228_s13 = smov [#allocation19]  }
  0xaf   : > { %s577_s19 = sshll.u32 %s11227_s10, 4  ;;  %s603_s16 = sshll.u32 %s11228_s13, 4  ;;  %s578_s19 = int_to_ptr.vmem [resolvable:$true] %s577_s19  ;;  %s604_s16 = int_to_ptr.vmem [resolvable:$true] %s603_s16 }
  0xb0   : > { %s13122_s7 = sld [smem:[#allocation54_spill]] }
  0xb6   : > { %s10768_s25 = scalar_lea.hbm %s13122_s7, 1024 }
  0xb7   : > { %p10769_p1 = scmp.ne.s32.totalorder %s13122_s7, %s10768_s25  ;;  %p10775_p12 = scmp.lt.u32.totalorder %s10768_s25, %s13122_s7 }
  0xb9   : > { %p10771_p4 = pnand %p10769_p1, %p11410_p8 }
  0xbb   : > { %p10772_p11 = pneg %p10771_p4 }
  0xbd   : > { %p10777_p13 = pnand %p10775_p12, %p10772_p11 }
  0xbf   : > { %10780 = shalt.err (!%p10777_p13)
}
  0xc0   : > { %s10781_s18 = scalar_lea.vmem %s578_s19, 1024  ;;  %p10789_p7 = scmp.lt.s32.totalorder %s578_s19, %s578_s19 }
  0xc1   : > { %p10782_p0 = scmp.ne.s32.totalorder %s578_s19, %s10781_s18  ;;  %p10790_p9 = scmp.lt.s32.totalorder %s10781_s18, %s10781_s18 }
  0xc3   : > { %p10784_p2 = pnand %p10782_p0, %p11410_p8  ;;  %p10791_p3 = por %p10790_p9, %p10789_p7 }
  0xc5   : > { %p10785_p5 = pneg %p10784_p2 }
  0xc7   : > { %p10792_p10 = pnand %p10791_p3, %p10785_p5 }
  0xc9   : > { %10795 = shalt.err (!%p10792_p10)
}
  0xca   : > { %10039 = dma.hbm_to_vmem [thread:$0]  (!%p11394_p6), %s13122_s7, 1024, %s578_s19, [#allocation17], %s13119_s17, %s13119_s17, %s13118_s28  }
  0xcb   : > { %s13123_s9 = sld [smem:[#allocation55_spill]] }
  0xd1   : > { %s10796_s29 = scalar_lea.hbm %s13123_s9, 2048 }
  0xd2   : > { %p10797_p1 = scmp.ne.s32.totalorder %s13123_s9, %s10796_s29  ;;  %p10803_p12 = scmp.lt.u32.totalorder %s10796_s29, %s13123_s9 }
  0xd4   : > { %p10799_p4 = pnand %p10797_p1, %p11410_p8 }
  0xd6   : > { %p10800_p11 = pneg %p10799_p4 }
  0xd8   : > { %p10805_p13 = pnand %p10803_p12, %p10800_p11 }
  0xda   : > { %10808 = shalt.err (!%p10805_p13)
}
  0xdb   : > { %s10809_s30 = scalar_lea.vmem %s604_s16, 2048  ;;  %p10817_p7 = scmp.lt.s32.totalorder %s604_s16, %s604_s16 }
  0xdc   : > { %p10810_p0 = scmp.ne.s32.totalorder %s604_s16, %s10809_s30  ;;  %p10818_p9 = scmp.lt.s32.totalorder %s10809_s30, %s10809_s30 }
  0xde   : > { %p10812_p2 = pnand %p10810_p0, %p11410_p8  ;;  %p10819_p3 = por %p10818_p9, %p10817_p7 }
  0xe0   : > { %p10813_p5 = pneg %p10812_p2 }
  0xe2   : > { %p10820_p10 = pnand %p10819_p3, %p10813_p5 }
  0xe4   : > { %10823 = shalt.err (!%p10820_p10)
}
  0xe5   : > { %10045 = dma.hbm_to_vmem [thread:$0]  (!%p11394_p6), %s13123_s9, 2048, %s604_s16, [#allocation20], %s13119_s17, %s13119_s17, %s13118_s28  }
  0xe6   : > { %s11229_s2 = smov [#allocation22]   ;;  %s11230_s13 = smov [#allocation28]  }
  0xe7   : > { %s628_s10 = sshll.u32 %s11229_s2, 4  ;;  %s663_s20 = sshll.u32 %s11230_s13, 4  ;;  %s629_s10 = int_to_ptr.vmem [resolvable:$true] %s628_s10  ;;  %s664_s20 = int_to_ptr.vmem [resolvable:$true] %s663_s20 }
  0xe8   : > { %s13124_s11 = sld [smem:[#allocation57_spill]] }
  0xee   : > { %s10824_s12 = scalar_lea.hbm %s13124_s11, 16 }
  0xef   : > { %p10825_p1 = scmp.ne.s32.totalorder %s13124_s11, %s10824_s12  ;;  %p10831_p12 = scmp.lt.u32.totalorder %s10824_s12, %s13124_s11 }
  0xf1   : > { %p10827_p4 = pnand %p10825_p1, %p11410_p8 }
  0xf3   : > { %p10828_p11 = pneg %p10827_p4 }
  0xf5   : > { %p10833_p13 = pnand %p10831_p12, %p10828_p11 }
  0xf7   : > { %10836 = shalt.err (!%p10833_p13)
}
  0xf8   : > { %s10837_s16 = scalar_lea.vmem %s629_s10, 16  ;;  %s10844_s18 = scalar_lea.vmem %s629_s10, 32 }
  0xf9   : > { %p10838_p0 = scmp.ne.s32.totalorder %s629_s10, %s10837_s16  ;;  %p10845_p7 = scmp.lt.s32.totalorder %s629_s10, %s629_s10 }
  0xfa   : > { %p10846_p9 = scmp.lt.s32.totalorder %s10844_s18, %s10837_s16 }
  0xfb   : > { %p10840_p2 = pnand %p10838_p0, %p11410_p8 }
  0xfc   : > { %p10847_p3 = por %p10846_p9, %p10845_p7 }
  0xfd   : > { %p10841_p5 = pneg %p10840_p2 }
  0xff   : > { %p10848_p10 = pnand %p10847_p3, %p10841_p5 }
 0x101   : > { %10851 = shalt.err (!%p10848_p10)
}
 0x102   : > { %10051 = dma.hbm_to_vmem [thread:$0]  (!%p11394_p6), %s13124_s11, 16, %s629_s10, [#allocation23]  }
 0x103   : > { %s10852_s12 = scalar_lea.hbm %s13056_s15, 16 }
 0x104   : > { %p10853_p1 = scmp.ne.s32.totalorder %s13056_s15, %s10852_s12  ;;  %p10859_p12 = scmp.lt.u32.totalorder %s10852_s12, %s13056_s15 }
 0x106   : > { %p10855_p4 = pnand %p10853_p1, %p11410_p8 }
 0x108   : > { %p10856_p11 = pneg %p10855_p4 }
 0x10a   : > { %p10861_p13 = pnand %p10859_p12, %p10856_p11 }
 0x10c   : > { %10864 = shalt.err (!%p10861_p13)
}
 0x10d   : > { %s10865_s16 = scalar_lea.vmem %s664_s20, 16  ;;  %s10872_s10 = scalar_lea.vmem %s664_s20, 32 }
 0x10e   : > { %p10866_p0 = scmp.ne.s32.totalorder %s664_s20, %s10865_s16  ;;  %p10873_p7 = scmp.lt.s32.totalorder %s664_s20, %s664_s20 }
 0x10f   : > { %p10874_p9 = scmp.lt.s32.totalorder %s10872_s10, %s10865_s16 }
 0x110   : > { %p10868_p2 = pnand %p10866_p0, %p11410_p8 }
 0x111   : > { %p10875_p3 = por %p10874_p9, %p10873_p7 }
 0x112   : > { %p10869_p5 = pneg %p10868_p2 }
 0x114   : > { %p10876_p10 = pnand %p10875_p3, %p10869_p5 }
 0x116   : > { %10879 = shalt.err (!%p10876_p10)
}
 0x117   : > { %10060 = dma.hbm_to_vmem [thread:$0]  (!%p11394_p6), %s13056_s15, 16, %s664_s20, [#allocation11]  }
 0x118   : > { %s11597_s13 = sadd.s32 1, %s11216_s24   ;;  %s349_s25 = sadd.s32 1, %s11212_s23 }
 0x119   : > { %s346_s29 = ssub.s32 %s11216_s24, %s11597_s13  ;;  %p356_p4 = scmp.ne.s32.totalorder %s11212_s23, %s11208_s22 }
 0x11a   : > { %p347_p1 = scmp.eq.s32.totalorder %s346_s29, 0  ;;  %p357_p11 = scmp.eq.s32.totalorder %s11216_s24, 0 }
 0x11b   : > { %p362_p12 = scmp.ne.s32.totalorder %s11208_s22, %s11204_s1  ;;  %p13125_p0 = scmp.eq.s32.totalorder %s11378_s3, 0 }
 0x11c   : > { %s11608_s12 = scalar_select %p347_p1, %s11212_s23, %s349_s25  }
 0x11d   : > { %p358_p13 = por %p357_p11, %p356_p4  ;;  %p11612_p2 = por %p13125_p0, %p362_p12 }
 0x11e   : > { %p10089_p5 = scmp.lt.s32.totalorder %s11216_s24, 2  ;;  %s715_s0 = sand.u32 1, %s11216_s24  }
 0x11f   : > { %s13126_s26 = scalar_select %p11612_p2, 1, 0 }
 0x120   : > { %s13084_s20 = sand.u32 1, %s11212_s23   ;;  %s8705_s19 = sshll.u32 %s11216_s24, 13 }
 0x121   : > { %s8272_s30 = sshll.u32 %s13084_s20, 9  ;;  %s11625_s18 = scalar_lea.hbm %s13055_s14, %s8705_s19 }
 0x122   : > { %s719_s1 = scalar_lea.vmem [#allocation27], %s8272_s30  ;;  %p11627_p7 = pnand %p10089_p5, %p358_p13 }
 0x123   : > { %s726_s2 = sshll.u32 %s719_s1, 4  ;;  %s11633_s25 = scalar_lea.sflag [#allocation8], %s715_s0  ;;  %s11631_s2 = int_to_ptr.vmem [resolvable:$true] %s726_s2 }
 0x124   : > { %s13127_s29 = scalar_select %p11627_p7, 1, 0 }
 0x125   : > { %s10880_s20 = scalar_lea.hbm %s11625_s18, 8192  ;;  %p13088_p3 = pneg %p11627_p7 }
 0x126   : > { %p10881_p9 = scmp.ne.s32.totalorder %s11625_s18, %s10880_s20  ;;  %s10885_s16 = scalar_lea.hbm %s13055_s14, 16384 }
 0x127   : > { %p10886_p4 = scmp.lt.u32.totalorder %s11625_s18, %s13055_s14  ;;  %p10887_p11 = scmp.lt.u32.totalorder %s10885_s16, %s10880_s20 }
 0x128   : > { %p10883_p10 = pnand %p13088_p3, %p10881_p9  ;;  %p10889_p13 = scmp.lt.u32.totalorder %s10880_s20, %s11625_s18 }
 0x129   : > { %p10888_p12 = por %p10887_p11, %p10886_p4 }
 0x12a   : > { %p10884_p1 = pneg %p10883_p10 }
 0x12b   : > { %p10890_p0 = por %p10889_p13, %p10888_p12 }
 0x12d   : > { %p10891_p5 = pnand %p10890_p0, %p10884_p1 }
 0x12f   : > { %10894 = shalt.err (!%p10891_p5)
}
 0x130   : > { %s10895_s0 = scalar_lea.vmem %s11631_s2, 8192  ;;  %s11231_s30 = smov [#allocation27]  }
 0x131   : > { %p10896_p9 = scmp.ne.s32.totalorder %s11631_s2, %s10895_s0  ;;  %s10900_s19 = sshll.u32 %s11231_s30, 4  ;;  %s10901_s19 = int_to_ptr.vmem [resolvable:$false] %s10900_s19 }
 0x132   : > { %s10902_s10 = scalar_lea.vmem %s10901_s19, 16384  ;;  %p10903_p6 = scmp.lt.s32.totalorder %s11631_s2, %s10901_s19 }
 0x133   : > { %p10898_p10 = pnand %p10896_p9, %p13088_p3  ;;  %p10904_p4 = scmp.lt.s32.totalorder %s10902_s10, %s10895_s0 }
 0x135   : > { %p10899_p2 = pneg %p10898_p10  ;;  %p10905_p11 = por %p10904_p4, %p10903_p6 }
 0x137   : > { %p10906_p12 = pnand %p10905_p11, %p10899_p2 }
 0x139   : > { %10909 = shalt.err (!%p10906_p12)
}
 0x13a   : > { %s13091_s20 = smov 64   ;;  %s13092_s16 = smov 4  }
 0x13b   : > { %10070 = dma.hbm_to_vmem [thread:$0]  (!%p11627_p7), %s11625_s18, 8192, %s11631_s2, %s11633_s25, %s13091_s20, %s13091_s20, %s13092_s16  }
 0x13c   : > { %s11234_s1 = smov [#allocation18]   ;;  %s11235_s5 = smov [#allocation21]  }
 0x13d   : > { %s590_s30 = sshll.u32 %s11234_s1, 4  ;;  %s617_s19 = sshll.u32 %s11235_s5, 4  ;;  %s591_s30 = int_to_ptr.vmem [resolvable:$true] %s590_s30  ;;  %s11664_s19 = int_to_ptr.vmem [resolvable:$true] %s617_s19 }
 0x13e   : > { %s10910_s6 = scalar_lea.hbm %s13049_s8, 1024 }
 0x13f   : > { %p10911_p6 = scmp.ne.s32.totalorder %s13049_s8, %s10910_s6  ;;  %p10917_p13 = scmp.lt.u32.totalorder %s10910_s6, %s13049_s8 }
 0x141   : > { %p10913_p2 = pnand %p10911_p6, %p11410_p8 }
 0x143   : > { %p10914_p1 = pneg %p10913_p2 }
 0x145   : > { %p10919_p0 = pnand %p10917_p13, %p10914_p1 }
 0x147   : > { %10922 = shalt.err (!%p10919_p0)
}
 0x148   : > { %s10923_s5 = scalar_lea.vmem %s591_s30, 1024  ;;  %p10931_p4 = scmp.lt.s32.totalorder %s591_s30, %s591_s30 }
 0x149   : > { %p10924_p5 = scmp.ne.s32.totalorder %s591_s30, %s10923_s5  ;;  %p10932_p11 = scmp.lt.s32.totalorder %s10923_s5, %s10923_s5 }
 0x14b   : > { %p10926_p9 = pnand %p10924_p5, %p11410_p8  ;;  %p10933_p12 = por %p10932_p11, %p10931_p4 }
 0x14d   : > { %p10927_p10 = pneg %p10926_p9 }
 0x14f   : > { %p10934_p3 = pnand %p10933_p12, %p10927_p10 }
 0x151   : > { %10937 = shalt.err (!%p10934_p3)
}
 0x152   : > { %p13128_p6 = scmp.ne.s32.totalorder %s13113_s4, 0  ;;  %s13129_s2 = sld [smem:[#allocation56_spill]] }
 0x154   : > { %10042 = dma.hbm_to_vmem [thread:$0]  (!%p13128_p6), %s13049_s8, 1024, %s591_s30, [#allocation17], %s13119_s17, %s13119_s17, %s13118_s28  }
 0x158   : > { %s10938_s1 = scalar_lea.hbm %s13129_s2, 32 }
 0x159   : > { %p10939_p2 = scmp.ne.s32.totalorder %s13129_s2, %s10938_s1  ;;  %p10945_p13 = scmp.lt.u32.totalorder %s10938_s1, %s13129_s2 }
 0x15b   : > { %p10941_p3 = pnand %p10939_p2, %p11410_p8 }
 0x15d   : > { %p10942_p1 = pneg %p10941_p3 }
 0x15f   : > { %p10947_p0 = pnand %p10945_p13, %p10942_p1 }
 0x161   : > { %10950 = shalt.err (!%p10947_p0)
}
 0x162   : > { %s10951_s28 = scalar_lea.vmem %s11664_s19, 32  ;;  %p10959_p4 = scmp.lt.s32.totalorder %s11664_s19, %s11664_s19 }
 0x163   : > { %p10952_p5 = scmp.ne.s32.totalorder %s11664_s19, %s10951_s28  ;;  %p10960_p11 = scmp.lt.s32.totalorder %s10951_s28, %s10951_s28 }
 0x165   : > { %p10954_p9 = pnand %p10952_p5, %p11410_p8  ;;  %p10961_p12 = por %p10960_p11, %p10959_p4 }
 0x167   : > { %p10955_p10 = pneg %p10954_p9 }
 0x169   : > { %p10962_p2 = pnand %p10961_p12, %p10955_p10 }
 0x16b   : > { %10965 = shalt.err (!%p10962_p2)
}
 0x16c   : > { %10048 = dma.hbm_to_vmem [thread:$0]  (!%p13128_p6), %s13129_s2, 32, %s11664_s19, [#allocation20]  }
 0x16d   : > { %s11236_s7 = smov [#allocation24]   ;;  %s11237_s9 = smov [#allocation25]  }
 0x16e   : > { %s638_s6 = sshll.u32 %s11236_s7, 4  ;;  %s652_s11 = sshll.u32 %s11237_s9, 4  ;;  %s639_s6 = int_to_ptr.vmem [resolvable:$true] %s638_s6  ;;  %s11710_s11 = int_to_ptr.vmem [resolvable:$true] %s652_s11 }
 0x16f   : > { %s13130_s10 = sld [smem:[#allocation58_spill]] }
 0x175   : > { %s10966_s18 = scalar_lea.hbm %s13130_s10, 8192 }
 0x176   : > { %p10967_p3 = scmp.ne.s32.totalorder %s13130_s10, %s10966_s18  ;;  %p10973_p0 = scmp.lt.u32.totalorder %s10966_s18, %s13130_s10 }
 0x178   : > { %p10969_p1 = pnand %p10967_p3, %p11410_p8 }
 0x17a   : > { %p10970_p13 = pneg %p10969_p1 }
 0x17c   : > { %p10975_p5 = pnand %p10973_p0, %p10970_p13 }
 0x17e   : > { %10978 = shalt.err (!%p10975_p5)
}
 0x17f   : > { %s10979_s30 = scalar_lea.vmem %s639_s6, 8192  ;;  %p10987_p11 = scmp.lt.s32.totalorder %s639_s6, %s639_s6 }
 0x180   : > { %p10980_p9 = scmp.ne.s32.totalorder %s639_s6, %s10979_s30  ;;  %p10988_p12 = scmp.lt.s32.totalorder %s10979_s30, %s10979_s30 }
 0x182   : > { %p10982_p10 = pnand %p10980_p9, %p11410_p8  ;;  %p10989_p2 = por %p10988_p12, %p10987_p11 }
 0x184   : > { %p10983_p4 = pneg %p10982_p10 }
 0x186   : > { %p10990_p7 = pnand %p10989_p2, %p10983_p4 }
 0x188   : > { %10993 = shalt.err (!%p10990_p7)
}
 0x189   : > { %s13131_s7 = smov 8   ;;  %s13132_s9 = smov 128  }
 0x18a   : > { %10054 = dma.hbm_to_vmem [thread:$0]  (!%p13128_p6), %s13130_s10, 8192, %s639_s6, [#allocation23], %s13132_s9, %s13132_s9, %s13131_s7  }
 0x18b   : > { %s13133_s28 = sld [smem:[#allocation59_spill]] }
 0x191   : > { %s10994_s17 = scalar_lea.hbm %s13133_s28, 16 }
 0x192   : > { %p10995_p3 = scmp.ne.s32.totalorder %s13133_s28, %s10994_s17  ;;  %p11001_p13 = scmp.lt.u32.totalorder %s10994_s17, %s13133_s28 }
 0x194   : > { %p10997_p7 = pnand %p10995_p3, %p11410_p8 }
 0x196   : > { %p10998_p1 = pneg %p10997_p7 }
 0x198   : > { %p11003_p0 = pnand %p11001_p13, %p10998_p1 }
 0x19a   : > { %11006 = shalt.err (!%p11003_p0)
}
 0x19b   : > { %s11007_s6 = scalar_lea.vmem %s11710_s11, 16  ;;  %s11014_s20 = scalar_lea.vmem %s11710_s11, 32 }
 0x19c   : > { %p11008_p5 = scmp.ne.s32.totalorder %s11710_s11, %s11007_s6  ;;  %p11015_p4 = scmp.lt.s32.totalorder %s11710_s11, %s11710_s11 }
 0x19d   : > { %p11016_p11 = scmp.lt.s32.totalorder %s11014_s20, %s11007_s6 }
 0x19e   : > { %p11010_p9 = pnand %p11008_p5, %p11410_p8 }
 0x19f   : > { %p11017_p12 = por %p11016_p11, %p11015_p4 }
 0x1a0   : > { %p11011_p10 = pneg %p11010_p9 }
 0x1a2   : > { %p11018_p2 = pnand %p11017_p12, %p11011_p10 }
 0x1a4   : > { %11021 = shalt.err (!%p11018_p2)
}
 0x1a5   : > { %10057 = dma.hbm_to_vmem [thread:$0]  (!%p13128_p6), %s13133_s28, 16, %s11710_s11, [#allocation26]  }
 0x1a6   : > { %s11238_s9 = smov [#allocation30]   ;;  %s11239_s0 = smov [#allocation31]  }
 0x1a7   : > { %s674_s1 = sshll.u32 %s11238_s9, 4  ;;  %s688_s18 = sshll.u32 %s11239_s0, 4  ;;  %s675_s1 = int_to_ptr.vmem [resolvable:$true] %s674_s1  ;;  %s11757_s18 = int_to_ptr.vmem [resolvable:$true] %s688_s18 }
 0x1a8   : > { %s13134_s19 = sld [smem:[#allocation61_spill]] }
 0x1ae   : > { %s11022_s30 = scalar_lea.hbm %s13134_s19, 16 }
 0x1af   : > { %p11023_p3 = scmp.ne.s32.totalorder %s13134_s19, %s11022_s30  ;;  %p11029_p13 = scmp.lt.u32.totalorder %s11022_s30, %s13134_s19 }
 0x1b1   : > { %p11025_p7 = pnand %p11023_p3, %p11410_p8 }
 0x1b3   : > { %p11026_p1 = pneg %p11025_p7 }
 0x1b5   : > { %p11031_p0 = pnand %p11029_p13, %p11026_p1 }
 0x1b7   : > { %11034 = shalt.err (!%p11031_p0)
}
 0x1b8   : > { %s11035_s7 = scalar_lea.vmem %s675_s1, 16  ;;  %s11042_s9 = scalar_lea.vmem %s675_s1, 32 }
 0x1b9   : > { %p11036_p5 = scmp.ne.s32.totalorder %s675_s1, %s11035_s7  ;;  %p11043_p4 = scmp.lt.s32.totalorder %s675_s1, %s675_s1 }
 0x1ba   : > { %p11044_p11 = scmp.lt.s32.totalorder %s11042_s9, %s11035_s7 }
 0x1bb   : > { %p11038_p9 = pnand %p11036_p5, %p11410_p8 }
 0x1bc   : > { %p11045_p12 = por %p11044_p11, %p11043_p4 }
 0x1bd   : > { %p11039_p10 = pneg %p11038_p9 }
 0x1bf   : > { %p11046_p2 = pnand %p11045_p12, %p11039_p10 }
 0x1c1   : > { %11049 = shalt.err (!%p11046_p2)
}
 0x1c2   : > { %10063 = dma.hbm_to_vmem [thread:$0]  (!%p13128_p6), %s13134_s19, 16, %s675_s1, [#allocation11]  }
 0x1c3   : > { %s13135_s6 = sld [smem:[#allocation63_spill]] }
 0x1c9   : > { %s11050_s20 = scalar_lea.hbm %s13135_s6, 16 }
 0x1ca   : > { %p11051_p3 = scmp.ne.s32.totalorder %s13135_s6, %s11050_s20  ;;  %p11057_p13 = scmp.lt.u32.totalorder %s11050_s20, %s13135_s6 }
 0x1cc   : > { %p11053_p7 = pnand %p11051_p3, %p11410_p8 }
 0x1ce   : > { %p11054_p1 = pneg %p11053_p7 }
 0x1d0   : > { %p11059_p0 = pnand %p11057_p13, %p11054_p1 }
 0x1d2   : > { %11062 = shalt.err (!%p11059_p0)
}
 0x1d3   : > { %s11063_s1 = scalar_lea.vmem %s11757_s18, 16  ;;  %s11070_s0 = scalar_lea.vmem %s11757_s18, 32 }
 0x1d4   : > { %p11064_p5 = scmp.ne.s32.totalorder %s11757_s18, %s11063_s1  ;;  %p11071_p4 = scmp.lt.s32.totalorder %s11757_s18, %s11757_s18 }
 0x1d5   : > { %p11072_p11 = scmp.lt.s32.totalorder %s11070_s0, %s11063_s1 }
 0x1d6   : > { %p11066_p9 = pnand %p11064_p5, %p11410_p8 }
 0x1d7   : > { %p11073_p12 = por %p11072_p11, %p11071_p4 }
 0x1d8   : > { %p11067_p10 = pneg %p11066_p9 }
 0x1da   : > { %p11074_p2 = pnand %p11073_p12, %p11067_p10 }
 0x1dc   : > { %11077 = shalt.err (!%p11074_p2)
}
 0x1dd   : > { %10066 = dma.hbm_to_vmem [thread:$0]  (!%p13128_p6), %s13135_s6, 16, %s11757_s18, [#allocation14]  }
 0x1de   : > { %s13136_s27 = sand.u32 1, %s11212_s23   ;;  %s8706_s20 = smul.u32 36864, %s11216_s24 }
 0x1df   : > { %s9951_s30 = smul.u32 2304, %s13136_s27  ;;  %s13137_s7 = sld [smem:[#allocation60_spill]] }
 0x1e0   : > { %p13138_p3 = scmp.ne.s32.totalorder %s13127_s29, 0 }
 0x1e1   : > { %s740_s4 = scalar_lea.vmem [#allocation29], %s9951_s30 }
 0x1e2   : > { %s747_s1 = sshll.u32 %s740_s4, 4  ;;  %p13139_p6 = pneg %p13138_p3  ;;  %s11809_s1 = int_to_ptr.vmem [resolvable:$true] %s747_s1 }
 0x1e5   : > { %s11807_s9 = scalar_lea.hbm %s13137_s7, %s8706_s20  ;;  %s11083_s5 = scalar_lea.hbm %s13137_s7, 73728 }
 0x1e6   : > { %s11078_s0 = scalar_lea.hbm %s11807_s9, 36864  ;;  %p11084_p13 = scmp.lt.u32.totalorder %s11807_s9, %s13137_s7 }
 0x1e7   : > { %p11079_p8 = scmp.ne.s32.totalorder %s11807_s9, %s11078_s0  ;;  %p11085_p0 = scmp.lt.u32.totalorder %s11083_s5, %s11078_s0 }
 0x1e8   : > { %p11087_p9 = scmp.lt.u32.totalorder %s11078_s0, %s11807_s9 }
 0x1e9   : > { %p11081_p7 = pnand %p11079_p8, %p13139_p6  ;;  %p11086_p5 = por %p11085_p0, %p11084_p13 }
 0x1eb   : > { %p11082_p1 = pneg %p11081_p7  ;;  %p11088_p10 = por %p11087_p9, %p11086_p5 }
 0x1ed   : > { %p11089_p4 = pnand %p11088_p10, %p11082_p1 }
 0x1ef   : > { %11092 = shalt.err (!%p11089_p4)
}
 0x1f0   : > { %s11093_s30 = scalar_lea.vmem %s11809_s1, 36864  ;;  %p13140_p12 = pmov %p13139_p6 }
 0x1f1   : > { %p11094_p11 = scmp.ne.s32.totalorder %s11809_s1, %s11093_s30  ;;  %s11240_s20 = smov [#allocation29]  }
 0x1f2   : > { %s11098_s16 = sshll.u32 %s11240_s20, 4  ;;  %s11099_s16 = int_to_ptr.vmem [resolvable:$false] %s11098_s16 }
 0x1f3   : > { %p11096_p2 = pnand %p11094_p11, %p13140_p12  ;;  %s11100_s11 = scalar_lea.vmem %s11099_s16, 73728 }
 0x1f4   : > { %p11101_p6 = scmp.lt.s32.totalorder %s11809_s1, %s11099_s16  ;;  %p11102_p7 = scmp.lt.s32.totalorder %s11100_s11, %s11093_s30 }
 0x1f5   : > { %p11097_p8 = pneg %p11096_p2 }
 0x1f6   : > { %p11103_p13 = por %p11102_p7, %p11101_p6 }
 0x1f8   : > { %p11104_p0 = pnand %p11103_p13, %p11097_p8 }
 0x1fa   : > { %11107 = shalt.err (!%p11104_p0)
}
 0x1fb   : > { %s13141_s4 = smov 4   ;;  %s13142_s0 = smov 64  }
 0x1fc   : > { %10073 = dma.hbm_to_vmem [thread:$0]  (!%p13138_p3), %s11807_s9, 36864, %s11809_s1, %s11633_s25, %s13142_s0, %s13142_s0, %s13141_s4  }
 0x1fd   : > { %s13143_s24 = sld [smem:[#allocation46_spill]] }
 0x203   : > { %p13144_p1 = scmp.ne.s32.totalorder %s13143_s24, 0 }
 0x204   : > { %p13145_p5 = scmp.eq.s32.totalorder (!%p13144_p1), %s11378_s3, 0 }
 0x205   : > { %759 = sbr.rel (%p13144_p1) target bundleno = 9564 (0x255c), region = 100 }
 0x20c   : > { %11151 = dma.done.wait (%p13145_p5), [#allocation8], 256   ;;  %p13146_p9 = pmov %p13145_p5 }
 0x20d   : > { %p13147_p10 = pmov %p13145_p5 }
 0x20e   : > { %11153 = vsyncadd (%p13146_p9), [#allocation8], 4294967040 }
 0x20f   : > { %11155 = dma.done.wait (%p13147_p10), [#allocation11], 2560   ;;  %p13148_p4 = pmov %p13145_p5 }
 0x211   : > { %11157 = vsyncadd (%p13148_p4), [#allocation11], 4294964736  ;;  %p13149_p11 = pmov %p13148_p4 }
 0x212   : > { %p13150_p3 = pmov %p13148_p4 }
 0x213   : > { %11159 = dma.done.wait (%p13149_p11), [#allocation14], 48  }
 0x214   : > { %11161 = vsyncadd (%p13150_p3), [#allocation14], 4294967248  ;;  %p13151_p12 = pmov %p13150_p3 }
 0x215   : > { %p13152_p2 = pmov %p13150_p3 }
 0x216   : > { %11163 = dma.done.wait (%p13151_p12), [#allocation17], 2048  }
 0x217   : > { %11165 = vsyncadd (%p13152_p2), [#allocation17], 4294965248  ;;  %p13153_p8 = pmov %p13152_p2 }
 0x218   : > { %p13154_p6 = pmov %p13152_p2 }
 0x219   : > { %11167 = dma.done.wait (%p13153_p8), [#allocation20], 2080  }
 0x21a   : > { %11169 = vsyncadd (%p13154_p6), [#allocation20], 4294965216  ;;  %p13155_p7 = pmov %p13152_p2 }
 0x21b   : > { %p13156_p13 = pmov %p13152_p2 }
 0x21c   : > { %11171 = dma.done.wait (%p13155_p7), [#allocation23], 8208  }
 0x21d   : > { %11173 = vsyncadd (%p13156_p13), [#allocation23], 4294959088  ;;  %p13157_p0 = pmov %p13152_p2 }
 0x21f   : > { %11175 = dma.done.wait (%p13157_p0), [#allocation26], 16   ;;  %p13158_p1 = pmov %p13157_p0 }
 0x220   : > { %s809_s29 = sand.u32 1, %s11378_s3   ;;  %s811_s25 = sand.u32 1, %s11208_s22  }
 0x221   : > { %11177 = vsyncadd (%p13158_p1), [#allocation26], 4294967280  ;;  %s8289_s9 = sshll.u32 %s811_s25, 9  ;;  %s810_s1 = scalar_lea.sflag [#allocation8], %s809_s29 }
 0x222   : > { %s11870_s18 = scalar_lea.vmem [#allocation27], %s8289_s9  ;;  %p13159_p5 = scmp.ne.s32.totalorder %s13126_s26, 0 }
 0x224   : > { %11179 = dma.done.wait (%p13159_p5), %s810_s1, 8192  }
 0x225   : > { %11181 = vsyncadd (%p13159_p5), %s810_s1, 4294959104  ;;  %p13160_p9 = pmov %p13157_p0 }
 0x226   : > { %p13161_p10 = pmov %p13157_p0 }
 0x227   : > { %11183 = dma.done.wait (%p13160_p9), [#allocation11], 16  }
 0x228   : > { %11185 = vsyncadd (%p13161_p10), [#allocation11], 4294967280  ;;  %s9952_s5 = smul.u32 2304, %s811_s25 }
 0x22a   : > { %s11880_s17 = scalar_lea.vmem [#allocation29], %s9952_s5 }
 0x22b   : > { %11187 = dma.done.wait (%p13159_p5), %s810_s1, 36864  }
 0x22c   : > { %11189 = vsyncadd (%p13159_p5), %s810_s1, 4294930432  ;;  %p13162_p4 = pmov %p13157_p0 }
 0x22d   : > { %p13163_p11 = pmov %p13157_p0 }
 0x22e   : > { %11191 = dma.done.wait (%p13162_p4), [#allocation11], 16  }
 0x22f   : > { %11193 = vsyncadd (%p13163_p11), [#allocation11], 4294967280  ;;  %p13164_p3 = pmov %p13157_p0 }
 0x230   : > { %p13165_p12 = pmov %p13157_p0 }
 0x231   : > { %11195 = dma.done.wait (%p13164_p3), [#allocation14], 16  }
 0x232   : > { %11197 = vsyncadd (%p13165_p12), [#allocation14], 4294967280  ;;  %s8293_s27 = sshll.u32 %s11378_s3, 3  ;;  %s904_s30 = smul.u32 36, %s11378_s3 }
 0x233   : > { %p900_p2 = scmp.lt.s32.totalorder %s8293_s27, 15  ;;  %s13166_s16 = sld [smem:[#allocation48_spill]] }
 0x234   : > { %p905_p8 = scmp.lt.s32.totalorder %s904_s30, 71  ;;  %s13167_s24 = sld [smem:[#allocation49_spill]] }
 0x235   : > { %s13183_s27 = smov (!%p900_p2, %s8293_s27), 15  ;;  %p13168_p6 = scmp.ne.s32.totalorder %s11378_s3, 0 }
 0x236   : > { %s13185_s30 = smov (!%p905_p8, %s904_s30), 71  ;;  %v1095_v0 = vld [vmem:[#allocation12 + $0x8] sm:$0xff] (!%p13168_p6)  ;;  %v1097_v1 = vld [vmem:[#allocation12 + $0x18] sm:$0xff] (!%p13168_p6)  ;;  %v1094_v2 = vld [vmem:[#allocation12] sm:$0xff] (!%p13168_p6)  ;;  %vm1010_vm0 = vcmask (!%p13168_p6), 1044480   ;;  %v11241_v7 = vmov (!%p13168_p6), 0.0  }
 0x237   : > { %915 = sbr.rel (%p13168_p6) target bundleno = 8729 (0x2219), region = 172  ;;  %v11909_v3 = vpack.c.bf16 (!%p13168_p6), %v1097_v1, %v1095_v0  ;;  %v1096_v4 = vld [vmem:[#allocation12 + $0x10] sm:$0xff] (!%p13168_p6)  ;;  %v989_v5 = vld [vmem:[#allocation10 + $0x8] sm:$0xff] (!%p13168_p6)  ;;  %v991_v6 = vld [vmem:[#allocation10 + $0x18] sm:$0x1f] (!%p13168_p6)  ;;  %1081 = vmatprep.mubr.f32.mxu0 (!%p13168_p6), %v11241_v7  ;;  %1222 = vmatprep.mubr.f32.mxu1 (!%p13168_p6), %v11241_v7  ;;  %vm11242_vm1 = vmmov (!%p13168_p6), 1  }
 0x238   : > { %916 = vst [vmem:[#allocation2] sm:$0x3] (!%p13168_p6), %v11241_v7  ;;  %917 = vst [vmem:[#allocation3] sm:$0x3] (!%p13168_p6), %v11241_v7  ;;  %v11915_v8 = vpack.c.bf16 (!%p13168_p6), %v1096_v4, %v1094_v2  ;;  %v9502_v9 = vpack.c.bf16 (!%p13168_p6), %v991_v6, %v989_v5  ;;  %v1099_v11 = vld [vmem:[#allocation12 + $0x28] sm:$0xff] (!%p13168_p6)  ;;  %v1101_v12 = vld [vmem:[#allocation12 + $0x38] sm:$0xff] (!%p13168_p6) }
 0x239   : > { %s902_s11 = scalar_lea.vmem %s13166_s16, %s13183_s27  ;;  %vm11917_vm2 = vmpackc.low (!%p13168_p6), %vm1010_vm0, %vm11242_vm1  ;;  %9509 = vmatprep.subr.bf16.mxu1 (!%p13168_p6), %v11909_v3  ;;  %v11922_v13 = vpack.c.bf16 (!%p13168_p6), %v1101_v12, %v1099_v11  ;;  %v988_v14 = vld [vmem:[#allocation10] sm:$0xff] (!%p13168_p6)  ;;  %v990_v15 = vld [vmem:[#allocation10 + $0x10] sm:$0x1f] (!%p13168_p6)  ;;  %vm922_vm3 = vcmask (!%p13168_p6), 105472   ;;  %vm946_vm4 = vcmask (!%p13168_p6), 1041409   ;;  %vm951_vm5 = vcmask (!%p13168_p6), 1043459  }
 0x23a   : > { %s11905_s29 = scalar_lea.vmem %s13167_s24, %s13185_s30  ;;  %v1098_v16 = vld [vmem:[#allocation12 + $0x20] sm:$0xff] (!%p13168_p6)  ;;  %9511 = vmatpush1.bf16.msra.mxu1 (!%p13168_p6), %v11915_v8  ;;  %9504 = vmatprep.subr.msk.bf16.mxu0 (!%p13168_p6), %vm11917_vm2, %v9502_v9  ;;  %v9505_v17 = vpack.c.bf16 (!%p13168_p6), %v990_v15, %v988_v14  ;;  %v1100_v18 = vld [vmem:[#allocation12 + $0x30] sm:$0xff] (!%p13168_p6)  ;;  %v919_v20 = vld [vmem:[#allocation7 + $0x8] sm:$0xff] (!%p13168_p6)  ;;  %vm956_vm6 = vcmask (!%p13168_p6), 1045509   ;;  %vm961_vm7 = vcmask (!%p13168_p6), 1047559   ;;  %vm979_vm8 = vcmask (!%p13168_p6), 1041408  }
 0x23b   : > { %v918_v19 = vld [vmem:[#allocation7] sm:$0xff] (!%p13168_p6)  ;;  %9513 = vmatprep.subr.bf16.mxu1 (!%p13168_p6), %v11922_v13  ;;  %v11928_v21 = vpack.c.bf16 (!%p13168_p6), %v1100_v18, %v1098_v16  ;;  %v921_v23 = vmul.f32 (!%p13168_p6), %v919_v20, %v919_v20  ;;  %v1103_v24 = vld [vmem:[#allocation12 + $0x48] sm:$0xff] (!%p13168_p6)  ;;  %v1105_v25 = vld [vmem:[#allocation12 + $0x58] sm:$0xff] (!%p13168_p6)  ;;  %vm981_vm9 = vcmask (!%p13168_p6), 1043456   ;;  %vm983_vm10 = vcmask (!%p13168_p6), 1045504   ;;  %s11243_s25 = smov (!%p13168_p6), 64  }
 0x23c   : > { %v920_v22 = vmul.f32 (!%p13168_p6), %v918_v19, %v918_v19  ;;  %v1102_v26 = vld [vmem:[#allocation12 + $0x40] sm:$0xff] (!%p13168_p6)  ;;  %9507 = vmatpush1.bf16.msk.msra.mxu0 (!%p13168_p6), %vm11917_vm2, %v9505_v17  ;;  %v11932_v27 = vpack.c.bf16 (!%p13168_p6), %v1105_v25, %v1103_v24  ;;  %v1104_v28 = vld [vmem:[#allocation12 + $0x50] sm:$0xff] (!%p13168_p6)  ;;  %v1107_v29 = vld [vmem:[#allocation12 + $0x68] sm:$0xff] (!%p13168_p6)  ;;  %vm1252_vm13 = vcmask (!%p13168_p6), 254976   ;;  %vm1154_vm14 = vcmask (!%p13168_p6), 523264   ;;  %s11244_s9 = smov (!%p13168_p6), 32  }
 0x23d   : > { %v1109_v30 = vld [vmem:[#allocation12 + $0x78] sm:$0xff] (!%p13168_p6)  ;;  %v930_v32 = vsel (!%p13168_p6), %vm922_vm3, %v921_v23, 0.0  ;;  %9525 = vmatprep.subr.bf16.mxu0 (!%p13168_p6), %v11909_v3  ;;  %v11938_v35 = vpack.c.bf16 (!%p13168_p6), %v1104_v28, %v1102_v26  ;;  %v1106_v37 = vld [vmem:[#allocation12 + $0x60] sm:$0xff] (!%p13168_p6)  ;;  %v1108_v38 = vld [vmem:[#allocation12 + $0x70] sm:$0xff] (!%p13168_p6)  ;;  %v994_v28 = vlaneseq (!%p13168_p6)  ;;  %vm1481_vm15 = vcmask (!%p13168_p6), 259076  }
 0x23e   : > { %v923_v31 = vsel %vm922_vm3, %v920_v22, 0.0  ;;  %9515 = vmatpush1.bf16.msra.mxu1 %v11928_v21  ;;  %v931_v34 = vrot.slane %v930_v32, 4  ;;  %v11941_v36 = vpack.c.bf16 %v1109_v30, %v1107_v29  ;;  %v11944_v43 = vpack.c.bf16 %v1108_v38, %v1106_v37 }
 0x23f   : > { %v924_v33 = vrot.slane %v923_v31, 4  ;;  %9517 = vmatprep.subr.bf16.mxu1 %v11932_v27  ;;  %v11985_v29 = vshrl.u32 %v994_v28, 7  ;;  %vm1368_vm0 = vcmask 257026   ;;  %vm1594_vm1 = vcmask 261126  }
 0x240   : > { %v932_v40 = vadd.f32 %v931_v34, %v930_v32  ;;  %v992_v32 = vld [vmem:[#allocation13] sm:$0x3]  ;;  %vm2072_vm2 = vcmask 261120  }
 0x241   : > { %v925_v39 = vadd.f32 %v924_v33, %v923_v31  ;;  %v996_v30 = vsub.s32 0, %v11985_v29  ;;  %v1112_v31 = vand.u32 127, %v994_v28  ;;  %v1000_v33 = vsub.s32 1, %v11985_v29 }
 0x242   : > { %v933_v42 = vrot.slane %v932_v40, 2  ;;  %9519 = vmatpush1.bf16.msra.mxu1 %v11938_v35 }
 0x243   : > { %v926_v41 = vrot.slane %v925_v39, 2  ;;  %9521 = vmatprep.subr.bf16.mxu1 %v11941_v36  ;;  %v997_v34 = vrot.slane %v992_v32, %v996_v30  ;;  %v1113_v37 = vadd.s32 128, %v1112_v31  ;;  %v1001_v38 = vrot.slane %v992_v32, %v1000_v33 }
 0x244   : > { %v934_v45 = vadd.f32 %v933_v42, %v932_v40  ;;  %v1118_v40 = vand.u32 63, %v1112_v31 }
 0x245   : > { %v927_v44 = vadd.f32 %v926_v41, %v925_v39  ;;  %v1125_v42 = vand.u32 63, %v1113_v37 }
 0x246   : > { %v935_v47 = vrot.slane %v934_v45, 1  ;;  %9523 = vmatpush1.bf16.msra.mxu1 %v11944_v43  ;;  %vm11993_vm11 = vcmp.lt.s32.totalorder %v1118_v40, 32 }
 0x247   : > { %v928_v46 = vrot.slane %v927_v44, 1  ;;  %9541 = vmatprep.subr.bf16.mxu1 %v11909_v3  ;;  %vm11997_vm12 = vcmp.lt.s32.totalorder %v1125_v42, 32 }
 0x248   : > { %v936_v49 = vadd.f32 %v935_v47, %v934_v45 }
 0x249   : > { %v929_v48 = vadd.f32 %v928_v46, %v927_v44  ;;  %1223 = vmatmul.mubr.f32.vlgmr.msra.gmra.mrb[0].mxu1 %v11241_v7  ;;  %v12268_v46 = vld [vmem:[#allocation22] ss:$0 sm:$0xff] }
 0x24a   : > { %v938_v51 = vmax.f32 %v936_v49, 1e-24  ;;  %9543 = vmatpush1.bf16.msra.mxu1 %v11915_v8  ;;  %1443 = vmatprep.mubr.f32.mxu1 %v11241_v7 }
 0x24b   : > { %v937_v50 = vmax.f32 %v929_v48, 1e-24  ;;  %9545 = vmatprep.subr.bf16.mxu1 %v11922_v13  ;;  %v2383_v48 = vld [vmem:[#allocation24] sm:$0xff] }
 0x24d   : > { %10171 = vrsqrt.f32 %v937_v50 }
 0x24e   : > { %10173 = vrsqrt.f32 %v938_v51  ;;  %9547 = vmatpush1.bf16.msra.mxu1 %v11928_v21 }
 0x24f   : > { %9549 = vmatprep.subr.bf16.mxu1 %v11932_v27 }
 0x252   : > { %9551 = vmatpush1.bf16.msra.mxu1 %v11938_v35 }
 0x253   : > { %9553 = vmatprep.subr.bf16.mxu1 %v11941_v36 }
 0x256   : > { %9555 = vmatpush1.bf16.msra.mxu1 %v11944_v43 }
 0x257   : > { %v10172_v52 = vpop.eup %10171  ;;  %9573 = vmatprep.subr.bf16.mxu1 %v11909_v3 }
 0x258   : > { %v10174_v53 = vpop.eup %10173  ;;  %v941_v54 = vmul.f32 %v10172_v52, %v918_v19 }
 0x259   : > { %v942_v55 = vmul.f32 %v10174_v53, %v919_v20 }
 0x25a   : > { %v949_v56 = vrot.slane %v941_v54, 7  ;;  %v954_v57 = vrot.slane %v941_v54, 6  ;;  %v959_v58 = vrot.slane %v941_v54, 5  ;;  %v964_v59 = vrot.slane %v941_v54, 4 }
 0x25b   : > { %v945_v60 = vrot.slane %v942_v55, 7  ;;  %v950_v61 = vrot.slane %v942_v55, 6  ;;  %v955_v62 = vrot.slane %v942_v55, 5  ;;  %v960_v63 = vrot.slane %v942_v55, 4 }
 0x25c   : > { %v965_v0 = vrot.slane %v942_v55, 3  ;;  %v968_v1 = vrot.slane %v941_v54, 3  ;;  %v969_v2 = vrot.slane %v942_v55, 2  ;;  %v972_v4 = vrot.slane %v941_v54, 2 }
 0x25d   : > { %v947_v5 = vsel %vm946_vm4, %v945_v60, %v941_v54  ;;  %v952_v6 = vsel %vm951_vm5, %v950_v61, %v949_v56  ;;  %v957_v9 = vsel %vm956_vm6, %v955_v62, %v954_v57  ;;  %v962_v10 = vsel %vm961_vm7, %v960_v63, %v959_v58 }
 0x25e   : > { %v980_v11 = vsel %vm979_vm8, %v947_v5, %v952_v6  ;;  %v966_v12 = vsel %vm946_vm4, %v965_v0, %v964_v59  ;;  %v970_v14 = vsel %vm951_vm5, %v969_v2, %v968_v1  ;;  %v973_v15 = vrot.slane %v942_v55, 1 }
 0x25f   : > { %v982_v16 = vsel %vm981_vm9, %v980_v11, %v957_v9  ;;  %v976_v17 = vrot.slane %v941_v54, 1  ;;  %v985_v18 = vsel %vm979_vm8, %v966_v12, %v970_v14  ;;  %v12034_v11 = vld [vmem:[#allocation15] ss:$0 sm:$0xff] }
 0x260   : > { %v984_v19 = vsel %vm983_vm10, %v982_v16, %v962_v10  ;;  %v974_v20 = vsel %vm956_vm6, %v973_v15, %v972_v4 }
 0x261   : > { %8297 = vmatmul.mubr.msk.f32.vlgmr.msra.gmra.mrb[0].mxu0 %vm922_vm3, %v984_v19  ;;  %v977_v22 = vsel %vm961_vm7, %v942_v55, %v976_v17  ;;  %v986_v23 = vsel %vm981_vm9, %v985_v18, %v974_v20 }
 0x262   : > { %1087 = vmatprep.mubr.f32.mxu0 %v11241_v7  ;;  %v987_v24 = vsel %vm983_vm10, %v986_v23, %v977_v22  ;;  %9527 = vmatpush1.bf16.msra.mxu0 %v11915_v8 }
 0x263   : > { %9529 = vmatprep.subr.bf16.mxu0 %v11922_v13 }
 0x265   : > { %8298 = vmatmul.mubr.msk.f32.gmra.mrb[2].mxu0 %vm922_vm3, %v987_v24  ;;  %vm11246_vm3 = vmmov 0  }
 0x266   : > { %9531 = vmatpush1.bf16.msra.mxu0 %v11928_v21  ;;  %1330 = vmatprep.mubr.f32.mxu0 %v11241_v7 }
 0x267   : > { %9533 = vmatprep.subr.bf16.mxu0 %v11932_v27 }
 0x26a   : > { %9535 = vmatpush1.bf16.msra.mxu0 %v11938_v35 }
 0x26b   : > { %9537 = vmatprep.subr.bf16.mxu0 %v11941_v36 }
 0x26e   : > { %9539 = vmatpush1.bf16.msra.mxu0 %v11944_v43 }
 0x26f   : > { %9557 = vmatprep.subr.bf16.mxu0 %v11909_v3 }
 0x31c   : > { %v1224_v25 = vpop.f32.mrb[0].mxu1 }
 0x31d   : > { %v1226_v26 = vpop.f32.mrb[1].mxu1 }
 0x31e   : > { %v1236_v12 = vadd.f32 %v12034_v11, %v1226_v26 }
 0x334   : > { %v1083_v39 = vpop.f32.mrb[0].mxu0 }
 0x335   : > { %v1084_v41 = vadd.f32 %v1083_v39, %v997_v34  ;;  %v1085_v44 = vpop.f32.mrb[1].mxu0 }
 0x336   : > { %v1086_v45 = vadd.f32 %v1085_v44, %v1001_v38 }
 0x337   : > { %v1602_v51 = vrot.slane %v1084_v41, 6  ;;  %v1713_v52 = vrot.slane %v1084_v41, 2 }
 0x338   : > { %v1089_v47 = vpop.f32.mrb[2].mxu0  ;;  %v1603_v53 = vrot.slane %v1086_v45, 6  ;;  %v1714_v54 = vrot.slane %v1086_v45, 2 }
 0x339   : > { %v1090_v49 = vadd.f32 %v1089_v47, %v997_v34  ;;  %v1091_v50 = vpop.f32.mrb[3].mxu0 }
 0x33a   : > { %v1092_v55 = vadd.f32 %v1091_v50, %v1001_v38 }
 0x33b   : > { %v1148_v56 = vrot.slane %v1090_v49, 6  ;;  %v1258_v57 = vrot.slane %v1090_v49, 2  ;;  %v12003_v58 = vsel %vm11993_vm11, %v1090_v49, %v1602_v51  ;;  %v12007_v59 = vsel %vm11993_vm11, %v1090_v49, %v1713_v52 }
 0x33c   : > { %v1149_v60 = vrot.slane %v1092_v55, 6  ;;  %v1259_v61 = vrot.slane %v1092_v55, 2  ;;  %v12011_v62 = vsel %vm11997_vm12, %v1092_v55, %v1603_v53  ;;  %v12015_v63 = vsel %vm11997_vm12, %v1092_v55, %v1714_v54 }
 0x33d   : > { %v12019_v0 = vsel %vm11993_vm11, %v1084_v41, %v1148_v56  ;;  %v12023_v1 = vsel %vm11993_vm11, %v1084_v41, %v1258_v57 }
 0x33e   : > { %v1229_v2 = vadd.f32 %v1224_v25, %v12019_v0  ;;  %v12028_v4 = vsel %vm11997_vm12, %v1086_v45, %v1149_v60  ;;  %v12032_v5 = vsel %vm11997_vm12, %v1086_v45, %v1259_v61 }
 0x340   : > { %v8300_v6 = vmul.f32 -1.442695, %v1229_v2 }
 0x342   : > { %10175 = vpow2.f32 %v8300_v6 }
 0x34c   : > { %v10176_v9 = vpop.eup %10175 }
 0x34d   : > { %v1233_v10 = vadd.f32 1.0, %v10176_v9 }
 0x34f   : > { %10177 = vrcp.f32 %v1233_v10 }
 0x359   : > { %v10178_v14 = vpop.eup %10177 }
 0x35a   : > { %v1237_v15 = vmul.f32 %v10178_v14, %v1236_v12  ;;  %v1240_v18 = vsub.f32 1.0, %v10178_v14  ;;  %v1246_v20 = vmul.f32 0.0, %v10178_v14 }
 0x35c   : > { %v1238_v16 = vadd.f32 %v1237_v15, %v12028_v4 }
 0x35e   : > { %10179 = vtanh.f32 %v1238_v16 }
 0x368   : > { %v10180_v17 = vpop.eup %10179 }
 0x369   : > { %1242 = vrot.lane.b32.xlu0 %v10180_v17, %s11243_s25 }
 0x3db   : > { %v1243_v19 = vpop.permute.xlu0 %1242 }
 0x3dc   : > { %v1245_v22 = vmul.f32 %v1243_v19, %v1240_v18 }
 0x3de   : > { %v12039_v23 = vadd.f32 %v1246_v20, %v1245_v22 }
 0x3e0   : > { %1249 = vrot.lane.b32.xlu0 %v12039_v23, %s11243_s25  ;;  %v1360_v47 = vrot.slane %v12039_v23, 6 }
 0x452   : > { %v1250_v24 = vpop.permute.xlu0 %1249 }
 0x453   : > { %1253 = vst.msk [vmem:[#allocation5] sm:$0x3] %vm1252_vm13, %v1250_v24  ;;  %8301 = vmatmul.mubr.msk.f32.vlgmr.msra.gmra.mrb[4].mxu0 %vm1154_vm14, %v1250_v24 }
 0x454   : > { %9559 = vmatpush1.bf16.msra.mxu0 %v11915_v8  ;;  %1556 = vmatprep.mubr.f32.mxu0 %v11241_v7 }
 0x455   : > { %9561 = vmatprep.subr.bf16.mxu0 %v11922_v13 }
 0x458   : > { %9563 = vmatpush1.bf16.msra.mxu0 %v11928_v21 }
 0x459   : > { %9565 = vmatprep.subr.bf16.mxu0 %v11932_v27 }
 0x45c   : > { %9567 = vmatpush1.bf16.msra.mxu0 %v11938_v35 }
 0x45d   : > { %9569 = vmatprep.subr.bf16.mxu0 %v11941_v36 }
 0x460   : > { %9571 = vmatpush1.bf16.msra.mxu0 %v11944_v43 }
 0x461   : > { %9589 = vmatprep.subr.bf16.mxu0 %v11909_v3 }
 0x526   : > { %v1332_v25 = vpop.f32.mrb[4].mxu0 }
 0x527   : > { %v1338_v26 = vrot.slane %v1332_v25, 6  ;;  %v1334_v28 = vpop.f32.mrb[5].mxu0 }
 0x528   : > { %v1347_v38 = vadd.f32 %v12034_v11, %v1334_v28 }
 0x529   : > { %v1340_v31 = vadd.f32 %v1338_v26, %v12023_v1 }
 0x52a   : > { %v1349_v39 = vrot.slane %v1347_v38, 6 }
 0x52b   : > { %v8302_v32 = vmul.f32 -1.442695, %v1340_v31 }
 0x52d   : > { %10181 = vpow2.f32 %v8302_v32 }
 0x537   : > { %v10182_v34 = vpop.eup %10181 }
 0x538   : > { %v1344_v37 = vadd.f32 1.0, %v10182_v34 }
 0x53a   : > { %10183 = vrcp.f32 %v1344_v37 }
 0x544   : > { %v10184_v40 = vpop.eup %10183 }
 0x545   : > { %v1351_v41 = vmul.f32 %v10184_v40, %v1349_v39  ;;  %v1354_v45 = vsub.f32 1.0, %v10184_v40  ;;  %v1362_v51 = vmul.f32 %v10184_v40, %v1360_v47 }
 0x547   : > { %v1352_v42 = vadd.f32 %v1351_v41, %v12032_v5 }
 0x549   : > { %10185 = vtanh.f32 %v1352_v42 }
 0x553   : > { %v10186_v44 = vpop.eup %10185 }
 0x554   : > { %1356 = vrot.lane.b32.xlu1 %v10186_v44, %s11243_s25 }
 0x5c6   : > { %v1357_v49 = vpop.permute.xlu1 %1356 }
 0x5c7   : > { %v1359_v50 = vmul.f32 %v1357_v49, %v1354_v45 }
 0x5c9   : > { %v12059_v52 = vadd.f32 %v1362_v51, %v1359_v50 }
 0x5cb   : > { %v1374_v53 = vrot.slane %v12059_v52, 2  ;;  %v1473_v18 = vrot.slane %v12059_v52, 6 }
 0x5cd   : > { %1375 = vrot.lane.b32.xlu1 %v1374_v53, %s11243_s25 }
 0x63f   : > { %v1376_v54 = vpop.permute.xlu1 %1375 }
 0x640   : > { %8303 = vmatmul.mubr.msk.f32.vlgmr.msra.gmra.mrb[2].mxu1 %vm1154_vm14, %v1376_v54 }
 0x641   : > { %9575 = vmatpush1.bf16.msra.mxu1 %v11915_v8  ;;  %1677 = vmatprep.mubr.f32.mxu1 %v11241_v7 }
 0x642   : > { %9577 = vmatprep.subr.bf16.mxu1 %v11922_v13 }
 0x645   : > { %9579 = vmatpush1.bf16.msra.mxu1 %v11928_v21 }
 0x646   : > { %9581 = vmatprep.subr.bf16.mxu1 %v11932_v27 }
 0x649   : > { %9583 = vmatpush1.bf16.msra.mxu1 %v11938_v35 }
 0x64a   : > { %9585 = vmatprep.subr.bf16.mxu1 %v11941_v36 }
 0x64d   : > { %9587 = vmatpush1.bf16.msra.mxu1 %v11944_v43 }
 0x64e   : > { %9605 = vmatprep.subr.bf16.mxu1 %v11909_v3 }
 0x713   : > { %v1445_v55 = vpop.f32.mrb[2].mxu1 }
 0x714   : > { %v1451_v56 = vrot.slane %v1445_v55, 4  ;;  %v1447_v57 = vpop.f32.mrb[3].mxu1 }
 0x715   : > { %v1460_v9 = vadd.f32 %v12034_v11, %v1447_v57 }
 0x716   : > { %v1453_v60 = vadd.f32 %v1451_v56, %v12019_v0 }
 0x717   : > { %v1462_v10 = vrot.slane %v1460_v9, 4 }
 0x718   : > { %v8304_v61 = vmul.f32 -1.442695, %v1453_v60 }
 0x71a   : > { %10187 = vpow2.f32 %v8304_v61 }
 0x724   : > { %v10188_v2 = vpop.eup %10187 }
 0x725   : > { %v1457_v6 = vadd.f32 1.0, %v10188_v2 }
 0x727   : > { %10189 = vrcp.f32 %v1457_v6 }
 0x731   : > { %v10190_v12 = vpop.eup %10189 }
 0x732   : > { %v1464_v14 = vmul.f32 %v10190_v12, %v1462_v10  ;;  %v1467_v17 = vsub.f32 1.0, %v10190_v12  ;;  %v1475_v19 = vmul.f32 %v10190_v12, %v1473_v18 }
 0x734   : > { %v1465_v15 = vadd.f32 %v1464_v14, %v12028_v4 }
 0x736   : > { %10191 = vtanh.f32 %v1465_v15 }
 0x740   : > { %v10192_v16 = vpop.eup %10191 }
 0x741   : > { %1469 = vrot.lane.b32.xlu0 %v10192_v16, %s11243_s25 }
 0x7b3   : > { %v1470_v0 = vpop.permute.xlu0 %1469 }
 0x7b4   : > { %v1472_v20 = vmul.f32 %v1470_v0, %v1467_v17 }
 0x7b6   : > { %v12078_v22 = vadd.f32 %v1475_v19, %v1472_v20 }
 0x7b8   : > { %v1487_v24 = vrot.slane %v12078_v22, 4  ;;  %v1586_v45 = vrot.slane %v12078_v22, 6 }
 0x7ba   : > { %1488 = vrot.lane.b32.xlu1 %v1487_v24, %s11243_s25 }
 0x82c   : > { %v1489_v25 = vpop.permute.xlu1 %1488 }
 0x82d   : > { %8305 = vmatmul.mubr.msk.f32.vlgmr.msra.gmra.mrb[6].mxu0 %vm1154_vm14, %v1489_v25 }
 0x82e   : > { %9591 = vmatpush1.bf16.msra.mxu0 %v11915_v8  ;;  %1785 = vmatprep.mubr.f32.mxu0 %v11241_v7 }
 0x82f   : > { %9593 = vmatprep.subr.bf16.mxu0 %v11922_v13 }
 0x832   : > { %9595 = vmatpush1.bf16.msra.mxu0 %v11928_v21 }
 0x833   : > { %9597 = vmatprep.subr.bf16.mxu0 %v11932_v27 }
 0x836   : > { %9599 = vmatpush1.bf16.msra.mxu0 %v11938_v35 }
 0x837   : > { %9601 = vmatprep.subr.bf16.mxu0 %v11941_v36 }
 0x83a   : > { %9603 = vmatpush1.bf16.msra.mxu0 %v11944_v43 }
 0x83b   : > { %9621 = vmatprep.subr.bf16.mxu0 %v11909_v3 }
 0x900   : > { %v1558_v4 = vpop.f32.mrb[6].mxu0 }
 0x901   : > { %v1564_v26 = vrot.slane %v1558_v4, 2  ;;  %v1560_v28 = vpop.f32.mrb[7].mxu0 }
 0x902   : > { %v1573_v38 = vadd.f32 %v12034_v11, %v1560_v28 }
 0x903   : > { %v1566_v31 = vadd.f32 %v1564_v26, %v12023_v1 }
 0x904   : > { %v1575_v39 = vrot.slane %v1573_v38, 2 }
 0x905   : > { %v8306_v32 = vmul.f32 -1.442695, %v1566_v31 }
 0x907   : > { %10193 = vpow2.f32 %v8306_v32 }
 0x911   : > { %v10194_v34 = vpop.eup %10193 }
 0x912   : > { %v1570_v37 = vadd.f32 1.0, %v10194_v34 }
 0x914   : > { %10195 = vrcp.f32 %v1570_v37 }
 0x91e   : > { %v10196_v40 = vpop.eup %10195 }
 0x91f   : > { %v1577_v41 = vmul.f32 %v10196_v40, %v1575_v39  ;;  %v1580_v3 = vsub.f32 1.0, %v10196_v40  ;;  %v1588_v47 = vmul.f32 %v10196_v40, %v1586_v45 }
 0x921   : > { %v1578_v42 = vadd.f32 %v1577_v41, %v12032_v5 }
 0x923   : > { %10197 = vtanh.f32 %v1578_v42 }
 0x92d   : > { %v10198_v44 = vpop.eup %10197 }
 0x92e   : > { %1582 = vrot.lane.b32.xlu0 %v10198_v44, %s11243_s25 }
 0x9a0   : > { %v1583_v1 = vpop.permute.xlu0 %1582 }
 0x9a1   : > { %v1585_v49 = vmul.f32 %v1583_v1, %v1580_v3 }
 0x9a3   : > { %v12097_v50 = vadd.f32 %v1588_v47, %v1585_v49 }
 0x9a5   : > { %v1608_v51 = vrot.slane %v12097_v50, 6 }
 0x9a7   : > { %1609 = vrot.lane.b32.xlu1 %v1608_v51, %s11243_s25 }
 0xa19   : > { %v1610_v53 = vpop.permute.xlu1 %1609 }
 0xa1a   : > { %8307 = vmatmul.mubr.msk.f32.vlgmr.msra.gmra.mrb[4].mxu1 %vm1154_vm14, %v1610_v53 }
 0xa1b   : > { %9607 = vmatpush1.bf16.msra.mxu1 %v11915_v8  ;;  %1897 = vmatprep.mubr.f32.mxu1 %v11241_v7 }
 0xa1c   : > { %9609 = vmatprep.subr.bf16.mxu1 %v11922_v13 }
 0xa1f   : > { %9611 = vmatpush1.bf16.msra.mxu1 %v11928_v21 }
 0xa20   : > { %9613 = vmatprep.subr.bf16.mxu1 %v11932_v27 }
 0xa23   : > { %9615 = vmatpush1.bf16.msra.mxu1 %v11938_v35 }
 0xa24   : > { %9617 = vmatprep.subr.bf16.mxu1 %v11941_v36 }
 0xa27   : > { %9619 = vmatpush1.bf16.msra.mxu1 %v11944_v43 }
 0xaed   : > { %v1679_v5 = vpop.f32.mrb[4].mxu1 }
 0xaee   : > { %v1684_v54 = vadd.f32 %v1679_v5, %v12003_v58  ;;  %v1681_v55 = vpop.f32.mrb[5].mxu1 }
 0xaef   : > { %v1691_v61 = vadd.f32 %v12034_v11, %v1681_v55 }
 0xaf0   : > { %v8308_v56 = vmul.f32 -1.442695, %v1684_v54 }
 0xaf2   : > { %10199 = vpow2.f32 %v8308_v56 }
 0xafc   : > { %v10200_v57 = vpop.eup %10199 }
 0xafd   : > { %v1688_v60 = vadd.f32 1.0, %v10200_v57 }
 0xaff   : > { %10201 = vrcp.f32 %v1688_v60 }
 0xb09   : > { %v10202_v2 = vpop.eup %10201 }
 0xb0a   : > { %v1692_v6 = vmul.f32 %v10202_v2, %v1691_v61  ;;  %v1695_v12 = vsub.f32 1.0, %v10202_v2  ;;  %v1702_v15 = vmul.f32 %v10202_v2, %v1608_v51 }
 0xb0c   : > { %v1693_v9 = vadd.f32 %v1692_v6, %v12011_v62 }
 0xb0e   : > { %10203 = vtanh.f32 %v1693_v9 }
 0xb18   : > { %v10204_v10 = vpop.eup %10203 }
 0xb19   : > { %1697 = vrot.lane.b32.xlu0 %v10204_v10, %s11243_s25 }
 0xb8b   : > { %v1698_v14 = vpop.permute.xlu0 %1697 }
 0xb8c   : > { %v1700_v16 = vmul.f32 %v1698_v14, %v1695_v12 }
 0xb8e   : > { %v12114_v17 = vadd.f32 %v1702_v15, %v1700_v16 }
 0xb90   : > { %1705 = vrot.lane.b32.xlu1 %v12114_v17, %s11243_s25  ;;  %v1815_v28 = vrot.slane %v12114_v17, 6 }
 0xc02   : > { %v1706_v18 = vpop.permute.xlu1 %1705 }
 0xc03   : > { %1708 = vst.msk [vmem:[#allocation5 + $0x8] sm:$0x3] %vm1252_vm13, %v1706_v18  ;;  %8309 = vmatmul.mubr.msk.f32.vlgmr.msra.gmra.mrb[8].mxu0 %vm1154_vm14, %v1706_v18 }
 0xc04   : > { %9623 = vmatpush1.bf16.msra.mxu0 %v11915_v8  ;;  %2009 = vmatprep.mubr.f32.mxu0 %v11241_v7 }
 0xc05   : > { %9625 = vmatprep.subr.bf16.mxu0 %v11922_v13 }
 0xc08   : > { %9627 = vmatpush1.bf16.msra.mxu0 %v11928_v21 }
 0xc09   : > { %9629 = vmatprep.subr.bf16.mxu0 %v11932_v27 }
 0xc0c   : > { %9631 = vmatpush1.bf16.msra.mxu0 %v11938_v35 }
 0xc0d   : > { %9633 = vmatprep.subr.bf16.mxu0 %v11941_v36 }
 0xc10   : > { %9635 = vmatpush1.bf16.msra.mxu0 %v11944_v43 }
 0xcd6   : > { %v1787_v0 = vpop.f32.mrb[8].mxu0 }
 0xcd7   : > { %v1793_v19 = vrot.slane %v1787_v0, 6  ;;  %v1789_v20 = vpop.f32.mrb[9].mxu0 }
 0xcd8   : > { %v1802_v13 = vadd.f32 %v12034_v11, %v1789_v20 }
 0xcd9   : > { %v1795_v24 = vadd.f32 %v1793_v19, %v12007_v59 }
 0xcda   : > { %v1804_v21 = vrot.slane %v1802_v13, 6 }
 0xcdb   : > { %v8310_v8 = vmul.f32 -1.442695, %v1795_v24 }
 0xcdd   : > { %10205 = vpow2.f32 %v8310_v8 }
 0xce7   : > { %v10206_v25 = vpop.eup %10205 }
 0xce8   : > { %v1799_v4 = vadd.f32 1.0, %v10206_v25 }
 0xcea   : > { %10207 = vrcp.f32 %v1799_v4 }
 0xcf4   : > { %v10208_v27 = vpop.eup %10207 }
 0xcf5   : > { %v1806_v26 = vmul.f32 %v10208_v27, %v1804_v21  ;;  %v1809_v43 = vsub.f32 1.0, %v10208_v27  ;;  %v1817_v34 = vmul.f32 %v10208_v27, %v1815_v28 }
 0xcf7   : > { %v1807_v35 = vadd.f32 %v1806_v26, %v12015_v63  ;;  %v2055_v26 = vld [vmem:[#allocation16 + $0x8] sm:$0xff] }
 0xcf9   : > { %10209 = vtanh.f32 %v1807_v35  ;;  %v2057_v35 = vld [vmem:[#allocation16 + $0x18] sm:$0xff] }
 0xd03   : > { %v10210_v36 = vpop.eup %10209 }
 0xd04   : > { %1811 = vrot.lane.b32.xlu0 %v10210_v36, %s11243_s25  ;;  %v9644_v36 = vpack.c.bf16 %v2057_v35, %v2055_v26 }
 0xd06   : > { %9645 = vmatprep.subr.bf16.mxu1 %v9644_v36  ;;  %v2274_v36 = vld [vmem:[#allocation19 + $0x60] sm:$0xff] }
 0xd76   : > { %v1812_v31 = vpop.permute.xlu0 %1811 }
 0xd77   : > { %v1814_v32 = vmul.f32 %v1812_v31, %v1809_v43  ;;  %v2054_v43 = vld [vmem:[#allocation16] sm:$0xff]  ;;  %v2059_v31 = vld [vmem:[#allocation16 + $0x28] sm:$0xff] }
 0xd79   : > { %v12133_v37 = vadd.f32 %v1817_v34, %v1814_v32  ;;  %v2061_v32 = vld [vmem:[#allocation16 + $0x38] sm:$0xff] }
 0xd7a   : > { %v9648_v34 = vpack.c.bf16 %v2061_v32, %v2059_v31 }
 0xd7b   : > { %v1828_v38 = vrot.slane %v12133_v37, 2  ;;  %v1927_v56 = vrot.slane %v12133_v37, 6 }
 0xd7d   : > { %1829 = vrot.lane.b32.xlu1 %v1828_v38, %s11243_s25  ;;  %v2060_v38 = vld [vmem:[#allocation16 + $0x30] sm:$0xff] }
 0xdef   : > { %v1830_v39 = vpop.permute.xlu1 %1829 }
 0xdf0   : > { %8311 = vmatmul.mubr.msk.f32.vlgmr.msra.gmra.mrb[6].mxu1 %vm1154_vm14, %v1830_v39 }
 0xdf1   : > { %2226 = vmatprep.mubr.f32.mxu1 %v11241_v7 }
 0xec3   : > { %v1899_v40 = vpop.f32.mrb[6].mxu1 }
 0xec4   : > { %v1905_v41 = vrot.slane %v1899_v40, 4  ;;  %v1901_v42 = vpop.f32.mrb[7].mxu1 }
 0xec5   : > { %v1914_v47 = vadd.f32 %v12034_v11, %v1901_v42 }
 0xec6   : > { %v1907_v44 = vadd.f32 %v1905_v41, %v12003_v58  ;;  %v2067_v41 = vld [vmem:[#allocation18 + $0x18] sm:$0xff] }
 0xec7   : > { %v1916_v49 = vrot.slane %v1914_v47, 4  ;;  %v2071_v47 = vld [vmem:[#allocation18 + $0x38] sm:$0xff] }
 0xec8   : > { %v8312_v3 = vmul.f32 -1.442695, %v1907_v44  ;;  %v2064_v44 = vld [vmem:[#allocation18] sm:$0xff] }
 0xeca   : > { %10211 = vpow2.f32 %v8312_v3  ;;  %v2066_v3 = vld [vmem:[#allocation18 + $0x10] sm:$0xff] }
 0xed4   : > { %v10212_v45 = vpop.eup %10211 }
 0xed5   : > { %v1911_v1 = vadd.f32 1.0, %v10212_v45  ;;  %v9638_v45 = vpack.c.bf16 %v2066_v3, %v2064_v44 }
 0xed7   : > { %10213 = vrcp.f32 %v1911_v1  ;;  %v2069_v1 = vld [vmem:[#allocation18 + $0x28] sm:$0xff] }
 0xee1   : > { %v10214_v51 = vpop.eup %10213 }
 0xee2   : > { %v1918_v53 = vmul.f32 %v10214_v51, %v1916_v49  ;;  %v1921_v55 = vsub.f32 1.0, %v10214_v51  ;;  %v1929_v57 = vmul.f32 %v10214_v51, %v1927_v56  ;;  %v9640_v49 = vpack.c.bf16 %v2071_v47, %v2069_v1  ;;  %v2068_v51 = vld [vmem:[#allocation18 + $0x20] sm:$0xff] }
 0xee4   : > { %v1919_v5 = vadd.f32 %v1918_v53, %v12011_v62  ;;  %v2070_v53 = vld [vmem:[#allocation18 + $0x30] sm:$0xff] }
 0xee6   : > { %10215 = vtanh.f32 %v1919_v5  ;;  %v9642_v5 = vpack.c.bf16 %v2070_v53, %v2068_v51 }
 0xef0   : > { %v10216_v54 = vpop.eup %10215 }
 0xef1   : > { %1923 = vrot.lane.b32.xlu0 %v10216_v54, %s11243_s25  ;;  %v2263_v54 = vld [vmem:[#allocation19 + $0x8] sm:$0xff] }
 0xf63   : > { %v1924_v58 = vpop.permute.xlu0 %1923 }
 0xf64   : > { %v1926_v60 = vmul.f32 %v1924_v58, %v1921_v55  ;;  %v2265_v55 = vld [vmem:[#allocation19 + $0x18] sm:$0xff] }
 0xf65   : > { %v12178_v56 = vpack.c.bf16 %v2265_v55, %v2263_v54 }
 0xf66   : > { %v1930_v61 = vadd.f32 %v1929_v57, %v1926_v60 }
 0xf68   : > { %v1940_v2 = vrot.slane %v1930_v61, 4  ;;  %v2039_v25 = vrot.slane %v1930_v61, 6 }
 0xf6a   : > { %1941 = vrot.lane.b32.xlu1 %v1940_v2, %s11243_s25 }
 0xf6e   : > { %1709 = vrot.lane.b32.xlu1 %v12114_v17, %s11244_s9 }
 0xf72   : > { %1936 = vrot.lane.b32.xlu1 %v1930_v61, %s11244_s9 }
 0xf76   : > { %1365 = vrot.lane.b32.xlu1 %v12059_v52, %s11243_s25 }
 0xf7a   : > { %1591 = vrot.lane.b32.xlu1 %v12097_v50, %s11243_s25 }
 0xf7e   : > { %1370 = vrot.lane.b32.xlu1 %v12059_v52, %s11244_s9 }
 0xf82   : > { %1596 = vrot.lane.b32.xlu1 %v12097_v50, %s11244_s9 }
 0xf86   : > { %1932 = vrot.lane.b32.xlu1 %v1930_v61, %s11243_s25 }
 0xfdc   : > { %v1942_v62 = vpop.permute.xlu1 %1941 }
 0xfdd   : > { %8313 = vmatmul.mubr.msk.f32.vlgmr.msra.gmra.mrb[10].mxu0 %vm1154_vm14, %v1942_v62 }
 0xfde   : > { %2143 = vmatprep.mubr.f32.mxu0 %v11241_v7 }
 0xfe0   : > { %v1710_v6 = vpop.permute.xlu1 %1709 }
 0xfe1   : > { %1712 = vst.msk [vmem:[#allocation6 + $0x6] sm:$0x3] %vm1252_vm13, %v1710_v6 }
 0xfe4   : > { %v1937_v9 = vpop.permute.xlu1 %1936 }
 0xfe5   : > { %1939 = vst.msk [vmem:[#allocation6 - $0x2] sm:$0x30] %vm1481_vm15, %v1937_v9 }
 0xfe8   : > { %v1366_v10 = vpop.permute.xlu1 %1365 }
 0xfe9   : > { %1369 = vst.msk [vmem:[#allocation5] sm:$0xc] %vm1368_vm0, %v1366_v10  ;;  %v2262_v10 = vld [vmem:[#allocation19] sm:$0xff] }
 0xfec   : > { %v1592_v52 = vpop.permute.xlu1 %1591 }
 0xfed   : > { %1595 = vst.msk [vmem:[#allocation5] sm:$0xc0] %vm1594_vm1, %v1592_v52  ;;  %v2264_v52 = vld [vmem:[#allocation19 + $0x10] sm:$0xff] }
 0xff0   : > { %v1371_v50 = vpop.permute.xlu1 %1370 }
 0xff1   : > { %1373 = vst.msk [vmem:[#allocation6 + $0xa] sm:$0xc] %vm1368_vm0, %v1371_v50  ;;  %v2267_v50 = vld [vmem:[#allocation19 + $0x28] sm:$0xff] }
 0xff4   : > { %v1597_v12 = vpop.permute.xlu1 %1596 }
 0xff5   : > { %1599 = vst.msk [vmem:[#allocation6 + $0x2] sm:$0xc0] %vm1594_vm1, %v1597_v12  ;;  %v2269_v12 = vld [vmem:[#allocation19 + $0x38] sm:$0xff] }
 0xff8   : > { %v1933_v14 = vpop.permute.xlu1 %1932 }
 0xff9   : > { %1935 = vst.msk [vmem:[#allocation5 + $0x8] sm:$0x30] %vm1481_vm15, %v1933_v14  ;;  %v12193_v14 = vpack.c.bf16 %v2264_v52, %v2262_v10 }
0x10b0   : > { %v2011_v15 = vpop.f32.mrb[10].mxu0 }
0x10b1   : > { %v2017_v16 = vrot.slane %v2011_v15, 2  ;;  %v2013_v17 = vpop.f32.mrb[11].mxu0  ;;  %v12195_v15 = vpack.c.bf16 %v2269_v12, %v2267_v50 }
0x10b2   : > { %v2026_v24 = vadd.f32 %v12034_v11, %v2013_v17  ;;  %v2058_v11 = vld [vmem:[#allocation16 + $0x20] sm:$0xff]  ;;  %v2268_v17 = vld [vmem:[#allocation19 + $0x30] sm:$0xff] }
0x10b3   : > { %v2019_v18 = vadd.f32 %v2017_v16, %v12007_v59  ;;  %v2056_v59 = vld [vmem:[#allocation16 + $0x10] sm:$0xff]  ;;  %v9650_v39 = vpack.c.bf16 %v2060_v38, %v2058_v11  ;;  %v2266_v16 = vld [vmem:[#allocation19 + $0x20] sm:$0xff] }
0x10b4   : > { %v2028_v8 = vrot.slane %v2026_v24, 2  ;;  %v9646_v28 = vpack.c.bf16 %v2056_v59, %v2054_v43  ;;  %v12201_v24 = vpack.c.bf16 %v2268_v17, %v2266_v16  ;;  %v2276_v43 = vld [vmem:[#allocation19 + $0x70] sm:$0xff]  ;;  %v2239_v11 = vld [vmem:[#allocation21] sm:$0x3] }
0x10b5   : > { %v8314_v0 = vmul.f32 -1.442695, %v2019_v18 }
0x10b6   : > { %9647 = vmatpush1.bf16.msra.mxu1 %v9646_v28  ;;  %v12216_v28 = vpack.c.bf16 %v2276_v43, %v2274_v36  ;;  %v2387_v43 = vld [vmem:[#allocation24 + $0x20] sm:$0xff] }
0x10b7   : > { %10217 = vpow2.f32 %v8314_v0  ;;  %9649 = vmatprep.subr.bf16.mxu1 %v9648_v34 }
0x10ba   : > { %9651 = vmatpush1.bf16.msra.mxu1 %v9650_v39 }
0x10c1   : > { %v10218_v19 = vpop.eup %10217 }
0x10c2   : > { %v2023_v20 = vadd.f32 1.0, %v10218_v19  ;;  %v2271_v19 = vld [vmem:[#allocation19 + $0x48] sm:$0xff] }
0x10c4   : > { %10219 = vrcp.f32 %v2023_v20  ;;  %v2273_v20 = vld [vmem:[#allocation19 + $0x58] sm:$0xff] }
0x10ce   : > { %v10220_v4 = vpop.eup %10219 }
0x10cf   : > { %v2030_v13 = vmul.f32 %v10220_v4, %v2028_v8  ;;  %v2041_v21 = vmul.f32 %v10220_v4, %v2039_v25  ;;  %v12204_v8 = vpack.c.bf16 %v2273_v20, %v2271_v19  ;;  %v2270_v25 = vld [vmem:[#allocation19 + $0x40] sm:$0xff] }
0x10d1   : > { %v2031_v27 = vadd.f32 %v2030_v13, %v12015_v63  ;;  %v2065_v63 = vld [vmem:[#allocation18 + $0x8] sm:$0xff] }
0x10d2   : > { %v9636_v42 = vpack.c.bf16 %v2067_v41, %v2065_v63  ;;  %v2244_v63 = vrot.slane %v2239_v11, %v996_v30  ;;  %v2248_v41 = vrot.slane %v2239_v11, %v1000_v33  ;;  %v2390_v11 = vld [vmem:[#allocation24 + $0x38] sm:$0xff] }
0x10d3   : > { %10221 = vtanh.f32 %v2031_v27  ;;  %v2277_v27 = vld [vmem:[#allocation19 + $0x78] sm:$0xff] }
0x10d4   : > { %9637 = vmatprep.subr.bf16.mxu0 %v9636_v42 }
0x10d5   : > { %9639 = vmatpush1.bf16.msra.mxu0 %v9638_v45 }
0x10d6   : > { %9641 = vmatprep.subr.bf16.mxu0 %v9640_v49 }
0x10d9   : > { %9643 = vmatpush1.bf16.msra.mxu0 %v9642_v5 }
0x10da   : > { %9653 = vmatprep.subr.bf16.mxu0 %v12178_v56 }
0x10dd   : > { %v10222_v40 = vpop.eup %10221 }
0x10de   : > { %2035 = vrot.lane.b32.xlu0 %v10222_v40, %s11243_s25 }
0x10e2   : > { %1824 = vrot.lane.b32.xlu0 %v12133_v37, %s11244_s9 }
0x10e6   : > { %1478 = vrot.lane.b32.xlu0 %v12078_v22, %s11243_s25 }
0x10ea   : > { %1254 = vrot.lane.b32.xlu0 %v12039_v23, %s11244_s9  ;;  %v2033_v23 = vsub.f32 1.0, %v10220_v4  ;;  %v2272_v4 = vld [vmem:[#allocation19 + $0x50] sm:$0xff] }
0x10eb   : > { %v12208_v26 = vpack.c.bf16 %v2272_v4, %v2270_v25  ;;  %v2384_v25 = vld [vmem:[#allocation24 + $0x8] sm:$0xff]  ;;  %v2385_v4 = vld [vmem:[#allocation24 + $0x10] sm:$0xff] }
0x10ee   : > { %1483 = vrot.lane.b32.xlu0 %v12078_v22, %s11244_s9 }
0x1150   : > { %v2036_v22 = vpop.permute.xlu0 %2035 }
0x1151   : > { %v2038_v58 = vmul.f32 %v2036_v22, %v2033_v23 }
0x1153   : > { %v2042_v57 = vadd.f32 %v2041_v21, %v2038_v58  ;;  %v2275_v21 = vld [vmem:[#allocation19 + $0x68] sm:$0xff] }
0x1154   : > { %v1825_v60 = vpop.permute.xlu0 %1824  ;;  %v12212_v35 = vpack.c.bf16 %v2277_v27, %v2275_v21  ;;  %v9669_v21 = vpack.c.bf16 %v2384_v25, %v2383_v48  ;;  %v2386_v27 = vld [vmem:[#allocation24 + $0x18] sm:$0xff] }
0x1155   : > { %1827 = vst.msk [vmem:[#allocation6 + $0x2] sm:$0xc] %vm1368_vm0, %v1825_v60  ;;  %2048 = vrot.lane.b32.xlu0 %v2042_v57, %s11244_s9  ;;  %v9672_v36 = vpack.c.bf16 %v2386_v27, %v2385_v4 }
0x1158   : > { %v1479_v61 = vpop.permute.xlu0 %1478 }
0x1159   : > { %1482 = vst.msk [vmem:[#allocation5] sm:$0x30] %vm1481_vm15, %v1479_v61  ;;  %1820 = vrot.lane.b32.xlu0 %v12133_v37, %s11243_s25 }
0x115c   : > { %v1255_v2 = vpop.permute.xlu0 %1254 }
0x115d   : > { %1257 = vst.msk [vmem:[#allocation6 + $0xe] sm:$0x3] %vm1252_vm13, %v1255_v2  ;;  %2044 = vrot.lane.b32.xlu0 %v2042_v57, %s11243_s25 }
0x1160   : > { %v1484_v62 = vpop.permute.xlu0 %1483  ;;  %v2052_v6 = vld [vmem:[#allocation5] sm:$0xff] }
0x1161   : > { %1486 = vst.msk [vmem:[#allocation6 + $0x6] sm:$0x30] %vm1481_vm15, %v1484_v62  ;;  %8317 = vmatmul.mubr.msk.f32.vlgmr.msra.gmra.mrb[8].mxu1 %vm2072_vm2, %v2052_v6 }
0x1162   : > { %2232 = vmatprep.mubr.f32.mxu1 %v11241_v7 }
0x1168   : > { %v2063_v13 = vld [vmem:[#allocation6 + $0x8] sm:$0xff] }
0x11c7   : > { %v2049_v9 = vpop.permute.xlu0 %2048 }
0x11c8   : > { %2051 = vst.msk [vmem:[#allocation6 - $0x6] sm:$0xc0] %vm1594_vm1, %v2049_v9 }
0x11cb   : > { %v1821_v37 = vpop.permute.xlu0 %1820 }
0x11cc   : > { %1823 = vst.msk [vmem:[#allocation5 + $0x8] sm:$0xc] %vm1368_vm0, %v1821_v37 }
0x11cf   : > { %v2045_v18 = vpop.permute.xlu0 %2044  ;;  %v2062_v0 = vld [vmem:[#allocation6] sm:$0xff] }
0x11d0   : > { %2047 = vst.msk [vmem:[#allocation5 + $0x8] sm:$0xc0] %vm1594_vm1, %v2045_v18  ;;  %8315 = vmatmul.mubr.msk.f32.vlgmr.msra.gmra.mrb[12].mxu0 %vm2072_vm2, %v2062_v0 }
0x11d1   : > { %9655 = vmatpush1.bf16.msra.mxu0 %v12193_v14  ;;  %2149 = vmatprep.mubr.f32.mxu0 %v11241_v7 }
0x11d2   : > { %9657 = vmatprep.subr.bf16.mxu0 %v12195_v15 }
0x11d4   : > { %8316 = vmatmul.mubr.msk.f32.gmra.mrb[14].mxu0 %vm2072_vm2, %v2063_v13  ;;  %v11245_v13 = vmov 0.0|0.0  }
0x11d5   : > { %9659 = vmatpush1.bf16.msra.mxu0 %v12201_v24  ;;  %2357 = vmatprep.mubr.f32.mxu0 %v11241_v7 }
0x11d6   : > { %9661 = vmatprep.subr.bf16.mxu0 %v12204_v8  ;;  %9668 = vmatprep.subr.bf16.mxu1 %v11245_v13 }
0x11d7   : > { %v2053_v59 = vld [vmem:[#allocation5 + $0x8] sm:$0xff]  ;;  %9670 = vmatpush3.bf16.msra.mxu1 %v9669_v21 }
0x11d8   : > { %8318 = vmatmul.mubr.msk.f32.gmra.mrb[10].mxu1 %vm2072_vm2, %v2053_v59  ;;  %9671 = vmatprep.subr.bf16.mxu1 %v11245_v13  ;;  %v2388_v59 = vld [vmem:[#allocation24 + $0x28] sm:$0xff] }
0x11d9   : > { %9663 = vmatpush1.bf16.msra.mxu0 %v12208_v26  ;;  %9331 = vmatprep.mubr.msk.f32.mxu1 %vm11246_vm3, %v11241_v7 }
0x11da   : > { %9665 = vmatprep.subr.bf16.mxu0 %v12212_v35 }
0x11db   : > { %9673 = vmatpush3.bf16.msra.mxu1 %v9672_v36 }
0x11dc   : > { %9674 = vmatprep.subr.bf16.mxu1 %v11245_v13 }
0x11dd   : > { %9667 = vmatpush1.bf16.msra.mxu0 %v12216_v28 }
0x11de   : > { %9681 = vmatprep.subr.bf16.mxu0 %v12178_v56 }
0x11e0   : > { %2358 = vmatmul.mubr.f32.vlgmr.msra.gmra.mrb[16].mxu0 %v11241_v7 }
0x11e1   : > { %9683 = vmatpush1.bf16.msra.mxu0 %v12193_v14  ;;  %2537 = vmatprep.mubr.f32.mxu0 %v11241_v7 }
0x11e2   : > { %9685 = vmatprep.subr.bf16.mxu0 %v12195_v15 }
0x11e5   : > { %9687 = vmatpush1.bf16.msra.mxu0 %v12201_v24 }
0x11e6   : > { %9689 = vmatprep.subr.bf16.mxu0 %v12204_v8 }
0x11e9   : > { %9691 = vmatpush1.bf16.msra.mxu0 %v12208_v26 }
0x11ea   : > { %9693 = vmatprep.subr.bf16.mxu0 %v12212_v35 }
0x11ed   : > { %9695 = vmatpush1.bf16.msra.mxu0 %v12216_v28 }
0x11ee   : > { %9709 = vmatprep.subr.bf16.mxu0 %v12178_v56 }
0x1234   : > { %v2228_v31 = vpop.f32.mrb[8].mxu1 }
0x1235   : > { %v2230_v32 = vpop.f32.mrb[9].mxu1 }
0x12a3   : > { %v2145_v34 = vpop.f32.mrb[12].mxu0 }
0x12a4   : > { %v2229_v38 = vadd.f32 %v2228_v31, %v2145_v34  ;;  %v2147_v39 = vpop.f32.mrb[13].mxu0  ;;  %v9675_v31 = vpack.c.bf16 %v2388_v59, %v2387_v43  ;;  %v2389_v34 = vld [vmem:[#allocation24 + $0x30] sm:$0xff] }
0x12a5   : > { %v2231_v40 = vadd.f32 %v2230_v32, %v2147_v39 }
0x12a6   : > { %v2251_v3 = vadd.f32 %v2244_v63, %v2229_v38  ;;  %9676 = vmatpush3.bf16.msra.mxu1 %v9675_v31  ;;  %v9678_v38 = vpack.c.bf16 %v2390_v11, %v2389_v34 }
0x12a7   : > { %v2151_v42 = vpop.f32.mrb[14].mxu0  ;;  %v2252_v45 = vadd.f32 %v2248_v41, %v2231_v40  ;;  %9677 = vmatprep.subr.bf16.mxu1 %v11245_v13 }
0x12a8   : > { %v2153_v44 = vpop.f32.mrb[15].mxu0  ;;  %v3027_v5 = vrot.slane %v2251_v3, 6  ;;  %v3209_v54 = vrot.slane %v2251_v3, 2 }
0x12a9   : > { %v3028_v23 = vrot.slane %v2252_v45, 6  ;;  %v3210_v22 = vrot.slane %v2252_v45, 2 }
0x12aa   : > { %9679 = vmatpush3.bf16.msra.mxu1 %v9678_v38 }
0x12ab   : > { %v2234_v1 = vpop.f32.mrb[10].mxu1  ;;  %9696 = vmatprep.subr.bf16.mxu1 %v11245_v13 }
0x12ac   : > { %v2235_v47 = vadd.f32 %v2234_v1, %v2151_v42  ;;  %v2236_v49 = vpop.f32.mrb[11].mxu1 }
0x12ad   : > { %v2237_v51 = vadd.f32 %v2236_v49, %v2153_v44 }
0x12ae   : > { %v2253_v53 = vadd.f32 %v2244_v63, %v2235_v47 }
0x12af   : > { %v2254_v55 = vadd.f32 %v2248_v41, %v2237_v51 }
0x12b0   : > { %v2287_v58 = vrot.slane %v2253_v53, 6  ;;  %v2467_v57 = vrot.slane %v2253_v53, 2  ;;  %v12237_v29 = vsel %vm11993_vm11, %v2253_v53, %v3027_v5  ;;  %v12241_v30 = vsel %vm11993_vm11, %v2253_v53, %v3209_v54 }
0x12b1   : > { %v2288_v33 = vrot.slane %v2254_v55, 6  ;;  %v2468_v60 = vrot.slane %v2254_v55, 2  ;;  %v12245_v61 = vsel %vm11997_vm12, %v2254_v55, %v3028_v23  ;;  %v12249_v2 = vsel %vm11997_vm12, %v2254_v55, %v3210_v22 }
0x12b2   : > { %v12253_v62 = vsel %vm11993_vm11, %v2251_v3, %v2287_v58  ;;  %v12257_v6 = vsel %vm11993_vm11, %v2251_v3, %v2467_v57 }
0x12b3   : > { %v2359_v9 = vpop.f32.mrb[16].mxu0  ;;  %v12261_v10 = vsel %vm11997_vm12, %v2252_v45, %v2288_v33  ;;  %v12265_v52 = vsel %vm11997_vm12, %v2252_v45, %v2468_v60  ;;  %v2572_v33 = vld [vmem:[#allocation24 + $0x40] sm:$0xff]  ;;  %v2573_v60 = vld [vmem:[#allocation24 + $0x48] sm:$0xff] }
0x12b4   : > { %v2364_v37 = vadd.f32 %v2359_v9, %v12253_v62  ;;  %v2361_v50 = vpop.f32.mrb[17].mxu0  ;;  %v2574_v9 = vld [vmem:[#allocation24 + $0x50] sm:$0xff] }
0x12b5   : > { %v2371_v18 = vadd.f32 %v12268_v46, %v2361_v50  ;;  %v2575_v50 = vld [vmem:[#allocation24 + $0x58] sm:$0xff] }
0x12b6   : > { %v8321_v12 = vmul.f32 -1.442695, %v2364_v37  ;;  %v9697_v37 = vpack.c.bf16 %v2573_v60, %v2572_v33 }
0x12b8   : > { %10223 = vpow2.f32 %v8321_v12  ;;  %v9700_v12 = vpack.c.bf16 %v2575_v50, %v2574_v9 }
0x12c2   : > { %v10224_v16 = vpop.eup %10223 }
0x12c3   : > { %v2368_v17 = vadd.f32 1.0, %v10224_v16  ;;  %v2576_v16 = vld [vmem:[#allocation24 + $0x60] sm:$0xff] }
0x12c5   : > { %10225 = vrcp.f32 %v2368_v17  ;;  %v2577_v17 = vld [vmem:[#allocation24 + $0x68] sm:$0xff] }
0x12cf   : > { %v10226_v0 = vpop.eup %10225 }
0x12d0   : > { %v2372_v19 = vmul.f32 %v10226_v0, %v2371_v18  ;;  %v2375_v39 = vsub.f32 1.0, %v10226_v0  ;;  %v2381_v63 = vmul.f32 0.0, %v10226_v0  ;;  %v9703_v0 = vpack.c.bf16 %v2577_v17, %v2576_v16 }
0x12d2   : > { %v2373_v20 = vadd.f32 %v2372_v19, %v12261_v10  ;;  %v2578_v19 = vld [vmem:[#allocation24 + $0x70] sm:$0xff] }
0x12d4   : > { %10227 = vtanh.f32 %v2373_v20  ;;  %v2579_v20 = vld [vmem:[#allocation24 + $0x78] sm:$0xff] }
0x12d5   : > { %v9706_v48 = vpack.c.bf16 %v2579_v20, %v2578_v19 }
0x12de   : > { %v10228_v32 = vpop.eup %10227 }
0x12df   : > { %2377 = vrot.lane.b32.xlu1 %v10228_v32, %s11243_s25 }
0x1351   : > { %v2378_v40 = vpop.permute.xlu1 %2377 }
0x1352   : > { %v2380_v41 = vmul.f32 %v2378_v40, %v2375_v39 }
0x1354   : > { %v2382_v42 = vadd.f32 %v2381_v63, %v2380_v41 }
0x1356   : > { %2392 = vrot.lane.b32.xlu0 %v2382_v42, %s11243_s25  ;;  %v2567_v54 = vrot.slane %v2382_v42, 6 }
0x13c8   : > { %v2393_v44 = vpop.permute.xlu0 %2392 }
0x13c9   : > { %9332 = vmatmul.mubr.msk.f32.vlgmr.msra.gmra.mrb[12].mxu1 %vm1154_vm14, %v2393_v44  ;;  %8323 = vmatmul.mubr.msk.f32.vlgmr.msra.gmra.mrb[18].mxu0 %vm1154_vm14, %v2393_v44 }
0x13ca   : > { %9711 = vmatpush1.bf16.msra.mxu0 %v12193_v14  ;;  %9350 = vmatprep.mubr.msk.f32.mxu1 %vm11246_vm3, %v11241_v7 }
0x13cb   : > { %9713 = vmatprep.subr.bf16.mxu0 %v12195_v15  ;;  %2721 = vmatprep.mubr.f32.mxu0 %v11241_v7 }
0x13cc   : > { %9698 = vmatpush3.bf16.msra.mxu1 %v9697_v37 }
0x13cd   : > { %9699 = vmatprep.subr.bf16.mxu1 %v11245_v13 }
0x13ce   : > { %9715 = vmatpush1.bf16.msra.mxu0 %v12201_v24 }
0x13cf   : > { %9717 = vmatprep.subr.bf16.mxu0 %v12204_v8 }
0x13d0   : > { %9701 = vmatpush3.bf16.msra.mxu1 %v9700_v12 }
0x13d1   : > { %9702 = vmatprep.subr.bf16.mxu1 %v11245_v13 }
0x13d2   : > { %9719 = vmatpush1.bf16.msra.mxu0 %v12208_v26 }
0x13d3   : > { %9721 = vmatprep.subr.bf16.mxu0 %v12212_v35 }
0x13d4   : > { %9704 = vmatpush3.bf16.msra.mxu1 %v9703_v0 }
0x13d5   : > { %9705 = vmatprep.subr.bf16.mxu1 %v11245_v13 }
0x13d6   : > { %9723 = vmatpush1.bf16.msra.mxu0 %v12216_v28 }
0x13d7   : > { %9737 = vmatprep.subr.bf16.mxu0 %v12178_v56 }
0x13d8   : > { %9707 = vmatpush3.bf16.msra.mxu1 %v9706_v48 }
0x13d9   : > { %9724 = vmatprep.subr.bf16.mxu1 %v11245_v13 }
0x149c   : > { %v2539_v3 = vpop.f32.mrb[18].mxu0 }
0x149d   : > { %v2545_v45 = vrot.slane %v2539_v3, 6  ;;  %v2541_v1 = vpop.f32.mrb[19].mxu0 }
0x149e   : > { %v2554_v5 = vadd.f32 %v12268_v46, %v2541_v1  ;;  %v2756_v1 = vld [vmem:[#allocation24 + $0x80] sm:$0xff] }
0x149f   : > { %v2547_v47 = vadd.f32 %v2545_v45, %v12257_v6 }
0x14a0   : > { %v2556_v55 = vrot.slane %v2554_v5, 6  ;;  %v2760_v5 = vld [vmem:[#allocation24 + $0xa0] sm:$0xff] }
0x14a1   : > { %v8324_v49 = vmul.f32 -1.442695, %v2547_v47  ;;  %v2757_v47 = vld [vmem:[#allocation24 + $0x88] sm:$0xff] }
0x14a3   : > { %10229 = vpow2.f32 %v8324_v49  ;;  %v2758_v49 = vld [vmem:[#allocation24 + $0x90] sm:$0xff] }
0x14ad   : > { %v10230_v51 = vpop.eup %10229 }
0x14ae   : > { %v2551_v53 = vadd.f32 1.0, %v10230_v51  ;;  %v9725_v51 = vpack.c.bf16 %v2757_v47, %v2756_v1 }
0x14b0   : > { %10231 = vrcp.f32 %v2551_v53 }
0x14ba   : > { %v10232_v23 = vpop.eup %10231 }
0x14bb   : > { %v2558_v22 = vmul.f32 %v10232_v23, %v2556_v55  ;;  %v2569_v58 = vmul.f32 %v10232_v23, %v2567_v54  ;;  %v2561_v25 = vsub.f32 1.0, %v10232_v23  ;;  %v2761_v54 = vld [vmem:[#allocation24 + $0xa8] sm:$0xff] }
0x14bc   : > { %v9731_v23 = vpack.c.bf16 %v2761_v54, %v2760_v5 }
0x14bd   : > { %v2559_v57 = vadd.f32 %v2558_v22, %v12265_v52  ;;  %v2763_v22 = vld [vmem:[#allocation24 + $0xb8] sm:$0xff] }
0x14bf   : > { %10233 = vtanh.f32 %v2559_v57 }
0x14c9   : > { %v10234_v18 = vpop.eup %10233 }
0x14ca   : > { %2563 = vrot.lane.b32.xlu1 %v10234_v18, %s11243_s25 }
0x153c   : > { %v2564_v4 = vpop.permute.xlu1 %2563 }
0x153d   : > { %v2566_v21 = vmul.f32 %v2564_v4, %v2561_v25 }
0x153f   : > { %v2570_v27 = vadd.f32 %v2569_v58, %v2566_v21 }
0x1541   : > { %v2581_v36 = vrot.slane %v2570_v27, 2  ;;  %v2751_v63 = vrot.slane %v2570_v27, 6 }
0x1543   : > { %2582 = vrot.lane.b32.xlu0 %v2581_v36, %s11243_s25 }
0x15b5   : > { %v2583_v43 = vpop.permute.xlu0 %2582 }
0x15b6   : > { %9351 = vmatmul.mubr.msk.f32.vlgmr.msra.gmra.mrb[12].mxu1 %vm1154_vm14, %v2583_v43  ;;  %8326 = vmatmul.mubr.msk.f32.vlgmr.msra.gmra.mrb[20].mxu0 %vm1154_vm14, %v2583_v43 }
0x15b7   : > { %9739 = vmatpush1.bf16.msra.mxu0 %v12193_v14  ;;  %9369 = vmatprep.mubr.msk.f32.mxu1 %vm11246_vm3, %v11241_v7 }
0x15b8   : > { %9741 = vmatprep.subr.bf16.mxu0 %v12195_v15  ;;  %2905 = vmatprep.mubr.f32.mxu0 %v11241_v7 }
0x15b9   : > { %9726 = vmatpush3.bf16.msra.mxu1 %v9725_v51 }
0x15ba   : > { %9727 = vmatprep.subr.bf16.mxu1 %v11245_v13 }
0x15bb   : > { %9743 = vmatpush1.bf16.msra.mxu0 %v12201_v24 }
0x15bc   : > { %9745 = vmatprep.subr.bf16.mxu0 %v12204_v8 }
0x15bf   : > { %9747 = vmatpush1.bf16.msra.mxu0 %v12208_v26 }
0x15c0   : > { %9749 = vmatprep.subr.bf16.mxu0 %v12212_v35 }
0x15c3   : > { %9751 = vmatpush1.bf16.msra.mxu0 %v12216_v28 }
0x15c4   : > { %9765 = vmatprep.subr.bf16.mxu0 %v12178_v56 }
0x1689   : > { %v2723_v59 = vpop.f32.mrb[20].mxu0 }
0x168a   : > { %v2729_v31 = vrot.slane %v2723_v59, 4  ;;  %v2725_v32 = vpop.f32.mrb[21].mxu0  ;;  %v2940_v59 = vld [vmem:[#allocation24 + $0xc0] sm:$0xff] }
0x168b   : > { %v2738_v40 = vadd.f32 %v12268_v46, %v2725_v32  ;;  %v2942_v32 = vld [vmem:[#allocation24 + $0xd0] sm:$0xff] }
0x168c   : > { %v2731_v34 = vadd.f32 %v2729_v31, %v12253_v62  ;;  %v2759_v62 = vld [vmem:[#allocation24 + $0x98] sm:$0xff]  ;;  %v2941_v31 = vld [vmem:[#allocation24 + $0xc8] sm:$0xff] }
0x168d   : > { %v2740_v41 = vrot.slane %v2738_v40, 4  ;;  %v9728_v53 = vpack.c.bf16 %v2759_v62, %v2758_v49 }
0x168e   : > { %v8327_v11 = vmul.f32 -1.442695, %v2731_v34  ;;  %v9753_v34 = vpack.c.bf16 %v2941_v31, %v2940_v59 }
0x168f   : > { %9729 = vmatpush3.bf16.msra.mxu1 %v9728_v53 }
0x1690   : > { %10235 = vpow2.f32 %v8327_v11  ;;  %9730 = vmatprep.subr.bf16.mxu1 %v11245_v13 }
0x1693   : > { %9732 = vmatpush3.bf16.msra.mxu1 %v9731_v23 }
0x1694   : > { %9733 = vmatprep.subr.bf16.mxu1 %v11245_v13 }
0x169a   : > { %v10236_v38 = vpop.eup %10235 }
0x169b   : > { %v2735_v39 = vadd.f32 1.0, %v10236_v38  ;;  %v2944_v38 = vld [vmem:[#allocation24 + $0xe0] sm:$0xff] }
0x169d   : > { %10237 = vrcp.f32 %v2735_v39  ;;  %v2945_v39 = vld [vmem:[#allocation24 + $0xe8] sm:$0xff] }
0x16a7   : > { %v10238_v42 = vpop.eup %10237 }
0x16a8   : > { %v2742_v44 = vmul.f32 %v10238_v42, %v2740_v41  ;;  %v2753_v3 = vmul.f32 %v10238_v42, %v2751_v63  ;;  %v2745_v57 = vsub.f32 1.0, %v10238_v42  ;;  %v9759_v63 = vpack.c.bf16 %v2945_v39, %v2944_v38  ;;  %v2947_v41 = vld [vmem:[#allocation24 + $0xf8] sm:$0xff] }
0x16aa   : > { %v2743_v45 = vadd.f32 %v2742_v44, %v12261_v10  ;;  %v2762_v10 = vld [vmem:[#allocation24 + $0xb0] sm:$0xff] }
0x16ab   : > { %v9734_v58 = vpack.c.bf16 %v2763_v22, %v2762_v10 }
0x16ac   : > { %10239 = vtanh.f32 %v2743_v45 }
0x16ad   : > { %9735 = vmatpush3.bf16.msra.mxu1 %v9734_v58 }
0x16ae   : > { %9752 = vmatprep.subr.bf16.mxu1 %v11245_v13 }
0x16b6   : > { %v10240_v55 = vpop.eup %10239 }
0x16b7   : > { %2747 = vrot.lane.b32.xlu1 %v10240_v55, %s11243_s25 }
0x1729   : > { %v2748_v33 = vpop.permute.xlu1 %2747 }
0x172a   : > { %v2750_v60 = vmul.f32 %v2748_v33, %v2745_v57  ;;  %v3125_v57 = vld [vmem:[#allocation24 + $0x100] sm:$0xff]  ;;  %v3126_v33 = vld [vmem:[#allocation24 + $0x108] sm:$0xff] }
0x172c   : > { %v2754_v9 = vadd.f32 %v2753_v3, %v2750_v60  ;;  %v3127_v60 = vld [vmem:[#allocation24 + $0x110] sm:$0xff] }
0x172e   : > { %v2765_v37 = vrot.slane %v2754_v9, 4  ;;  %v2935_v25 = vrot.slane %v2754_v9, 6  ;;  %v9781_v9 = vpack.c.bf16 %v3126_v33, %v3125_v57 }
0x1730   : > { %2766 = vrot.lane.b32.xlu0 %v2765_v37, %s11243_s25  ;;  %v3128_v37 = vld [vmem:[#allocation24 + $0x118] sm:$0xff] }
0x17a2   : > { %v2767_v50 = vpop.permute.xlu0 %2766 }
0x17a3   : > { %9370 = vmatmul.mubr.msk.f32.vlgmr.msra.gmra.mrb[12].mxu1 %vm1154_vm14, %v2767_v50  ;;  %8329 = vmatmul.mubr.msk.f32.vlgmr.msra.gmra.mrb[22].mxu0 %vm1154_vm14, %v2767_v50  ;;  %v9784_v50 = vpack.c.bf16 %v3128_v37, %v3127_v60 }
0x17a4   : > { %9767 = vmatpush1.bf16.msra.mxu0 %v12193_v14  ;;  %9388 = vmatprep.mubr.msk.f32.mxu1 %vm11246_vm3, %v11241_v7 }
0x17a5   : > { %9769 = vmatprep.subr.bf16.mxu0 %v12195_v15  ;;  %3097 = vmatprep.mubr.f32.mxu0 %v11241_v7 }
0x17a6   : > { %9754 = vmatpush3.bf16.msra.mxu1 %v9753_v34 }
0x17a7   : > { %9755 = vmatprep.subr.bf16.mxu1 %v11245_v13 }
0x17a8   : > { %9771 = vmatpush1.bf16.msra.mxu0 %v12201_v24 }
0x17a9   : > { %9773 = vmatprep.subr.bf16.mxu0 %v12204_v8 }
0x17ac   : > { %9775 = vmatpush1.bf16.msra.mxu0 %v12208_v26 }
0x17ad   : > { %9777 = vmatprep.subr.bf16.mxu0 %v12212_v35 }
0x17b0   : > { %9779 = vmatpush1.bf16.msra.mxu0 %v12216_v28 }
0x17b1   : > { %9793 = vmatprep.subr.bf16.mxu0 %v12178_v56 }
0x1876   : > { %v2907_v12 = vpop.f32.mrb[22].mxu0 }
0x1877   : > { %v2913_v16 = vrot.slane %v2907_v12, 2  ;;  %v2909_v17 = vpop.f32.mrb[23].mxu0  ;;  %v3129_v12 = vld [vmem:[#allocation24 + $0x120] sm:$0xff] }
0x1878   : > { %v2922_v48 = vadd.f32 %v12268_v46, %v2909_v17 }
0x1879   : > { %v2915_v18 = vadd.f32 %v2913_v16, %v12257_v6  ;;  %v2943_v6 = vld [vmem:[#allocation24 + $0xd8] sm:$0xff]  ;;  %v3130_v16 = vld [vmem:[#allocation24 + $0x128] sm:$0xff] }
0x187a   : > { %v2924_v4 = vrot.slane %v2922_v48, 2  ;;  %v9756_v11 = vpack.c.bf16 %v2943_v6, %v2942_v32  ;;  %v9787_v17 = vpack.c.bf16 %v3130_v16, %v3129_v12 }
0x187b   : > { %v8330_v0 = vmul.f32 -1.442695, %v2915_v18 }
0x187c   : > { %9757 = vmatpush3.bf16.msra.mxu1 %v9756_v11 }
0x187d   : > { %10241 = vpow2.f32 %v8330_v0  ;;  %9758 = vmatprep.subr.bf16.mxu1 %v11245_v13  ;;  %v3131_v0 = vld [vmem:[#allocation24 + $0x130] sm:$0xff] }
0x1880   : > { %9760 = vmatpush3.bf16.msra.mxu1 %v9759_v63 }
0x1881   : > { %9761 = vmatprep.subr.bf16.mxu1 %v11245_v13 }
0x1887   : > { %v10242_v19 = vpop.eup %10241 }
0x1888   : > { %v2919_v20 = vadd.f32 1.0, %v10242_v19  ;;  %v3132_v19 = vld [vmem:[#allocation24 + $0x138] sm:$0xff] }
0x188a   : > { %10243 = vrcp.f32 %v2919_v20  ;;  %v9790_v20 = vpack.c.bf16 %v3132_v19, %v3131_v0  ;;  %v3499_v0 = vld [vmem:[#allocation24 + $0x188] sm:$0xff]  ;;  %v3500_v19 = vld [vmem:[#allocation24 + $0x190] sm:$0xff] }
0x1894   : > { %v10244_v21 = vpop.eup %10243 }
0x1895   : > { %v2926_v27 = vmul.f32 %v10244_v21, %v2924_v4  ;;  %v2937_v36 = vmul.f32 %v10244_v21, %v2935_v25  ;;  %v2929_v44 = vsub.f32 1.0, %v10244_v21 }
0x1897   : > { %v2927_v43 = vadd.f32 %v2926_v27, %v12265_v52  ;;  %v2946_v52 = vld [vmem:[#allocation24 + $0xf0] sm:$0xff] }
0x1898   : > { %v9762_v42 = vpack.c.bf16 %v2947_v41, %v2946_v52 }
0x1899   : > { %10245 = vtanh.f32 %v2927_v43 }
0x189a   : > { %9763 = vmatpush3.bf16.msra.mxu1 %v9762_v42 }
0x189b   : > { %9780 = vmatprep.subr.bf16.mxu1 %v11245_v13 }
0x18a3   : > { %v10246_v40 = vpop.eup %10245 }
0x18a4   : > { %2931 = vrot.lane.b32.xlu1 %v10246_v40, %s11243_s25 }
0x1916   : > { %v2932_v3 = vpop.permute.xlu1 %2931 }
0x1917   : > { %v2934_v45 = vmul.f32 %v2932_v3, %v2929_v44  ;;  %v3315_v44 = vld [vmem:[#allocation24 + $0x148] sm:$0xff]  ;;  %v3316_v3 = vld [vmem:[#allocation24 + $0x150] sm:$0xff] }
0x1919   : > { %v2938_v1 = vadd.f32 %v2937_v36, %v2934_v45 }
0x191b   : > { %v2949_v47 = vrot.slane %v2938_v1, 6  ;;  %v3317_v1 = vld [vmem:[#allocation24 + $0x158] sm:$0xff] }
0x191d   : > { %2950 = vrot.lane.b32.xlu0 %v2949_v47, %s11243_s25 }
0x198f   : > { %v2951_v49 = vpop.permute.xlu0 %2950 }
0x1990   : > { %9389 = vmatmul.mubr.msk.f32.vlgmr.msra.gmra.mrb[12].mxu1 %vm1154_vm14, %v2951_v49  ;;  %8332 = vmatmul.mubr.msk.f32.vlgmr.msra.gmra.mrb[24].mxu0 %vm1154_vm14, %v2951_v49  ;;  %v3318_v49 = vld [vmem:[#allocation24 + $0x160] sm:$0xff] }
0x1991   : > { %9795 = vmatpush1.bf16.msra.mxu0 %v12193_v14  ;;  %9407 = vmatprep.mubr.msk.f32.mxu1 %vm11246_vm3, %v11241_v7 }
0x1992   : > { %9797 = vmatprep.subr.bf16.mxu0 %v12195_v15  ;;  %3279 = vmatprep.mubr.f32.mxu0 %v11241_v7 }
0x1993   : > { %9782 = vmatpush3.bf16.msra.mxu1 %v9781_v9 }
0x1994   : > { %9783 = vmatprep.subr.bf16.mxu1 %v11245_v13 }
0x1995   : > { %9799 = vmatpush1.bf16.msra.mxu0 %v12201_v24 }
0x1996   : > { %9801 = vmatprep.subr.bf16.mxu0 %v12204_v8 }
0x1997   : > { %9785 = vmatpush3.bf16.msra.mxu1 %v9784_v50 }
0x1998   : > { %9786 = vmatprep.subr.bf16.mxu1 %v11245_v13 }
0x1999   : > { %9803 = vmatpush1.bf16.msra.mxu0 %v12208_v26 }
0x199a   : > { %9805 = vmatprep.subr.bf16.mxu0 %v12212_v35 }
0x199b   : > { %9788 = vmatpush3.bf16.msra.mxu1 %v9787_v17 }
0x199c   : > { %9789 = vmatprep.subr.bf16.mxu1 %v11245_v13 }
0x199d   : > { %9807 = vmatpush1.bf16.msra.mxu0 %v12216_v28 }
0x199e   : > { %9821 = vmatprep.subr.bf16.mxu0 %v12178_v56 }
0x199f   : > { %9791 = vmatpush3.bf16.msra.mxu1 %v9790_v20 }
0x19a0   : > { %9808 = vmatprep.subr.bf16.mxu1 %v11245_v13 }
0x1a63   : > { %v3099_v51 = vpop.f32.mrb[24].mxu0 }
0x1a64   : > { %v3104_v62 = vadd.f32 %v3099_v51, %v12237_v29  ;;  %v3101_v53 = vpop.f32.mrb[25].mxu0  ;;  %v3319_v51 = vld [vmem:[#allocation24 + $0x168] sm:$0xff] }
0x1a65   : > { %v3111_v23 = vadd.f32 %v12268_v46, %v3101_v53  ;;  %v9815_v53 = vpack.c.bf16 %v3319_v51, %v3318_v49  ;;  %v3683_v51 = vld [vmem:[#allocation24 + $0x1c8] sm:$0xff] }
0x1a66   : > { %v8333_v5 = vmul.f32 -1.442695, %v3104_v62 }
0x1a68   : > { %10247 = vpow2.f32 %v8333_v5  ;;  %v3320_v5 = vld [vmem:[#allocation24 + $0x170] sm:$0xff] }
0x1a72   : > { %v10248_v54 = vpop.eup %10247 }
0x1a73   : > { %v3108_v55 = vadd.f32 1.0, %v10248_v54  ;;  %v3321_v54 = vld [vmem:[#allocation24 + $0x178] sm:$0xff] }
0x1a75   : > { %10249 = vrcp.f32 %v3108_v55  ;;  %v9818_v55 = vpack.c.bf16 %v3321_v54, %v3320_v5  ;;  %v3686_v54 = vld [vmem:[#allocation24 + $0x1e0] sm:$0xff] }
0x1a7f   : > { %v10250_v10 = vpop.eup %10249 }
0x1a80   : > { %v3112_v22 = vmul.f32 %v10250_v10, %v3111_v23  ;;  %v3115_v48 = vsub.f32 1.0, %v10250_v10  ;;  %v3122_v4 = vmul.f32 %v10250_v10, %v2949_v47  ;;  %v9812_v47 = vpack.c.bf16 %v3317_v1, %v3316_v3 }
0x1a82   : > { %v3113_v58 = vadd.f32 %v3112_v22, %v12245_v61 }
0x1a84   : > { %10251 = vtanh.f32 %v3113_v58 }
0x1a8e   : > { %v10252_v18 = vpop.eup %10251 }
0x1a8f   : > { %3117 = vrot.lane.b32.xlu1 %v10252_v18, %s11243_s25 }
0x1b01   : > { %v3118_v25 = vpop.permute.xlu1 %3117 }
0x1b02   : > { %v3120_v21 = vmul.f32 %v3118_v25, %v3115_v48  ;;  %v3502_v25 = vld [vmem:[#allocation24 + $0x1a0] sm:$0xff] }
0x1b04   : > { %v3123_v27 = vadd.f32 %v3122_v4, %v3120_v21  ;;  %v3503_v4 = vld [vmem:[#allocation24 + $0x1a8] sm:$0xff] }
0x1b06   : > { %3134 = vrot.lane.b32.xlu0 %v3123_v27, %s11243_s25  ;;  %v3309_v39 = vrot.slane %v3123_v27, 6  ;;  %v9843_v27 = vpack.c.bf16 %v3503_v4, %v3502_v25 }
0x1b78   : > { %v3135_v36 = vpop.permute.xlu0 %3134 }
0x1b79   : > { %9408 = vmatmul.mubr.msk.f32.vlgmr.msra.gmra.mrb[12].mxu1 %vm1154_vm14, %v3135_v36  ;;  %8335 = vmatmul.mubr.msk.f32.vlgmr.msra.gmra.mrb[26].mxu0 %vm1154_vm14, %v3135_v36  ;;  %v3505_v36 = vld [vmem:[#allocation24 + $0x1b8] sm:$0xff] }
0x1b7a   : > { %9823 = vmatpush1.bf16.msra.mxu0 %v12193_v14  ;;  %9426 = vmatprep.mubr.msk.f32.mxu1 %vm11246_vm3, %v11241_v7 }
0x1b7b   : > { %9825 = vmatprep.subr.bf16.mxu0 %v12195_v15  ;;  %3463 = vmatprep.mubr.f32.mxu0 %v11241_v7 }
0x1b7e   : > { %9827 = vmatpush1.bf16.msra.mxu0 %v12201_v24 }
0x1b7f   : > { %9829 = vmatprep.subr.bf16.mxu0 %v12204_v8 }
0x1b82   : > { %9831 = vmatpush1.bf16.msra.mxu0 %v12208_v26 }
0x1b83   : > { %9833 = vmatprep.subr.bf16.mxu0 %v12212_v35 }
0x1b86   : > { %9835 = vmatpush1.bf16.msra.mxu0 %v12216_v28 }
0x1b87   : > { %9849 = vmatprep.subr.bf16.mxu0 %v12178_v56  ;;  %v3314_v56 = vld [vmem:[#allocation24 + $0x140] sm:$0xff] }
0x1b88   : > { %v9809_v45 = vpack.c.bf16 %v3315_v44, %v3314_v56 }
0x1b8a   : > { %9810 = vmatpush3.bf16.msra.mxu1 %v9809_v45 }
0x1b8b   : > { %9811 = vmatprep.subr.bf16.mxu1 %v11245_v13 }
0x1b8e   : > { %9813 = vmatpush3.bf16.msra.mxu1 %v9812_v47 }
0x1b8f   : > { %9814 = vmatprep.subr.bf16.mxu1 %v11245_v13 }
0x1b92   : > { %9816 = vmatpush3.bf16.msra.mxu1 %v9815_v53 }
0x1b93   : > { %9817 = vmatprep.subr.bf16.mxu1 %v11245_v13 }
0x1b96   : > { %9819 = vmatpush3.bf16.msra.mxu1 %v9818_v55  ;;  %v3687_v55 = vld [vmem:[#allocation24 + $0x1e8] sm:$0xff] }
0x1b97   : > { %9836 = vmatprep.subr.bf16.mxu1 %v11245_v13 }
0x1c4c   : > { %v3281_v43 = vpop.f32.mrb[26].mxu0 }
0x1c4d   : > { %v3287_v59 = vrot.slane %v3281_v43, 6  ;;  %v3283_v31 = vpop.f32.mrb[27].mxu0 }
0x1c4e   : > { %v3296_v38 = vadd.f32 %v12268_v46, %v3283_v31 }
0x1c4f   : > { %v3289_v32 = vadd.f32 %v3287_v59, %v12241_v30 }
0x1c50   : > { %v3298_v40 = vrot.slane %v3296_v38, 6 }
0x1c51   : > { %v8336_v34 = vmul.f32 -1.442695, %v3289_v32 }
0x1c53   : > { %10253 = vpow2.f32 %v8336_v34 }
0x1c5d   : > { %v10254_v6 = vpop.eup %10253 }
0x1c5e   : > { %v3293_v11 = vadd.f32 1.0, %v10254_v6 }
0x1c60   : > { %10255 = vrcp.f32 %v3293_v11 }
0x1c6a   : > { %v10256_v63 = vpop.eup %10255 }
0x1c6b   : > { %v3300_v52 = vmul.f32 %v10256_v63, %v3298_v40  ;;  %v3311_v41 = vmul.f32 %v10256_v63, %v3309_v39  ;;  %v3303_v23 = vsub.f32 1.0, %v10256_v63 }
0x1c6d   : > { %v3301_v42 = vadd.f32 %v3300_v52, %v12249_v2 }
0x1c6f   : > { %10257 = vtanh.f32 %v3301_v42 }
0x1c79   : > { %v10258_v62 = vpop.eup %10257 }
0x1c7a   : > { %3305 = vrot.lane.b32.xlu1 %v10258_v62, %s11243_s25  ;;  %v3684_v62 = vld [vmem:[#allocation24 + $0x1d0] sm:$0xff] }
0x1cec   : > { %v3306_v10 = vpop.permute.xlu1 %3305 }
0x1ced   : > { %v3308_v22 = vmul.f32 %v3306_v10, %v3303_v23  ;;  %v9871_v23 = vpack.c.bf16 %v3687_v55, %v3686_v54  ;;  %v3689_v10 = vld [vmem:[#allocation24 + $0x1f8] sm:$0xff] }
0x1cef   : > { %v3312_v58 = vadd.f32 %v3311_v41, %v3308_v22 }
0x1cf1   : > { %v3323_v57 = vrot.slane %v3312_v58, 2  ;;  %v3493_v16 = vrot.slane %v3312_v58, 6 }
0x1cf3   : > { %3324 = vrot.lane.b32.xlu0 %v3323_v57, %s11243_s25 }
0x1d65   : > { %v3325_v33 = vpop.permute.xlu0 %3324 }
0x1d66   : > { %9427 = vmatmul.mubr.msk.f32.vlgmr.msra.gmra.mrb[12].mxu1 %vm1154_vm14, %v3325_v33  ;;  %8338 = vmatmul.mubr.msk.f32.vlgmr.msra.gmra.mrb[28].mxu0 %vm1154_vm14, %v3325_v33 }
0x1d67   : > { %9851 = vmatpush1.bf16.msra.mxu0 %v12193_v14  ;;  %9445 = vmatprep.mubr.msk.f32.mxu1 %vm11246_vm3, %v11241_v7 }
0x1d68   : > { %9853 = vmatprep.subr.bf16.mxu0 %v12195_v15  ;;  %3647 = vmatprep.mubr.f32.mxu0 %v11241_v7 }
0x1d6b   : > { %9855 = vmatpush1.bf16.msra.mxu0 %v12201_v24 }
0x1d6c   : > { %9857 = vmatprep.subr.bf16.mxu0 %v12204_v8 }
0x1d6f   : > { %9859 = vmatpush1.bf16.msra.mxu0 %v12208_v26 }
0x1d70   : > { %9861 = vmatprep.subr.bf16.mxu0 %v12212_v35 }
0x1d73   : > { %9863 = vmatpush1.bf16.msra.mxu0 %v12216_v28  ;;  %v3498_v28 = vld [vmem:[#allocation24 + $0x180] sm:$0xff] }
0x1d74   : > { %v9837_v20 = vpack.c.bf16 %v3499_v0, %v3498_v28 }
0x1d76   : > { %9838 = vmatpush3.bf16.msra.mxu1 %v9837_v20 }
0x1d77   : > { %9839 = vmatprep.subr.bf16.mxu1 %v11245_v13 }
0x1e39   : > { %v3465_v60 = vpop.f32.mrb[28].mxu0 }
0x1e3a   : > { %v3471_v9 = vrot.slane %v3465_v60, 4  ;;  %v3467_v14 = vpop.f32.mrb[29].mxu0 }
0x1e3b   : > { %v3480_v24 = vadd.f32 %v12268_v46, %v3467_v14 }
0x1e3c   : > { %v3473_v37 = vadd.f32 %v3471_v9, %v12237_v29  ;;  %v3501_v29 = vld [vmem:[#allocation24 + $0x198] sm:$0xff] }
0x1e3d   : > { %v3482_v8 = vrot.slane %v3480_v24, 4  ;;  %v9840_v48 = vpack.c.bf16 %v3501_v29, %v3500_v19 }
0x1e3e   : > { %v8339_v50 = vmul.f32 -1.442695, %v3473_v37  ;;  %v8319_v37 = vld [vmem:[#allocation25] ss:$0 sm:$0xff] }
0x1e3f   : > { %9841 = vmatpush3.bf16.msra.mxu1 %v9840_v48 }
0x1e40   : > { %10259 = vpow2.f32 %v8339_v50  ;;  %9842 = vmatprep.subr.bf16.mxu1 %v11245_v13 }
0x1e43   : > { %9844 = vmatpush3.bf16.msra.mxu1 %v9843_v27 }
0x1e44   : > { %9845 = vmatprep.subr.bf16.mxu1 %v11245_v13 }
0x1e4a   : > { %v10260_v15 = vpop.eup %10259 }
0x1e4b   : > { %v3477_v12 = vadd.f32 1.0, %v10260_v15 }
0x1e4d   : > { %10261 = vrcp.f32 %v3477_v12 }
0x1e57   : > { %v10262_v17 = vpop.eup %10261 }
0x1e58   : > { %v3484_v26 = vmul.f32 %v10262_v17, %v3482_v8  ;;  %v3495_v18 = vmul.f32 %v10262_v17, %v3493_v16  ;;  %v3487_v59 = vsub.f32 1.0, %v10262_v17 }
0x1e5a   : > { %v3485_v35 = vadd.f32 %v3484_v26, %v12245_v61  ;;  %v3504_v61 = vld [vmem:[#allocation24 + $0x1b0] sm:$0xff] }
0x1e5b   : > { %v9846_v43 = vpack.c.bf16 %v3505_v36, %v3504_v61 }
0x1e5c   : > { %10263 = vtanh.f32 %v3485_v35 }
0x1e5d   : > { %9847 = vmatpush3.bf16.msra.mxu1 %v9846_v43 }
0x1e5e   : > { %9864 = vmatprep.subr.bf16.mxu1 %v11245_v13 }
0x1e66   : > { %v10264_v21 = vpop.eup %10263 }
0x1e67   : > { %3489 = vrot.lane.b32.xlu1 %v10264_v21, %s11243_s25 }
0x1ed9   : > { %v3490_v31 = vpop.permute.xlu1 %3489 }
0x1eda   : > { %v3492_v32 = vmul.f32 %v3490_v31, %v3487_v59 }
0x1edc   : > { %v3496_v34 = vadd.f32 %v3495_v18, %v3492_v32 }
0x1ede   : > { %v3507_v6 = vrot.slane %v3496_v34, 4  ;;  %v3677_v44 = vrot.slane %v3496_v34, 6 }
0x1ee0   : > { %3508 = vrot.lane.b32.xlu0 %v3507_v6, %s11243_s25 }
0x1f52   : > { %v3509_v11 = vpop.permute.xlu0 %3508 }
0x1f53   : > { %9446 = vmatmul.mubr.msk.f32.vlgmr.msra.gmra.mrb[12].mxu1 %vm1154_vm14, %v3509_v11  ;;  %8341 = vmatmul.mubr.msk.f32.vlgmr.msra.gmra.mrb[30].mxu0 %vm1154_vm14, %v3509_v11 }
0x1f54   : > { %9464 = vmatprep.mubr.msk.f32.mxu1 %vm11246_vm3, %v11241_v7  ;;  %v3682_v7 = vld [vmem:[#allocation24 + $0x1c0] sm:$0xff] }
0x1f55   : > { %v9865_v53 = vpack.c.bf16 %v3683_v51, %v3682_v7 }
0x1f57   : > { %9866 = vmatpush3.bf16.msra.mxu1 %v9865_v53 }
0x1f58   : > { %9867 = vmatprep.subr.bf16.mxu1 %v11245_v13 }
0x2026   : > { %v3649_v38 = vpop.f32.mrb[30].mxu0 }
0x2027   : > { %v3655_v39 = vrot.slane %v3649_v38, 2  ;;  %v3651_v40 = vpop.f32.mrb[31].mxu0 }
0x2028   : > { %v3664_v56 = vadd.f32 %v12268_v46, %v3651_v40 }
0x2029   : > { %v3657_v63 = vadd.f32 %v3655_v39, %v12241_v30  ;;  %v3685_v30 = vld [vmem:[#allocation24 + $0x1d8] sm:$0xff] }
0x202a   : > { %v3666_v3 = vrot.slane %v3664_v56, 2  ;;  %v9868_v5 = vpack.c.bf16 %v3685_v30, %v3684_v62 }
0x202b   : > { %v8342_v52 = vmul.f32 -1.442695, %v3657_v63 }
0x202c   : > { %9869 = vmatpush3.bf16.msra.mxu1 %v9868_v5 }
0x202d   : > { %10265 = vpow2.f32 %v8342_v52  ;;  %9870 = vmatprep.subr.bf16.mxu1 %v11245_v13 }
0x2030   : > { %9872 = vmatpush3.bf16.msra.mxu1 %v9871_v23 }
0x2031   : > { %9873 = vmatprep.subr.bf16.mxu1 %v11245_v13 }
0x2037   : > { %v10266_v41 = vpop.eup %10265 }
0x2038   : > { %v3661_v42 = vadd.f32 1.0, %v10266_v41 }
0x203a   : > { %10267 = vrcp.f32 %v3661_v42 }
0x2044   : > { %v10268_v45 = vpop.eup %10267 }
0x2045   : > { %v3668_v1 = vmul.f32 %v10268_v45, %v3666_v3  ;;  %v3679_v47 = vmul.f32 %v10268_v45, %v3677_v44  ;;  %v3671_v58 = vsub.f32 1.0, %v10268_v45 }
0x2047   : > { %v3669_v49 = vadd.f32 %v3668_v1, %v12249_v2  ;;  %v3688_v2 = vld [vmem:[#allocation24 + $0x1f0] sm:$0xff] }
0x2048   : > { %v9874_v22 = vpack.c.bf16 %v3689_v10, %v3688_v2 }
0x2049   : > { %10269 = vtanh.f32 %v3669_v49 }
0x204a   : > { %9875 = vmatpush3.bf16.msra.mxu1 %v9874_v22 }
0x2053   : > { %v10270_v46 = vpop.eup %10269 }
0x2054   : > { %3673 = vrot.lane.b32.xlu1 %v10270_v46, %s11243_s25 }
0x20c6   : > { %v3674_v57 = vpop.permute.xlu1 %3673 }
0x20c7   : > { %v3676_v33 = vmul.f32 %v3674_v57, %v3671_v58 }
0x20c9   : > { %v3680_v60 = vadd.f32 %v3679_v47, %v3676_v33 }
0x20cb   : > { %v3691_v9 = vrot.slane %v3680_v60, 6 }
0x20cd   : > { %3692 = vrot.lane.b32.xlu0 %v3691_v9, %s11243_s25 }
0x213f   : > { %v3693_v14 = vpop.permute.xlu0 %3692 }
0x2140   : > { %9465 = vmatmul.mubr.msk.f32.vlgmr.msra.gmra.mrb[12].mxu1 %vm1154_vm14, %v3693_v14 }
0x2213   : > { %v3762_v50 = vpop.f32.mrb[12].mxu1 }
0x2214   : > { %v9936_v15 = vadd.f32 %v8319_v37, %v3762_v50  ;;  %v9466_v12 = vpop.f32.mrb[13].mxu1 }
0x2216   : > { %v3767_v24 = vmax.f32 %v9936_v15, 0.0 }
0x2218   : > { %3768 = vst [vmem:[#allocation4] sm:$0x3] %v3767_v24 }
0x2219 PF: > { %v10271_v13 = vld [vmem:[%s11870_s18 + $0x40] sm:$0xff]   ;;  %v10275_v26 = vld [vmem:[%s11870_s18 + $0x48] sm:$0xff]   ;;  %v10279_v0 = vld [vmem:[%s11870_s18 + $0x50] sm:$0xff]   ;;  %v3904_v40 = vlaneseq  ;;  %v11247_v45 = vmov 1966171168   ;;  %p8697_p7 = scmp.ne.s32.totalorder %s11378_s3, 1 }
0x221a   : > { %v10272_v16 = vld [vmem:[%s11870_s18 + $0xc0] sm:$0xff]   ;;  %8779 = vmatprep.subr.bf16.mxu0 %v10271_v13  ;;  %v10276_v18 = vld [vmem:[%s11870_s18 + $0xc8] sm:$0xff]   ;;  %v10280_v19 = vld [vmem:[%s11870_s18 + $0xd0] sm:$0xff]   ;;  %v3902_v1 = vunpack.c.l.s4 %v11247_v45  ;;  %s13176_s27 = sld [smem:[#allocation62_spill]] (!%p8697_p7)  ;;  %vm11249_vm4 = vmmov (!%p8697_p7), 0   ;;  %vm8016_vm5 = vcmask (!%p8697_p7), 58368  }
0x221b   : > { %v10273_v8 = vld [vmem:[%s11870_s18] sm:$0xff]   ;;  %8801 = vmatprep.subr.bf16.mxu1 %v10272_v16  ;;  %v10277_v35 = vld [vmem:[%s11870_s18 + $0x8] sm:$0xff]   ;;  %v10281_v20 = vld [vmem:[%s11870_s18 + $0x10] sm:$0xff]   ;;  %v3905_v56 = vshrl.u32 %v3904_v40, 7 }
0x221c   : > { %v10274_v17 = vld [vmem:[%s11870_s18 + $0x80] sm:$0xff]   ;;  %8780 = vmatpush3.bf16.msra.mxu0 %v10273_v8  ;;  %v10278_v28 = vld [vmem:[%s11870_s18 + $0x88] sm:$0xff]   ;;  %v10282_v29 = vld [vmem:[%s11870_s18 + $0x90] sm:$0xff]   ;;  %v3903_v7 = vunpack.c.0.s8 %v3902_v1 }
0x221d   : > { %8802 = vmatpush3.bf16.msra.mxu1 %v10274_v17  ;;  %8781 = vmatprep.subr.bf16.mxu0 %v10275_v26  ;;  %v10283_v48 = vld [vmem:[%s11870_s18 + $0x58] sm:$0xff]   ;;  %v10287_v27 = vld [vmem:[%s11870_s18 + $0x60] sm:$0xff]   ;;  %v10291_v59 = vld [vmem:[%s11870_s18 + $0x68] sm:$0xff]  }
0x221e   : > { %8803 = vmatprep.subr.bf16.mxu1 %v10276_v18  ;;  %v10284_v25 = vld [vmem:[%s11870_s18 + $0xd8] sm:$0xff]   ;;  %v10288_v61 = vld [vmem:[%s11870_s18 + $0xe0] sm:$0xff]   ;;  %v10292_v31 = vld [vmem:[%s11870_s18 + $0xe8] sm:$0xff]   ;;  %v12464_v51 = vsub.s32 %v3903_v7, %v3905_v56 }
0x221f   : > { %v10285_v4 = vld [vmem:[%s11870_s18 + $0x18] sm:$0xff]   ;;  %v10289_v36 = vld [vmem:[%s11870_s18 + $0x20] sm:$0xff]   ;;  %v10293_v32 = vld [vmem:[%s11870_s18 + $0x28] sm:$0xff]  }
0x2220   : > { %8782 = vmatpush3.bf16.msra.mxu0 %v10277_v35  ;;  %v10286_v21 = vld [vmem:[%s11870_s18 + $0x98] sm:$0xff]   ;;  %v10290_v43 = vld [vmem:[%s11870_s18 + $0xa0] sm:$0xff]   ;;  %v10294_v34 = vld [vmem:[%s11870_s18 + $0xa8] sm:$0xff]  }
0x2221   : > { %8804 = vmatpush3.bf16.msra.mxu1 %v10278_v28  ;;  %8783 = vmatprep.subr.bf16.mxu0 %v10279_v0  ;;  %v10295_v6 = vld [vmem:[%s11870_s18 + $0x70] sm:$0xff]   ;;  %v10299_v63 = vld [vmem:[%s11870_s18 + $0x78] sm:$0xff]   ;;  %v10304_v3 = vld [vmem:[%s11870_s18 + $0x140] sm:$0xff]  }
0x2222   : > { %8805 = vmatprep.subr.bf16.mxu1 %v10280_v19  ;;  %v10296_v11 = vld [vmem:[%s11870_s18 + $0xf0] sm:$0xff]   ;;  %v10300_v52 = vld [vmem:[%s11870_s18 + $0xf8] sm:$0xff]   ;;  %v10305_v47 = vld [vmem:[%s11870_s18 + $0x1c0] sm:$0xff]  }
0x2223   : > { %v10297_v38 = vld [vmem:[%s11870_s18 + $0x30] sm:$0xff]   ;;  %v10301_v41 = vld [vmem:[%s11870_s18 + $0x38] sm:$0xff]   ;;  %v10306_v55 = vld [vmem:[%s11870_s18 + $0x100] sm:$0xff]  }
0x2224   : > { %8784 = vmatpush3.bf16.msra.mxu0 %v10281_v20  ;;  %v10298_v39 = vld [vmem:[%s11870_s18 + $0xb0] sm:$0xff]   ;;  %v10302_v42 = vld [vmem:[%s11870_s18 + $0xb8] sm:$0xff]   ;;  %v10307_v23 = vld [vmem:[%s11870_s18 + $0x180] sm:$0xff]  }
0x2225   : > { %8806 = vmatpush3.bf16.msra.mxu1 %v10282_v29  ;;  %8785 = vmatprep.subr.bf16.mxu0 %v10283_v48  ;;  %v3770_v44 = vld [vmem:[%s902_s11] sm:$0xff]  ;;  %v10308_v22 = vld [vmem:[%s11870_s18 + $0x148] sm:$0xff]   ;;  %v10316_v12 = vld [vmem:[%s11870_s18 + $0x158] sm:$0xff]  }
0x2226   : > { %8807 = vmatprep.subr.bf16.mxu1 %v10284_v25  ;;  %v3900_v49 = vcombine.high %v3770_v44, %v3770_v44  ;;  %v3907_v62 = vrot.slane %v3770_v44, %v12464_v51  ;;  %v10309_v57 = vld [vmem:[%s11870_s18 + $0x1c8] sm:$0xff]   ;;  %v10312_v14 = vld [vmem:[%s11870_s18 + $0x150] sm:$0xff]   ;;  %v10317_v24 = vld [vmem:[%s11870_s18 + $0x1d8] sm:$0xff]  }
0x2227   : > { %v10310_v33 = vld [vmem:[%s11870_s18 + $0x108] sm:$0xff]   ;;  %v10313_v37 = vld [vmem:[%s11870_s18 + $0x1d0] sm:$0xff]   ;;  %v10318_v13 = vld [vmem:[%s11870_s18 + $0x118] sm:$0xff]  }
0x2228   : > { %8786 = vmatpush3.bf16.msra.mxu0 %v10285_v4  ;;  %v12468_v53 = vrot.slane %v3900_v49, %v12464_v51  ;;  %v3915_v30 = vcombine.high %v3907_v62, %v3907_v62  ;;  %v3923_v5 = vrot.slane %v3907_v62, %v12464_v51  ;;  %v10311_v9 = vld [vmem:[%s11870_s18 + $0x188] sm:$0xff]   ;;  %v10314_v50 = vld [vmem:[%s11870_s18 + $0x110] sm:$0xff]   ;;  %v10319_v16 = vld [vmem:[%s11870_s18 + $0x198] sm:$0xff]  }
0x2229   : > { %8808 = vmatpush3.bf16.msra.mxu1 %v10286_v21  ;;  %8787 = vmatprep.subr.bf16.mxu0 %v10287_v27  ;;  %v10315_v15 = vld [vmem:[%s11870_s18 + $0x190] sm:$0xff]   ;;  %v10320_v8 = vld [vmem:[%s11870_s18 + $0x160] sm:$0xff]   ;;  %v10324_v35 = vld [vmem:[%s11870_s18 + $0x168] sm:$0xff]  }
0x222a   : > { %8809 = vmatprep.subr.bf16.mxu1 %v10288_v61  ;;  %v3916_v54 = vcombine.high %v12468_v53, %v12468_v53  ;;  %v3937_v46 = vrot.slane %v3915_v30, %v12464_v51  ;;  %v3945_v10 = vcombine.high %v3923_v5, %v3923_v5  ;;  %v10321_v17 = vld [vmem:[%s11870_s18 + $0x1e0] sm:$0xff]   ;;  %v10325_v28 = vld [vmem:[%s11870_s18 + $0x1e8] sm:$0xff]   ;;  %v10328_v20 = vld [vmem:[%s11870_s18 + $0x170] sm:$0xff]  }
0x222b   : > { %v10322_v26 = vld [vmem:[%s11870_s18 + $0x120] sm:$0xff]   ;;  %v10326_v0 = vld [vmem:[%s11870_s18 + $0x128] sm:$0xff]   ;;  %v10329_v29 = vld [vmem:[%s11870_s18 + $0x1f0] sm:$0xff]  }
0x222c   : > { %8788 = vmatpush3.bf16.msra.mxu0 %v10289_v36  ;;  %v3944_v2 = vrot.slane %v3916_v54, %v12464_v51  ;;  %4373 = vmatprep.mubr.bf16.mxu0 %v3937_v46  ;;  %v3947_v58 = vcombine.high %v3937_v46, %v3937_v46  ;;  %v10323_v18 = vld [vmem:[%s11870_s18 + $0x1a0] sm:$0xff]   ;;  %v10327_v19 = vld [vmem:[%s11870_s18 + $0x1a8] sm:$0xff]   ;;  %v10330_v48 = vld [vmem:[%s11870_s18 + $0x130] sm:$0xff]   ;;  %v3930_v36 = vrot.slane %v12468_v53, %v12464_v51 }
0x222d   : > { %8810 = vmatpush3.bf16.msra.mxu1 %v10290_v43  ;;  %8789 = vmatprep.subr.bf16.mxu0 %v10291_v59  ;;  %v10331_v25 = vld [vmem:[%s11870_s18 + $0x1b0] sm:$0xff]   ;;  %v10332_v4 = vld [vmem:[%s11870_s18 + $0x178] sm:$0xff]   ;;  %v10336_v43 = vld [vmem:[%s11880_s17 + $0x40] sm:$0xff]  }
0x222e   : > { %8811 = vmatprep.subr.bf16.mxu1 %v10292_v31  ;;  %v3948_v60 = vcombine.high %v3944_v2, %v3944_v2  ;;  %4413 = vmatprep.mubr.bf16.mxu1 %v3947_v58  ;;  %v10333_v21 = vld [vmem:[%s11870_s18 + $0x1f8] sm:$0xff]   ;;  %v10337_v59 = vld [vmem:[%s11880_s17 + $0xc0] sm:$0xff]   ;;  %v10356_v7 = vld [vmem:[%s11880_s17 + $0x68] sm:$0xff]  }
0x222f   : > { %v10334_v27 = vld [vmem:[%s11870_s18 + $0x138] sm:$0xff]   ;;  %v10338_v31 = vld [vmem:[%s11880_s17] sm:$0xff]   ;;  %v10357_v62 = vld [vmem:[%s11880_s17 + $0xe8] sm:$0xff]  }
0x2230   : > { %8790 = vmatpush3.bf16.msra.mxu0 %v10293_v32  ;;  %v10335_v61 = vld [vmem:[%s11870_s18 + $0x1b8] sm:$0xff]   ;;  %v10339_v32 = vld [vmem:[%s11880_s17 + $0x80] sm:$0xff]   ;;  %v10358_v53 = vld [vmem:[%s11880_s17 + $0x28] sm:$0xff]  }
0x2231   : > { %8812 = vmatpush3.bf16.msra.mxu1 %v10294_v34  ;;  %8791 = vmatprep.subr.bf16.mxu0 %v10295_v6  ;;  %v3946_v34 = vcombine.high %v3930_v36, %v3930_v36  ;;  %v10340_v6 = vld [vmem:[%s11880_s17 + $0x48] sm:$0xff]   ;;  %v10344_v40 = vld [vmem:[%s11880_s17 + $0x50] sm:$0xff]   ;;  %v10349_v56 = vld [vmem:[%s11880_s17 + $0xd8] sm:$0xff]  }
0x2232   : > { %8813 = vmatprep.subr.bf16.mxu1 %v10296_v11  ;;  %v10341_v11 = vld [vmem:[%s11880_s17 + $0xc8] sm:$0xff]   ;;  %v10350_v44 = vld [vmem:[%s11880_s17 + $0x18] sm:$0xff]   ;;  %v10352_v45 = vld [vmem:[%s11880_s17 + $0x60] sm:$0xff]  }
0x2233   : > { %v10353_v1 = vld [vmem:[%s11880_s17 + $0xe0] sm:$0xff]   ;;  %v10359_v30 = vld [vmem:[%s11880_s17 + $0xa8] sm:$0xff]  }
0x2234   : > { %8792 = vmatpush3.bf16.msra.mxu0 %v10297_v38  ;;  %v10342_v38 = vld [vmem:[%s11880_s17 + $0x8] sm:$0xff]   ;;  %v10355_v49 = vld [vmem:[%s11880_s17 + $0xa0] sm:$0xff]  }
0x2235   : > { %8814 = vmatpush3.bf16.msra.mxu1 %v10298_v39  ;;  %8793 = vmatprep.subr.bf16.mxu0 %v10299_v63  ;;  %v10343_v39 = vld [vmem:[%s11880_s17 + $0x88] sm:$0xff]   ;;  %v10345_v63 = vld [vmem:[%s11880_s17 + $0xd0] sm:$0xff]  }
0x2236   : > { %8815 = vmatprep.subr.bf16.mxu1 %v10300_v52  ;;  %v10346_v52 = vld [vmem:[%s11880_s17 + $0x10] sm:$0xff]  }
0x2237   : > { %v4504_v54 = vld [vmem:[%s11905_s29] sm:$0xff] }
0x2238   : > { %8794 = vmatpush3.bf16.msra.mxu0 %v10301_v41  ;;  %v10347_v41 = vld [vmem:[%s11880_s17 + $0x90] sm:$0xff]   ;;  %v5097_v46 = vrot.slane %v4504_v54, %v12464_v51 }
0x2239   : > { %8816 = vmatpush3.bf16.msra.mxu1 %v10302_v42  ;;  %8823 = vmatprep.subr.bf16.mxu0 %v10304_v3  ;;  %v10348_v42 = vld [vmem:[%s11880_s17 + $0x58] sm:$0xff]  }
0x223a   : > { %8845 = vmatprep.subr.bf16.mxu1 %v10305_v47  ;;  %v10351_v3 = vld [vmem:[%s11880_s17 + $0x98] sm:$0xff]   ;;  %v10354_v47 = vld [vmem:[%s11880_s17 + $0x20] sm:$0xff]  }
0x223b   : > { %4374 = vmatmul.mubr.bf16.vlgmr.msra.gmra.mrb[0].mxu0 %v3923_v5  ;;  %v10360_v5 = vld [vmem:[%s11880_s17 + $0x70] sm:$0xff]  }
0x223c   : > { %8824 = vmatpush3.bf16.msra.mxu0 %v10306_v55  ;;  %4414 = vmatmul.mubr.bf16.vlgmr.msra.gmra.mrb[0].mxu1 %v3945_v10  ;;  %v10361_v55 = vld [vmem:[%s11880_s17 + $0xf0] sm:$0xff]  }
0x223d   : > { %8825 = vmatprep.subr.bf16.mxu0 %v10308_v22  ;;  %8846 = vmatpush3.bf16.msra.mxu1 %v10307_v23  ;;  %v5090_v23 = vcombine.high %v4504_v54, %v4504_v54  ;;  %v10363_v10 = vld [vmem:[%s11880_s17 + $0xb0] sm:$0xff]   ;;  %v5105_v22 = vcombine.high %v5097_v46, %v5097_v46 }
0x223e   : > { %4453 = vmatprep.mubr.bf16.mxu0 %v3944_v2  ;;  %8847 = vmatprep.subr.bf16.mxu1 %v10309_v57  ;;  %v10362_v2 = vld [vmem:[%s11880_s17 + $0x30] sm:$0xff]   ;;  %v10364_v57 = vld [vmem:[%s11880_s17 + $0x78] sm:$0xff]  }
0x223f   : > { %4493 = vmatprep.mubr.bf16.mxu1 %v3948_v60  ;;  %v12538_v58 = vrot.slane %v5090_v23, %v12464_v51  ;;  %v5127_v60 = vrot.slane %v5105_v22, %v12464_v51  ;;  %v10411_v54 = vld [vmem:[%s11880_s17 + $0x210] sm:$0xff]   ;;  %v10414_v23 = vld [vmem:[%s11880_s17 + $0x2d8] sm:$0xff]   ;;  %v10417_v22 = vld [vmem:[%s11880_s17 + $0x260] sm:$0xff]  }
0x2240   : > { %8826 = vmatpush3.bf16.msra.mxu0 %v10310_v33  ;;  %v10365_v33 = vld [vmem:[%s11880_s17 + $0xf8] sm:$0xff]  }
0x2241   : > { %8827 = vmatprep.subr.bf16.mxu0 %v10312_v14  ;;  %8848 = vmatpush3.bf16.msra.mxu1 %v10311_v9  ;;  %v5106_v9 = vcombine.high %v12538_v58, %v12538_v58  ;;  %v10366_v14 = vld [vmem:[%s11880_s17 + $0x38] sm:$0xff]  }
0x2242   : > { %8849 = vmatprep.subr.bf16.mxu1 %v10313_v37  ;;  %v10367_v37 = vld [vmem:[%s11880_s17 + $0xb8] sm:$0xff]  }
0x2244   : > { %8828 = vmatpush3.bf16.msra.mxu0 %v10314_v50  ;;  %v5137_v50 = vcombine.high %v5127_v60, %v5127_v60 }
0x2245   : > { %8829 = vmatprep.subr.bf16.mxu0 %v10316_v12  ;;  %8850 = vmatpush3.bf16.msra.mxu1 %v10315_v15  ;;  %v5113_v15 = vrot.slane %v5097_v46, %v12464_v51  ;;  %v10368_v12 = vld [vmem:[%s11880_s17 + $0x140] sm:$0xff]   ;;  %v10413_v46 = vld [vmem:[%s11880_s17 + $0x258] sm:$0xff]  }
0x2246   : > { %8851 = vmatprep.subr.bf16.mxu1 %v10317_v24  ;;  %v10369_v24 = vld [vmem:[%s11880_s17 + $0x1c0] sm:$0xff]  }
0x2248   : > { %8830 = vmatpush3.bf16.msra.mxu0 %v10318_v13  ;;  %v5134_v13 = vrot.slane %v5106_v9, %v12464_v51  ;;  %v10422_v9 = vld [vmem:[%s11880_s17 + $0x2e8] sm:$0xff]  }
0x2249   : > { %8831 = vmatprep.subr.bf16.mxu0 %v10320_v8  ;;  %8852 = vmatpush3.bf16.msra.mxu1 %v10319_v16  ;;  %v10370_v16 = vld [vmem:[%s11880_s17 + $0x100] sm:$0xff]  }
0x224a   : > { %8853 = vmatprep.subr.bf16.mxu1 %v10321_v17  ;;  %v10371_v8 = vld [vmem:[%s11880_s17 + $0x180] sm:$0xff]   ;;  %v5135_v17 = vcombine.high %v5113_v15, %v5113_v15 }
0x224c   : > { %8832 = vmatpush3.bf16.msra.mxu0 %v10322_v26  ;;  %v10372_v26 = vld [vmem:[%s11880_s17 + $0x148] sm:$0xff]  }
0x224d   : > { %8833 = vmatprep.subr.bf16.mxu0 %v10324_v35  ;;  %8854 = vmatpush3.bf16.msra.mxu1 %v10323_v18  ;;  %v10373_v18 = vld [vmem:[%s11880_s17 + $0x1c8] sm:$0xff]   ;;  %v5138_v35 = vcombine.high %v5134_v13, %v5134_v13 }
0x224e   : > { %8855 = vmatprep.subr.bf16.mxu1 %v10325_v28  ;;  %v10374_v28 = vld [vmem:[%s11880_s17 + $0x108] sm:$0xff]  }
0x2250   : > { %8834 = vmatpush3.bf16.msra.mxu0 %v10326_v0  ;;  %v10375_v0 = vld [vmem:[%s11880_s17 + $0x188] sm:$0xff]  }
0x2251   : > { %8835 = vmatprep.subr.bf16.mxu0 %v10328_v20  ;;  %8856 = vmatpush3.bf16.msra.mxu1 %v10327_v19  ;;  %v10376_v19 = vld [vmem:[%s11880_s17 + $0x150] sm:$0xff]  }
0x2252   : > { %8857 = vmatprep.subr.bf16.mxu1 %v10329_v29  ;;  %v10377_v20 = vld [vmem:[%s11880_s17 + $0x1d0] sm:$0xff]  }
0x2253   : > { %v10378_v29 = vld [vmem:[%s11880_s17 + $0x110] sm:$0xff]  }
0x2254   : > { %8836 = vmatpush3.bf16.msra.mxu0 %v10330_v48  ;;  %v10379_v48 = vld [vmem:[%s11880_s17 + $0x190] sm:$0xff]  }
0x2255   : > { %8837 = vmatprep.subr.bf16.mxu0 %v10332_v4  ;;  %8858 = vmatpush3.bf16.msra.mxu1 %v10331_v25  ;;  %v10380_v25 = vld [vmem:[%s11880_s17 + $0x158] sm:$0xff]  }
0x2256   : > { %8859 = vmatprep.subr.bf16.mxu1 %v10333_v21  ;;  %v10381_v4 = vld [vmem:[%s11880_s17 + $0x1d8] sm:$0xff]  }
0x2257   : > { %v10382_v21 = vld [vmem:[%s11880_s17 + $0x118] sm:$0xff]  }
0x2258   : > { %8838 = vmatpush3.bf16.msra.mxu0 %v10334_v27  ;;  %v10383_v27 = vld [vmem:[%s11880_s17 + $0x198] sm:$0xff]  }
0x2259   : > { %8867 = vmatprep.subr.bf16.mxu0 %v10336_v43  ;;  %8860 = vmatpush3.bf16.msra.mxu1 %v10335_v61  ;;  %v10384_v61 = vld [vmem:[%s11880_s17 + $0x160] sm:$0xff]  }
0x225a   : > { %8889 = vmatprep.subr.bf16.mxu1 %v10337_v59  ;;  %v10386_v43 = vld [vmem:[%s11880_s17 + $0x120] sm:$0xff]  }
0x225b   : > { %4454 = vmatmul.mubr.bf16.vlgmr.msra.gmra.mrb[4].mxu0 %v3930_v36  ;;  %v10385_v36 = vld [vmem:[%s11880_s17 + $0x1e0] sm:$0xff]  }
0x225c   : > { %8868 = vmatpush3.bf16.msra.mxu0 %v10338_v31  ;;  %4494 = vmatmul.mubr.bf16.vlgmr.msra.gmra.mrb[4].mxu1 %v3946_v34  ;;  %v10387_v59 = vld [vmem:[%s11880_s17 + $0x1a0] sm:$0xff]   ;;  %v10388_v31 = vld [vmem:[%s11880_s17 + $0x168] sm:$0xff]  }
0x225d   : > { %8869 = vmatprep.subr.bf16.mxu0 %v10340_v6  ;;  %8890 = vmatpush3.bf16.msra.mxu1 %v10339_v32  ;;  %v10389_v32 = vld [vmem:[%s11880_s17 + $0x1e8] sm:$0xff]  }
0x225e   : > { %8891 = vmatprep.subr.bf16.mxu1 %v10341_v11  ;;  %7106 = vmatprep.mubr.bf16.mxu0 %v5127_v60  ;;  %v10390_v34 = vld [vmem:[%s11880_s17 + $0x128] sm:$0xff]   ;;  %v10392_v11 = vld [vmem:[%s11880_s17 + $0x170] sm:$0xff]  }
0x225f   : > { %7146 = vmatprep.mubr.bf16.mxu1 %v5137_v50  ;;  %v10391_v6 = vld [vmem:[%s11880_s17 + $0x1a8] sm:$0xff]   ;;  %v10425_v50 = vld [vmem:[%s11880_s17 + $0x270] sm:$0xff]  }
0x2260   : > { %8870 = vmatpush3.bf16.msra.mxu0 %v10342_v38  ;;  %v10393_v38 = vld [vmem:[%s11880_s17 + $0x1f0] sm:$0xff]   ;;  %v10421_v60 = vld [vmem:[%s11880_s17 + $0x268] sm:$0xff]  }
0x2261   : > { %8871 = vmatprep.subr.bf16.mxu0 %v10344_v40  ;;  %8892 = vmatpush3.bf16.msra.mxu1 %v10343_v39  ;;  %v10394_v39 = vld [vmem:[%s11880_s17 + $0x130] sm:$0xff]  }
0x2262   : > { %8893 = vmatprep.subr.bf16.mxu1 %v10345_v63  ;;  %v10395_v40 = vld [vmem:[%s11880_s17 + $0x1b0] sm:$0xff]   ;;  %v10396_v63 = vld [vmem:[%s11880_s17 + $0x178] sm:$0xff]  }
0x2264   : > { %8872 = vmatpush3.bf16.msra.mxu0 %v10346_v52  ;;  %v10397_v52 = vld [vmem:[%s11880_s17 + $0x1f8] sm:$0xff]  }
0x2265   : > { %8873 = vmatprep.subr.bf16.mxu0 %v10348_v42  ;;  %8894 = vmatpush3.bf16.msra.mxu1 %v10347_v41  ;;  %v10398_v41 = vld [vmem:[%s11880_s17 + $0x138] sm:$0xff]  }
0x2266   : > { %8895 = vmatprep.subr.bf16.mxu1 %v10349_v56  ;;  %v10399_v42 = vld [vmem:[%s11880_s17 + $0x1b8] sm:$0xff]   ;;  %v5120_v56 = vrot.slane %v12538_v58, %v12464_v51  ;;  %v10418_v58 = vld [vmem:[%s11880_s17 + $0x2e0] sm:$0xff]  }
0x2268   : > { %8874 = vmatpush3.bf16.msra.mxu0 %v10350_v44  ;;  %v10401_v44 = vld [vmem:[%s11880_s17 + $0x240] sm:$0xff]  }
0x2269   : > { %8875 = vmatprep.subr.bf16.mxu0 %v10352_v45  ;;  %8896 = vmatpush3.bf16.msra.mxu1 %v10351_v3  ;;  %v10402_v3 = vld [vmem:[%s11880_s17 + $0x2c0] sm:$0xff]  }
0x226a   : > { %8897 = vmatprep.subr.bf16.mxu1 %v10353_v1  ;;  %v10403_v45 = vld [vmem:[%s11880_s17 + $0x200] sm:$0xff]  }
0x226b   : > { %v10404_v1 = vld [vmem:[%s11880_s17 + $0x280] sm:$0xff]  }
0x226c   : > { %8876 = vmatpush3.bf16.msra.mxu0 %v10354_v47  ;;  %v5136_v47 = vcombine.high %v5120_v56, %v5120_v56 }
0x226d   : > { %8877 = vmatprep.subr.bf16.mxu0 %v10356_v7  ;;  %8898 = vmatpush3.bf16.msra.mxu1 %v10355_v49  ;;  %v10405_v49 = vld [vmem:[%s11880_s17 + $0x248] sm:$0xff]  }
0x226e   : > { %8899 = vmatprep.subr.bf16.mxu1 %v10357_v62  ;;  %v10406_v7 = vld [vmem:[%s11880_s17 + $0x2c8] sm:$0xff]  }
0x226f   : > { %v10407_v62 = vld [vmem:[%s11880_s17 + $0x208] sm:$0xff]  }
0x2270   : > { %8878 = vmatpush3.bf16.msra.mxu0 %v10358_v53  ;;  %v10408_v53 = vld [vmem:[%s11880_s17 + $0x288] sm:$0xff]  }
0x2271   : > { %8879 = vmatprep.subr.bf16.mxu0 %v10360_v5  ;;  %8900 = vmatpush3.bf16.msra.mxu1 %v10359_v30  ;;  %v10409_v30 = vld [vmem:[%s11880_s17 + $0x250] sm:$0xff]  }
0x2272   : > { %8901 = vmatprep.subr.bf16.mxu1 %v10361_v55  ;;  %v10410_v5 = vld [vmem:[%s11880_s17 + $0x2d0] sm:$0xff]  }
0x2273   : > { %v10412_v55 = vld [vmem:[%s11880_s17 + $0x290] sm:$0xff]  }
0x2274   : > { %8880 = vmatpush3.bf16.msra.mxu0 %v10362_v2  ;;  %v10415_v2 = vld [vmem:[%s11880_s17 + $0x218] sm:$0xff]  }
0x2275   : > { %8881 = vmatprep.subr.bf16.mxu0 %v10364_v57  ;;  %8902 = vmatpush3.bf16.msra.mxu1 %v10363_v10  ;;  %v10416_v10 = vld [vmem:[%s11880_s17 + $0x298] sm:$0xff]   ;;  %v10419_v57 = vld [vmem:[%s11880_s17 + $0x220] sm:$0xff]  }
0x2276   : > { %8903 = vmatprep.subr.bf16.mxu1 %v10365_v33  ;;  %v10420_v33 = vld [vmem:[%s11880_s17 + $0x2a0] sm:$0xff]  }
0x2278   : > { %8882 = vmatpush3.bf16.msra.mxu0 %v10366_v14  ;;  %v10423_v14 = vld [vmem:[%s11880_s17 + $0x228] sm:$0xff]  }
0x2279   : > { %8911 = vmatprep.subr.bf16.mxu0 %v10368_v12  ;;  %8904 = vmatpush3.bf16.msra.mxu1 %v10367_v37  ;;  %v10424_v37 = vld [vmem:[%s11880_s17 + $0x2a8] sm:$0xff]   ;;  %v10426_v12 = vld [vmem:[%s11880_s17 + $0x2f0] sm:$0xff]  }
0x227a   : > { %8933 = vmatprep.subr.bf16.mxu1 %v10369_v24 }
0x227b   : > { %7107 = vmatmul.mubr.bf16.vlgmr.msra.gmra.mrb[8].mxu0 %v5113_v15  ;;  %v4505_v15 = vld [vmem:[%s11905_s29 + $0x8] sm:$0xff] }
0x227c   : > { %8912 = vmatpush3.bf16.msra.mxu0 %v10370_v16  ;;  %7186 = vmatprep.mubr.bf16.mxu0 %v5134_v13  ;;  %v5146_v24 = vrot.slane %v4505_v15, %v12464_v51  ;;  %v5139_v13 = vcombine.high %v4505_v15, %v4505_v15  ;;  %v10427_v16 = vld [vmem:[%s11880_s17 + $0x230] sm:$0xff]  }
0x227d   : > { %7147 = vmatmul.mubr.bf16.vlgmr.msra.gmra.mrb[8].mxu1 %v5135_v17  ;;  %8913 = vmatprep.subr.bf16.mxu0 %v10372_v26  ;;  %v10476_v15 = vld [vmem:[%s11880_s17 + $0x410] sm:$0xff]  }
0x227e   : > { %8934 = vmatpush3.bf16.msra.mxu1 %v10371_v8  ;;  %7226 = vmatprep.mubr.bf16.mxu1 %v5138_v35  ;;  %v10428_v8 = vld [vmem:[%s11880_s17 + $0x2b0] sm:$0xff]   ;;  %v5154_v17 = vcombine.high %v5146_v24, %v5146_v24  ;;  %v12614_v26 = vrot.slane %v5139_v13, %v12464_v51  ;;  %v10430_v35 = vld [vmem:[%s11880_s17 + $0x2f8] sm:$0xff]  }
0x227f   : > { %8935 = vmatprep.subr.bf16.mxu1 %v10373_v18  ;;  %v10429_v18 = vld [vmem:[%s11880_s17 + $0x278] sm:$0xff]  }
0x2280   : > { %8914 = vmatpush3.bf16.msra.mxu0 %v10374_v28  ;;  %v5176_v28 = vrot.slane %v5154_v17, %v12464_v51  ;;  %v10479_v13 = vld [vmem:[%s11880_s17 + $0x4d8] sm:$0xff]   ;;  %v10482_v17 = vld [vmem:[%s11880_s17 + $0x460] sm:$0xff]  }
0x2281   : > { %8915 = vmatprep.subr.bf16.mxu0 %v10376_v19  ;;  %v10431_v19 = vld [vmem:[%s11880_s17 + $0x238] sm:$0xff]  }
0x2282   : > { %8936 = vmatpush3.bf16.msra.mxu1 %v10375_v0  ;;  %v5155_v0 = vcombine.high %v12614_v26, %v12614_v26 }
0x2283   : > { %8937 = vmatprep.subr.bf16.mxu1 %v10377_v20  ;;  %v10432_v20 = vld [vmem:[%s11880_s17 + $0x2b8] sm:$0xff]  }
0x2284   : > { %8916 = vmatpush3.bf16.msra.mxu0 %v10378_v29  ;;  %v5186_v29 = vcombine.high %v5176_v28, %v5176_v28 }
0x2285   : > { %8917 = vmatprep.subr.bf16.mxu0 %v10380_v25  ;;  %v10433_v25 = vld [vmem:[%s11880_s17 + $0x340] sm:$0xff]  }
0x2286   : > { %8938 = vmatpush3.bf16.msra.mxu1 %v10379_v48  ;;  %v5162_v48 = vrot.slane %v5146_v24, %v12464_v51  ;;  %v10478_v24 = vld [vmem:[%s11880_s17 + $0x458] sm:$0xff]  }
0x2287   : > { %8939 = vmatprep.subr.bf16.mxu1 %v10381_v4  ;;  %v10434_v4 = vld [vmem:[%s11880_s17 + $0x3c0] sm:$0xff]  }
0x2288   : > { %8918 = vmatpush3.bf16.msra.mxu0 %v10382_v21  ;;  %v5183_v21 = vrot.slane %v5155_v0, %v12464_v51  ;;  %v10487_v0 = vld [vmem:[%s11880_s17 + $0x4e8] sm:$0xff]  }
0x2289   : > { %8919 = vmatprep.subr.bf16.mxu0 %v10384_v61  ;;  %v10436_v61 = vld [vmem:[%s11880_s17 + $0x380] sm:$0xff]  }
0x228a   : > { %8940 = vmatpush3.bf16.msra.mxu1 %v10383_v27  ;;  %v10435_v27 = vld [vmem:[%s11880_s17 + $0x300] sm:$0xff]  }
0x228b   : > { %8941 = vmatprep.subr.bf16.mxu1 %v10385_v36  ;;  %v5184_v36 = vcombine.high %v5162_v48, %v5162_v48 }
0x228c   : > { %8920 = vmatpush3.bf16.msra.mxu0 %v10386_v43  ;;  %v10437_v43 = vld [vmem:[%s11880_s17 + $0x348] sm:$0xff]  }
0x228d   : > { %8921 = vmatprep.subr.bf16.mxu0 %v10388_v31  ;;  %v5187_v31 = vcombine.high %v5183_v21, %v5183_v21 }
0x228e   : > { %8942 = vmatpush3.bf16.msra.mxu1 %v10387_v59  ;;  %v10438_v59 = vld [vmem:[%s11880_s17 + $0x3c8] sm:$0xff]  }
0x228f   : > { %8943 = vmatprep.subr.bf16.mxu1 %v10389_v32  ;;  %v10439_v32 = vld [vmem:[%s11880_s17 + $0x308] sm:$0xff]  }
0x2290   : > { %8922 = vmatpush3.bf16.msra.mxu0 %v10390_v34  ;;  %v10440_v34 = vld [vmem:[%s11880_s17 + $0x388] sm:$0xff]  }
0x2291   : > { %8923 = vmatprep.subr.bf16.mxu0 %v10392_v11  ;;  %v10442_v11 = vld [vmem:[%s11880_s17 + $0x3d0] sm:$0xff]  }
0x2292   : > { %8944 = vmatpush3.bf16.msra.mxu1 %v10391_v6  ;;  %v10441_v6 = vld [vmem:[%s11880_s17 + $0x350] sm:$0xff]  }
0x2293   : > { %8945 = vmatprep.subr.bf16.mxu1 %v10393_v38  ;;  %v10443_v38 = vld [vmem:[%s11880_s17 + $0x310] sm:$0xff]  }
0x2294   : > { %8924 = vmatpush3.bf16.msra.mxu0 %v10394_v39  ;;  %v10444_v39 = vld [vmem:[%s11880_s17 + $0x390] sm:$0xff]  }
0x2295   : > { %8925 = vmatprep.subr.bf16.mxu0 %v10396_v63  ;;  %v10446_v63 = vld [vmem:[%s11880_s17 + $0x3d8] sm:$0xff]  }
0x2296   : > { %8946 = vmatpush3.bf16.msra.mxu1 %v10395_v40  ;;  %v10445_v40 = vld [vmem:[%s11880_s17 + $0x358] sm:$0xff]  }
0x2297   : > { %8947 = vmatprep.subr.bf16.mxu1 %v10397_v52  ;;  %v10447_v52 = vld [vmem:[%s11880_s17 + $0x318] sm:$0xff]  }
0x2298   : > { %8926 = vmatpush3.bf16.msra.mxu0 %v10398_v41  ;;  %v10448_v41 = vld [vmem:[%s11880_s17 + $0x398] sm:$0xff]  }
0x2299   : > { %8955 = vmatprep.subr.bf16.mxu0 %v10401_v44  ;;  %v10451_v44 = vld [vmem:[%s11880_s17 + $0x320] sm:$0xff]  }
0x229a   : > { %8948 = vmatpush3.bf16.msra.mxu1 %v10399_v42  ;;  %v10449_v42 = vld [vmem:[%s11880_s17 + $0x360] sm:$0xff]  }
0x229b   : > { %7187 = vmatmul.mubr.bf16.vlgmr.msra.gmra.mrb[12].mxu0 %v5120_v56  ;;  %8977 = vmatprep.subr.bf16.mxu1 %v10402_v3  ;;  %v10450_v56 = vld [vmem:[%s11880_s17 + $0x3e0] sm:$0xff]  }
0x229c   : > { %8956 = vmatpush3.bf16.msra.mxu0 %v10403_v45  ;;  %7266 = vmatprep.mubr.bf16.mxu0 %v5176_v28  ;;  %v10452_v3 = vld [vmem:[%s11880_s17 + $0x3a0] sm:$0xff]   ;;  %v10453_v45 = vld [vmem:[%s11880_s17 + $0x368] sm:$0xff]  }
0x229d   : > { %7227 = vmatmul.mubr.bf16.vlgmr.msra.gmra.mrb[12].mxu1 %v5136_v47  ;;  %8957 = vmatprep.subr.bf16.mxu0 %v10405_v49  ;;  %v10455_v47 = vld [vmem:[%s11880_s17 + $0x328] sm:$0xff]  }
0x229e   : > { %8978 = vmatpush3.bf16.msra.mxu1 %v10404_v1  ;;  %7306 = vmatprep.mubr.bf16.mxu1 %v5186_v29  ;;  %v10454_v1 = vld [vmem:[%s11880_s17 + $0x3e8] sm:$0xff]   ;;  %v10490_v29 = vld [vmem:[%s11880_s17 + $0x470] sm:$0xff]  }
0x229f   : > { %8979 = vmatprep.subr.bf16.mxu1 %v10406_v7  ;;  %v10456_v49 = vld [vmem:[%s11880_s17 + $0x3a8] sm:$0xff]   ;;  %v10457_v7 = vld [vmem:[%s11880_s17 + $0x370] sm:$0xff]  }
0x22a0   : > { %8958 = vmatpush3.bf16.msra.mxu0 %v10407_v62  ;;  %v10458_v62 = vld [vmem:[%s11880_s17 + $0x3f0] sm:$0xff]   ;;  %v10486_v28 = vld [vmem:[%s11880_s17 + $0x468] sm:$0xff]  }
0x22a1   : > { %8959 = vmatprep.subr.bf16.mxu0 %v10409_v30  ;;  %v10460_v30 = vld [vmem:[%s11880_s17 + $0x3b0] sm:$0xff]  }
0x22a2   : > { %8980 = vmatpush3.bf16.msra.mxu1 %v10408_v53  ;;  %v10459_v53 = vld [vmem:[%s11880_s17 + $0x330] sm:$0xff]  }
0x22a3   : > { %8981 = vmatprep.subr.bf16.mxu1 %v10410_v5  ;;  %v10461_v5 = vld [vmem:[%s11880_s17 + $0x378] sm:$0xff]  }
0x22a4   : > { %8960 = vmatpush3.bf16.msra.mxu0 %v10411_v54  ;;  %v10462_v54 = vld [vmem:[%s11880_s17 + $0x3f8] sm:$0xff]  }
0x22a5   : > { %8961 = vmatprep.subr.bf16.mxu0 %v10413_v46  ;;  %v10464_v46 = vld [vmem:[%s11880_s17 + $0x3b8] sm:$0xff]  }
0x22a6   : > { %8982 = vmatpush3.bf16.msra.mxu1 %v10412_v55  ;;  %v10463_v55 = vld [vmem:[%s11880_s17 + $0x338] sm:$0xff]  }
0x22a7   : > { %8983 = vmatprep.subr.bf16.mxu1 %v10414_v23  ;;  %v5169_v23 = vrot.slane %v12614_v26, %v12464_v51  ;;  %v10483_v26 = vld [vmem:[%s11880_s17 + $0x4e0] sm:$0xff]  }
0x22a8   : > { %8962 = vmatpush3.bf16.msra.mxu0 %v10415_v2  ;;  %v10466_v2 = vld [vmem:[%s11880_s17 + $0x440] sm:$0xff]  }
0x22a9   : > { %8963 = vmatprep.subr.bf16.mxu0 %v10417_v22  ;;  %v10468_v22 = vld [vmem:[%s11880_s17 + $0x400] sm:$0xff]  }
0x22aa   : > { %8984 = vmatpush3.bf16.msra.mxu1 %v10416_v10  ;;  %v10467_v10 = vld [vmem:[%s11880_s17 + $0x4c0] sm:$0xff]  }
0x22ab   : > { %8985 = vmatprep.subr.bf16.mxu1 %v10418_v58  ;;  %v10469_v58 = vld [vmem:[%s11880_s17 + $0x480] sm:$0xff]  }
0x22ac   : > { %8964 = vmatpush3.bf16.msra.mxu0 %v10419_v57  ;;  %v5185_v57 = vcombine.high %v5169_v23, %v5169_v23 }
0x22ad   : > { %8965 = vmatprep.subr.bf16.mxu0 %v10421_v60  ;;  %v10471_v60 = vld [vmem:[%s11880_s17 + $0x4c8] sm:$0xff]  }
0x22ae   : > { %8986 = vmatpush3.bf16.msra.mxu1 %v10420_v33  ;;  %v10470_v33 = vld [vmem:[%s11880_s17 + $0x448] sm:$0xff]  }
0x22af   : > { %8987 = vmatprep.subr.bf16.mxu1 %v10422_v9  ;;  %v10472_v9 = vld [vmem:[%s11880_s17 + $0x408] sm:$0xff]  }
0x22b0   : > { %8966 = vmatpush3.bf16.msra.mxu0 %v10423_v14  ;;  %v10473_v14 = vld [vmem:[%s11880_s17 + $0x488] sm:$0xff]  }
0x22b1   : > { %8967 = vmatprep.subr.bf16.mxu0 %v10425_v50  ;;  %v10475_v50 = vld [vmem:[%s11880_s17 + $0x4d0] sm:$0xff]  }
0x22b2   : > { %8988 = vmatpush3.bf16.msra.mxu1 %v10424_v37  ;;  %v10474_v37 = vld [vmem:[%s11880_s17 + $0x450] sm:$0xff]  }
0x22b3   : > { %8989 = vmatprep.subr.bf16.mxu1 %v10426_v12  ;;  %v10477_v12 = vld [vmem:[%s11880_s17 + $0x490] sm:$0xff]  }
0x22b4   : > { %8968 = vmatpush3.bf16.msra.mxu0 %v10427_v16  ;;  %v10480_v16 = vld [vmem:[%s11880_s17 + $0x418] sm:$0xff]  }
0x22b5   : > { %8969 = vmatprep.subr.bf16.mxu0 %v10429_v18  ;;  %v10484_v18 = vld [vmem:[%s11880_s17 + $0x420] sm:$0xff]  }
0x22b6   : > { %8990 = vmatpush3.bf16.msra.mxu1 %v10428_v8  ;;  %v10481_v8 = vld [vmem:[%s11880_s17 + $0x498] sm:$0xff]  }
0x22b7   : > { %8991 = vmatprep.subr.bf16.mxu1 %v10430_v35  ;;  %v10485_v35 = vld [vmem:[%s11880_s17 + $0x4a0] sm:$0xff]  }
0x22b8   : > { %8970 = vmatpush3.bf16.msra.mxu0 %v10431_v19  ;;  %v10488_v19 = vld [vmem:[%s11880_s17 + $0x428] sm:$0xff]  }
0x22b9   : > { %8999 = vmatprep.subr.bf16.mxu0 %v10433_v25  ;;  %v10491_v25 = vld [vmem:[%s11880_s17 + $0x4f0] sm:$0xff]  }
0x22ba   : > { %8992 = vmatpush3.bf16.msra.mxu1 %v10432_v20  ;;  %v10489_v20 = vld [vmem:[%s11880_s17 + $0x4a8] sm:$0xff]  }
0x22bb   : > { %7267 = vmatmul.mubr.bf16.vlgmr.msra.gmra.mrb[16].mxu0 %v5162_v48  ;;  %9021 = vmatprep.subr.bf16.mxu1 %v10434_v4  ;;  %v4506_v48 = vld [vmem:[%s11905_s29 + $0x10] sm:$0xff] }
0x22bc   : > { %9000 = vmatpush3.bf16.msra.mxu0 %v10435_v27  ;;  %7346 = vmatprep.mubr.bf16.mxu0 %v5183_v21  ;;  %v5195_v4 = vrot.slane %v4506_v48, %v12464_v51  ;;  %v5188_v21 = vcombine.high %v4506_v48, %v4506_v48  ;;  %v10492_v27 = vld [vmem:[%s11880_s17 + $0x430] sm:$0xff]   ;;  %v10529_v48 = vld [vmem:[%s11880_s17 + $0x5b8] sm:$0xff]  }
0x22bd   : > { %7307 = vmatmul.mubr.bf16.vlgmr.msra.gmra.mrb[16].mxu1 %v5184_v36  ;;  %9001 = vmatprep.subr.bf16.mxu0 %v10437_v43 }
0x22be   : > { %9022 = vmatpush3.bf16.msra.mxu1 %v10436_v61  ;;  %7386 = vmatprep.mubr.bf16.mxu1 %v5187_v31  ;;  %v10494_v61 = vld [vmem:[%s11880_s17 + $0x478] sm:$0xff]   ;;  %v5203_v36 = vcombine.high %v5195_v4, %v5195_v4  ;;  %v12690_v43 = vrot.slane %v5188_v21, %v12464_v51 }
0x22bf   : > { %9023 = vmatprep.subr.bf16.mxu1 %v10438_v59  ;;  %v10493_v59 = vld [vmem:[%s11880_s17 + $0x4b0] sm:$0xff]   ;;  %v10495_v31 = vld [vmem:[%s11880_s17 + $0x4f8] sm:$0xff]  }
0x22c0   : > { %9002 = vmatpush3.bf16.msra.mxu0 %v10439_v32  ;;  %v5225_v32 = vrot.slane %v5203_v36, %v12464_v51  ;;  %v10536_v36 = vld [vmem:[%s11880_s17 + $0x6c8] sm:$0xff]  }
0x22c1   : > { %9003 = vmatprep.subr.bf16.mxu0 %v10441_v6  ;;  %v10496_v6 = vld [vmem:[%s11880_s17 + $0x438] sm:$0xff]  }
0x22c2   : > { %9024 = vmatpush3.bf16.msra.mxu1 %v10440_v34  ;;  %v5204_v34 = vcombine.high %v12690_v43, %v12690_v43 }
0x22c3   : > { %9025 = vmatprep.subr.bf16.mxu1 %v10442_v11  ;;  %v5235_v11 = vcombine.high %v5225_v32, %v5225_v32 }
0x22c4   : > { %9004 = vmatpush3.bf16.msra.mxu0 %v10443_v38  ;;  %v5211_v38 = vrot.slane %v5195_v4, %v12464_v51  ;;  %v10533_v4 = vld [vmem:[%s11880_s17 + $0x600] sm:$0xff]  }
0x22c5   : > { %9005 = vmatprep.subr.bf16.mxu0 %v10445_v40  ;;  %v10497_v40 = vld [vmem:[%s11880_s17 + $0x4b8] sm:$0xff]  }
0x22c6   : > { %9026 = vmatpush3.bf16.msra.mxu1 %v10444_v39  ;;  %v10498_v39 = vld [vmem:[%s11880_s17 + $0x540] sm:$0xff]  }
0x22c7   : > { %9027 = vmatprep.subr.bf16.mxu1 %v10446_v63  ;;  %v5232_v63 = vrot.slane %v5204_v34, %v12464_v51  ;;  %v10541_v34 = vld [vmem:[%s11880_s17 + $0x610] sm:$0xff]  }
0x22c8   : > { %9006 = vmatpush3.bf16.msra.mxu0 %v10447_v52  ;;  %v10499_v52 = vld [vmem:[%s11880_s17 + $0x5c0] sm:$0xff]  }
0x22c9   : > { %9007 = vmatprep.subr.bf16.mxu0 %v10449_v42  ;;  %v5233_v42 = vcombine.high %v5211_v38, %v5211_v38 }
0x22ca   : > { %9028 = vmatpush3.bf16.msra.mxu1 %v10448_v41  ;;  %v10500_v41 = vld [vmem:[%s11880_s17 + $0x500] sm:$0xff]  }
0x22cb   : > { %9029 = vmatprep.subr.bf16.mxu1 %v10450_v56  ;;  %v10502_v56 = vld [vmem:[%s11880_s17 + $0x548] sm:$0xff]  }
0x22cc   : > { %9008 = vmatpush3.bf16.msra.mxu0 %v10451_v44  ;;  %v10501_v44 = vld [vmem:[%s11880_s17 + $0x580] sm:$0xff]  }
0x22cd   : > { %9009 = vmatprep.subr.bf16.mxu0 %v10453_v45  ;;  %v10503_v45 = vld [vmem:[%s11880_s17 + $0x5c8] sm:$0xff]  }
0x22ce   : > { %9030 = vmatpush3.bf16.msra.mxu1 %v10452_v3  ;;  %v5236_v3 = vcombine.high %v5232_v63, %v5232_v63 }
0x22cf   : > { %9031 = vmatprep.subr.bf16.mxu1 %v10454_v1  ;;  %v10504_v1 = vld [vmem:[%s11880_s17 + $0x508] sm:$0xff]  }
0x22d0   : > { %9010 = vmatpush3.bf16.msra.mxu0 %v10455_v47  ;;  %v10506_v47 = vld [vmem:[%s11880_s17 + $0x550] sm:$0xff]  }
0x22d1   : > { %9011 = vmatprep.subr.bf16.mxu0 %v10457_v7  ;;  %v10507_v7 = vld [vmem:[%s11880_s17 + $0x5d0] sm:$0xff]  }
0x22d2   : > { %9032 = vmatpush3.bf16.msra.mxu1 %v10456_v49  ;;  %v10505_v49 = vld [vmem:[%s11880_s17 + $0x588] sm:$0xff]  }
0x22d3   : > { %9033 = vmatprep.subr.bf16.mxu1 %v10458_v62  ;;  %v10508_v62 = vld [vmem:[%s11880_s17 + $0x510] sm:$0xff]  }
0x22d4   : > { %9012 = vmatpush3.bf16.msra.mxu0 %v10459_v53  ;;  %v10510_v53 = vld [vmem:[%s11880_s17 + $0x558] sm:$0xff]  }
0x22d5   : > { %9013 = vmatprep.subr.bf16.mxu0 %v10461_v5  ;;  %v10511_v5 = vld [vmem:[%s11880_s17 + $0x5d8] sm:$0xff]  }
0x22d6   : > { %9034 = vmatpush3.bf16.msra.mxu1 %v10460_v30  ;;  %v10509_v30 = vld [vmem:[%s11880_s17 + $0x590] sm:$0xff]  }
0x22d7   : > { %9035 = vmatprep.subr.bf16.mxu1 %v10462_v54  ;;  %v10512_v54 = vld [vmem:[%s11880_s17 + $0x518] sm:$0xff]  }
0x22d8   : > { %9014 = vmatpush3.bf16.msra.mxu0 %v10463_v55  ;;  %v10514_v55 = vld [vmem:[%s11880_s17 + $0x560] sm:$0xff]  }
0x22d9   : > { %9043 = vmatprep.subr.bf16.mxu0 %v10466_v2  ;;  %v10516_v2 = vld [vmem:[%s11880_s17 + $0x520] sm:$0xff]  }
0x22da   : > { %9036 = vmatpush3.bf16.msra.mxu1 %v10464_v46  ;;  %v10513_v46 = vld [vmem:[%s11880_s17 + $0x598] sm:$0xff]  }
0x22db   : > { %7347 = vmatmul.mubr.bf16.vlgmr.msra.gmra.mrb[20].mxu0 %v5169_v23  ;;  %9065 = vmatprep.subr.bf16.mxu1 %v10467_v10  ;;  %v10515_v23 = vld [vmem:[%s11880_s17 + $0x5e0] sm:$0xff]   ;;  %v10518_v10 = vld [vmem:[%s11880_s17 + $0x568] sm:$0xff]  }
0x22dc   : > { %9044 = vmatpush3.bf16.msra.mxu0 %v10468_v22  ;;  %7426 = vmatprep.mubr.bf16.mxu0 %v5225_v32  ;;  %v10517_v22 = vld [vmem:[%s11880_s17 + $0x5a0] sm:$0xff]   ;;  %v10540_v32 = vld [vmem:[%s11880_s17 + $0x6d0] sm:$0xff]  }
0x22dd   : > { %7387 = vmatmul.mubr.bf16.vlgmr.msra.gmra.mrb[20].mxu1 %v5185_v57  ;;  %9045 = vmatprep.subr.bf16.mxu0 %v10470_v33  ;;  %v10520_v57 = vld [vmem:[%s11880_s17 + $0x528] sm:$0xff]   ;;  %v10522_v33 = vld [vmem:[%s11880_s17 + $0x570] sm:$0xff]  }
0x22de   : > { %9066 = vmatpush3.bf16.msra.mxu1 %v10469_v58  ;;  %7466 = vmatprep.mubr.bf16.mxu1 %v5235_v11  ;;  %v10519_v58 = vld [vmem:[%s11880_s17 + $0x5e8] sm:$0xff]   ;;  %v10542_v11 = vld [vmem:[%s11880_s17 + $0x690] sm:$0xff]  }
0x22df   : > { %9067 = vmatprep.subr.bf16.mxu1 %v10471_v60 }
0x22e0   : > { %9046 = vmatpush3.bf16.msra.mxu0 %v10472_v9  ;;  %v10521_v9 = vld [vmem:[%s11880_s17 + $0x5a8] sm:$0xff]  }
0x22e1   : > { %9047 = vmatprep.subr.bf16.mxu0 %v10474_v37  ;;  %v10523_v37 = vld [vmem:[%s11880_s17 + $0x5f0] sm:$0xff]  }
0x22e2   : > { %9068 = vmatpush3.bf16.msra.mxu1 %v10473_v14 }
0x22e3   : > { %9069 = vmatprep.subr.bf16.mxu1 %v10475_v50 }
0x22e4   : > { %9048 = vmatpush3.bf16.msra.mxu0 %v10476_v15 }
0x22e5   : > { %9049 = vmatprep.subr.bf16.mxu0 %v10478_v24  ;;  %v10524_v24 = vld [vmem:[%s11880_s17 + $0x530] sm:$0xff]  }
0x22e6   : > { %9070 = vmatpush3.bf16.msra.mxu1 %v10477_v12 }
0x22e7   : > { %9071 = vmatprep.subr.bf16.mxu1 %v10479_v13  ;;  %v10526_v13 = vld [vmem:[%s11880_s17 + $0x578] sm:$0xff]  }
0x22e8   : > { %9050 = vmatpush3.bf16.msra.mxu0 %v10480_v16 }
0x22e9   : > { %9051 = vmatprep.subr.bf16.mxu0 %v10482_v17 }
0x22ea   : > { %9072 = vmatpush3.bf16.msra.mxu1 %v10481_v8 }
0x22eb   : > { %9073 = vmatprep.subr.bf16.mxu1 %v10483_v26 }
0x22ec   : > { %9052 = vmatpush3.bf16.msra.mxu0 %v10484_v18  ;;  %v10525_v18 = vld [vmem:[%s11880_s17 + $0x5b0] sm:$0xff]  }
0x22ed   : > { %9053 = vmatprep.subr.bf16.mxu0 %v10486_v28  ;;  %v10527_v28 = vld [vmem:[%s11880_s17 + $0x5f8] sm:$0xff]  }
0x22ee   : > { %9074 = vmatpush3.bf16.msra.mxu1 %v10485_v35 }
0x22ef   : > { %9075 = vmatprep.subr.bf16.mxu1 %v10487_v0 }
0x22f0   : > { %9054 = vmatpush3.bf16.msra.mxu0 %v10488_v19  ;;  %v10528_v19 = vld [vmem:[%s11880_s17 + $0x538] sm:$0xff]  }
0x22f1   : > { %9055 = vmatprep.subr.bf16.mxu0 %v10490_v29  ;;  %v10531_v29 = vld [vmem:[%s11880_s17 + $0x640] sm:$0xff]  }
0x22f2   : > { %9076 = vmatpush3.bf16.msra.mxu1 %v10489_v20  ;;  %v5218_v20 = vrot.slane %v12690_v43, %v12464_v51  ;;  %v10537_v43 = vld [vmem:[%s11880_s17 + $0x608] sm:$0xff]  }
0x22f3   : > { %9077 = vmatprep.subr.bf16.mxu1 %v10491_v25  ;;  %v10532_v25 = vld [vmem:[%s11880_s17 + $0x6c0] sm:$0xff]  }
0x22f4   : > { %9056 = vmatpush3.bf16.msra.mxu0 %v10492_v27  ;;  %v5234_v21 = vcombine.high %v5218_v20, %v5218_v20  ;;  %v10535_v27 = vld [vmem:[%s11880_s17 + $0x648] sm:$0xff]  }
0x22f5   : > { %9057 = vmatprep.subr.bf16.mxu0 %v10494_v61  ;;  %v10534_v61 = vld [vmem:[%s11880_s17 + $0x680] sm:$0xff]  }
0x22f6   : > { %9078 = vmatpush3.bf16.msra.mxu1 %v10493_v59  ;;  %v10539_v59 = vld [vmem:[%s11880_s17 + $0x650] sm:$0xff]  }
0x22f7   : > { %9079 = vmatprep.subr.bf16.mxu1 %v10495_v31  ;;  %v10538_v31 = vld [vmem:[%s11880_s17 + $0x688] sm:$0xff]  }
0x22f8   : > { %9058 = vmatpush3.bf16.msra.mxu0 %v10496_v6  ;;  %v10543_v6 = vld [vmem:[%s11880_s17 + $0x658] sm:$0xff]  }
0x22f9   : > { %9087 = vmatprep.subr.bf16.mxu0 %v10498_v39  ;;  %v10545_v39 = vld [vmem:[%s11880_s17 + $0x618] sm:$0xff]  }
0x22fa   : > { %9080 = vmatpush3.bf16.msra.mxu1 %v10497_v40  ;;  %v10546_v40 = vld [vmem:[%s11880_s17 + $0x698] sm:$0xff]  }
0x22fb   : > { %7427 = vmatmul.mubr.bf16.vlgmr.msra.gmra.mrb[24].mxu0 %v5211_v38  ;;  %9109 = vmatprep.subr.bf16.mxu1 %v10499_v52  ;;  %v10544_v38 = vld [vmem:[%s11880_s17 + $0x6d8] sm:$0xff]   ;;  %v10548_v52 = vld [vmem:[%s11880_s17 + $0x6e0] sm:$0xff]  }
0x22fc   : > { %9088 = vmatpush3.bf16.msra.mxu0 %v10500_v41  ;;  %7506 = vmatprep.mubr.bf16.mxu0 %v5232_v63  ;;  %v10547_v63 = vld [vmem:[%s11880_s17 + $0x660] sm:$0xff]  }
0x22fd   : > { %7467 = vmatmul.mubr.bf16.vlgmr.msra.gmra.mrb[24].mxu1 %v5233_v42  ;;  %9089 = vmatprep.subr.bf16.mxu0 %v10502_v56  ;;  %v10549_v41 = vld [vmem:[%s11880_s17 + $0x620] sm:$0xff]   ;;  %v10551_v56 = vld [vmem:[%s11880_s17 + $0x668] sm:$0xff]  }
0x22fe   : > { %9110 = vmatpush3.bf16.msra.mxu1 %v10501_v44  ;;  %7546 = vmatprep.mubr.bf16.mxu1 %v5236_v3  ;;  %v10550_v42 = vld [vmem:[%s11880_s17 + $0x6a0] sm:$0xff]   ;;  %v10552_v44 = vld [vmem:[%s11880_s17 + $0x6e8] sm:$0xff]  }
0x22ff   : > { %9111 = vmatprep.subr.bf16.mxu1 %v10503_v45  ;;  %v10553_v3 = vld [vmem:[%s11880_s17 + $0x628] sm:$0xff]  }
0x2300   : > { %9090 = vmatpush3.bf16.msra.mxu0 %v10504_v1  ;;  %v10554_v45 = vld [vmem:[%s11880_s17 + $0x6a8] sm:$0xff]   ;;  %v10555_v1 = vld [vmem:[%s11880_s17 + $0x670] sm:$0xff]  }
0x2301   : > { %9091 = vmatprep.subr.bf16.mxu0 %v10506_v47  ;;  %v10556_v47 = vld [vmem:[%s11880_s17 + $0x6f0] sm:$0xff]  }
0x2302   : > { %9112 = vmatpush3.bf16.msra.mxu1 %v10505_v49 }
0x2303   : > { %9113 = vmatprep.subr.bf16.mxu1 %v10507_v7  ;;  %v10557_v7 = vld [vmem:[%s11880_s17 + $0x630] sm:$0xff]  }
0x2304   : > { %9092 = vmatpush3.bf16.msra.mxu0 %v10508_v62 }
0x2305   : > { %9093 = vmatprep.subr.bf16.mxu0 %v10510_v53  ;;  %v4507_v53 = vld [vmem:[%s11905_s29 + $0x18] sm:$0xff] }
0x2306   : > { %9114 = vmatpush3.bf16.msra.mxu1 %v10509_v30 }
0x2307   : > { %9115 = vmatprep.subr.bf16.mxu1 %v10511_v5 }
0x2308   : > { %9094 = vmatpush3.bf16.msra.mxu0 %v10512_v54 }
0x2309   : > { %9095 = vmatprep.subr.bf16.mxu0 %v10514_v55  ;;  %v10558_v55 = vld [vmem:[%s11880_s17 + $0x6b0] sm:$0xff]  }
0x230a   : > { %9116 = vmatpush3.bf16.msra.mxu1 %v10513_v46  ;;  %v10559_v46 = vld [vmem:[%s11880_s17 + $0x678] sm:$0xff]  }
0x230b   : > { %9117 = vmatprep.subr.bf16.mxu1 %v10515_v23  ;;  %v5244_v23 = vrot.slane %v4507_v53, %v12464_v51 }
0x230c   : > { %9096 = vmatpush3.bf16.msra.mxu0 %v10516_v2  ;;  %v5237_v2 = vcombine.high %v4507_v53, %v4507_v53 }
0x230d   : > { %9097 = vmatprep.subr.bf16.mxu0 %v10518_v10  ;;  %v3769_v10 = vld [vmem:[#allocation2] sm:$0x3] }
0x230e   : > { %9118 = vmatpush3.bf16.msra.mxu1 %v10517_v22  ;;  %v8795_v60 = vpop.f32.mrb[0].mxu0 }
0x230f   : > { %v8796_v14 = vpop.f32.mrb[1].mxu0  ;;  %9119 = vmatprep.subr.bf16.mxu1 %v10519_v58  ;;  %v8817_v50 = vpop.f32.mrb[0].mxu1 }
0x2310   : > { %v8797_v15 = vadd.f32 %v8796_v14, %v8795_v60  ;;  %v8798_v12 = vpop.f32.mrb[2].mxu0  ;;  %9098 = vmatpush3.bf16.msra.mxu0 %v10520_v57  ;;  %v8818_v16 = vpop.f32.mrb[1].mxu1  ;;  %v5252_v14 = vcombine.high %v5244_v23, %v5244_v23 }
0x2311   : > { %v8799_v8 = vpop.f32.mrb[3].mxu0  ;;  %9099 = vmatprep.subr.bf16.mxu0 %v10522_v33  ;;  %v8819_v17 = vadd.f32 %v8818_v16, %v8817_v50  ;;  %v8820_v26 = vpop.f32.mrb[2].mxu1  ;;  %v10561_v50 = vld [vmem:[%s11880_s17 + $0x638] sm:$0xff]   ;;  %v5260_v16 = vrot.slane %v5244_v23, %v12464_v51 }
0x2312   : > { %9120 = vmatpush3.bf16.msra.mxu1 %v10521_v9  ;;  %v8821_v35 = vpop.f32.mrb[3].mxu1  ;;  %v10560_v9 = vld [vmem:[%s11880_s17 + $0x6f8] sm:$0xff]   ;;  %v10563_v8 = vld [vmem:[%s11880_s17 + $0x740] sm:$0xff]  }
0x2313   : > { %9121 = vmatprep.subr.bf16.mxu1 %v10523_v37  ;;  %v12731_v0 = vadd.f32 %v8819_v17, %v8797_v15  ;;  %v12772_v15 = vrot.slane %v5237_v2, %v12464_v51  ;;  %v10564_v35 = vld [vmem:[%s11880_s17 + $0x7c0] sm:$0xff]   ;;  %v10593_v23 = vld [vmem:[%s11880_s17 + $0x738] sm:$0xff]  }
0x2314   : > { %9100 = vmatpush3.bf16.msra.mxu0 %v10524_v24  ;;  %v10562_v24 = vld [vmem:[%s11880_s17 + $0x6b8] sm:$0xff]  }
0x2315   : > { %9101 = vmatprep.subr.bf16.mxu0 %v10526_v13  ;;  %v5274_v13 = vrot.slane %v5252_v14, %v12464_v51  ;;  %v5253_v17 = vcombine.high %v12772_v15, %v12772_v15  ;;  %v10600_v14 = vld [vmem:[%s11880_s17 + $0x848] sm:$0xff]  }
0x2316   : > { %9122 = vmatpush3.bf16.msra.mxu1 %v10525_v18 }
0x2317   : > { %9123 = vmatprep.subr.bf16.mxu1 %v10527_v28  ;;  %v5284_v18 = vcombine.high %v5274_v13, %v5274_v13  ;;  %v10565_v28 = vld [vmem:[%s11880_s17 + $0x700] sm:$0xff]  }
0x2318   : > { %9102 = vmatpush3.bf16.msra.mxu0 %v10528_v19  ;;  %v10566_v19 = vld [vmem:[%s11880_s17 + $0x780] sm:$0xff]  }
0x2319   : > { %9131 = vmatprep.subr.bf16.mxu0 %v10531_v29  ;;  %v10567_v29 = vld [vmem:[%s11880_s17 + $0x748] sm:$0xff]  }
0x231a   : > { %9124 = vmatpush3.bf16.msra.mxu1 %v10529_v48  ;;  %v10568_v48 = vld [vmem:[%s11880_s17 + $0x7c8] sm:$0xff]  }
0x231b   : > { %7507 = vmatmul.mubr.bf16.vlgmr.msra.gmra.mrb[28].mxu0 %v5218_v20  ;;  %9153 = vmatprep.subr.bf16.mxu1 %v10532_v25  ;;  %v5282_v20 = vcombine.high %v5260_v16, %v5260_v16 }
0x231c   : > { %9132 = vmatpush3.bf16.msra.mxu0 %v10533_v4  ;;  %7586 = vmatprep.mubr.bf16.mxu0 %v5274_v13  ;;  %v10569_v4 = vld [vmem:[%s11880_s17 + $0x708] sm:$0xff]   ;;  %v10606_v13 = vld [vmem:[%s11880_s17 + $0x810] sm:$0xff]  }
0x231d   : > { %7547 = vmatmul.mubr.bf16.vlgmr.msra.gmra.mrb[28].mxu1 %v5234_v21  ;;  %9133 = vmatprep.subr.bf16.mxu0 %v10535_v27  ;;  %v10570_v21 = vld [vmem:[%s11880_s17 + $0x788] sm:$0xff]   ;;  %v10571_v27 = vld [vmem:[%s11880_s17 + $0x750] sm:$0xff]  }
0x231e   : > { %9154 = vmatpush3.bf16.msra.mxu1 %v10534_v61  ;;  %7626 = vmatprep.mubr.bf16.mxu1 %v5284_v18  ;;  %v10572_v61 = vld [vmem:[%s11880_s17 + $0x7d0] sm:$0xff]   ;;  %v10611_v18 = vld [vmem:[%s11880_s17 + $0x898] sm:$0xff]  }
0x231f   : > { %9155 = vmatprep.subr.bf16.mxu1 %v10536_v36  ;;  %v10573_v36 = vld [vmem:[%s11880_s17 + $0x710] sm:$0xff]  }
0x2320   : > { %9134 = vmatpush3.bf16.msra.mxu0 %v10537_v43  ;;  %v10574_v43 = vld [vmem:[%s11880_s17 + $0x790] sm:$0xff]  }
0x2321   : > { %9135 = vmatprep.subr.bf16.mxu0 %v10539_v59  ;;  %v10575_v59 = vld [vmem:[%s11880_s17 + $0x758] sm:$0xff]  }
0x2322   : > { %9156 = vmatpush3.bf16.msra.mxu1 %v10538_v31  ;;  %v10576_v31 = vld [vmem:[%s11880_s17 + $0x7d8] sm:$0xff]  }
0x2323   : > { %9157 = vmatprep.subr.bf16.mxu1 %v10540_v32  ;;  %v10577_v32 = vld [vmem:[%s11880_s17 + $0x718] sm:$0xff]  }
0x2324   : > { %9136 = vmatpush3.bf16.msra.mxu0 %v10541_v34  ;;  %v10578_v34 = vld [vmem:[%s11880_s17 + $0x798] sm:$0xff]  }
0x2325   : > { %9137 = vmatprep.subr.bf16.mxu0 %v10543_v6  ;;  %v10579_v6 = vld [vmem:[%s11880_s17 + $0x760] sm:$0xff]  }
0x2326   : > { %9158 = vmatpush3.bf16.msra.mxu1 %v10542_v11  ;;  %v10580_v11 = vld [vmem:[%s11880_s17 + $0x7e0] sm:$0xff]  }
0x2327   : > { %9159 = vmatprep.subr.bf16.mxu1 %v10544_v38  ;;  %v10581_v38 = vld [vmem:[%s11880_s17 + $0x720] sm:$0xff]  }
0x2328   : > { %9138 = vmatpush3.bf16.msra.mxu0 %v10545_v39  ;;  %v10582_v39 = vld [vmem:[%s11880_s17 + $0x7a0] sm:$0xff]  }
0x2329   : > { %9139 = vmatprep.subr.bf16.mxu0 %v10547_v63  ;;  %v10584_v63 = vld [vmem:[%s11880_s17 + $0x7e8] sm:$0xff]  }
0x232a   : > { %9160 = vmatpush3.bf16.msra.mxu1 %v10546_v40  ;;  %v10583_v40 = vld [vmem:[%s11880_s17 + $0x768] sm:$0xff]  }
0x232b   : > { %9161 = vmatprep.subr.bf16.mxu1 %v10548_v52  ;;  %v10585_v52 = vld [vmem:[%s11880_s17 + $0x728] sm:$0xff]  }
0x232c   : > { %9140 = vmatpush3.bf16.msra.mxu0 %v10549_v41  ;;  %v10586_v41 = vld [vmem:[%s11880_s17 + $0x7a8] sm:$0xff]  }
0x232d   : > { %9141 = vmatprep.subr.bf16.mxu0 %v10551_v56 }
0x232e   : > { %9162 = vmatpush3.bf16.msra.mxu1 %v10550_v42  ;;  %v8839_v49 = vpop.f32.mrb[4].mxu0  ;;  %v10587_v42 = vld [vmem:[%s11880_s17 + $0x770] sm:$0xff]  }
0x232f   : > { %v8840_v62 = vpop.f32.mrb[5].mxu0  ;;  %9163 = vmatprep.subr.bf16.mxu1 %v10552_v44  ;;  %v8861_v30 = vpop.f32.mrb[4].mxu1  ;;  %v10588_v44 = vld [vmem:[%s11880_s17 + $0x7f0] sm:$0xff]  }
0x2330   : > { %v8841_v5 = vadd.f32 %v8840_v62, %v8839_v49  ;;  %v8842_v54 = vpop.f32.mrb[6].mxu0  ;;  %9142 = vmatpush3.bf16.msra.mxu0 %v10553_v3  ;;  %v8862_v22 = vpop.f32.mrb[5].mxu1  ;;  %v10591_v62 = vld [vmem:[%s11880_s17 + $0x778] sm:$0xff]  }
0x2331   : > { %v8843_v58 = vpop.f32.mrb[7].mxu0  ;;  %9143 = vmatprep.subr.bf16.mxu0 %v10555_v1  ;;  %v8863_v33 = vadd.f32 %v8862_v22, %v8861_v30  ;;  %v8864_v60 = vpop.f32.mrb[6].mxu1  ;;  %v5267_v22 = vrot.slane %v12772_v15, %v12464_v51  ;;  %v10603_v15 = vld [vmem:[%s11880_s17 + $0x888] sm:$0xff]  }
0x2332   : > { %v4456_v57 = vadd.f32 %v8841_v5, %v12731_v0  ;;  %9164 = vmatpush3.bf16.msra.mxu1 %v10554_v45  ;;  %v8865_v37 = vpop.f32.mrb[7].mxu1  ;;  %v5281_v0 = vrot.slane %v5253_v17, %v12464_v51  ;;  %v10589_v45 = vld [vmem:[%s11880_s17 + $0x730] sm:$0xff]   ;;  %v10596_v58 = vld [vmem:[%s11880_s17 + $0x840] sm:$0xff]   ;;  %v10609_v17 = vld [vmem:[%s11880_s17 + $0x8d8] sm:$0xff]  }
0x2333   : > { %9165 = vmatprep.subr.bf16.mxu1 %v10556_v47  ;;  %v10599_v60 = vld [vmem:[%s11880_s17 + $0x880] sm:$0xff]   ;;  %v10601_v37 = vld [vmem:[%s11880_s17 + $0x8c8] sm:$0xff]  }
0x2334   : > { %v4496_v12 = vadd.f32 %v8863_v33, %v4456_v57  ;;  %9144 = vmatpush3.bf16.msra.mxu0 %v10557_v7  ;;  %v5285_v25 = vcombine.high %v5281_v0, %v5281_v0  ;;  %v10590_v7 = vld [vmem:[%s11880_s17 + $0x7b0] sm:$0xff]   ;;  %v10597_v57 = vld [vmem:[%s11880_s17 + $0x8c0] sm:$0xff]  }
0x2335   : > { %9145 = vmatprep.subr.bf16.mxu0 %v10559_v46  ;;  %v10598_v33 = vld [vmem:[%s11880_s17 + $0x800] sm:$0xff]  }
0x2336   : > { %v4501_v26 = vadd.f32 %v4496_v12, %v3769_v10  ;;  %9166 = vmatpush3.bf16.msra.mxu1 %v10558_v55  ;;  %v10592_v55 = vld [vmem:[%s11880_s17 + $0x7f8] sm:$0xff]   ;;  %v10604_v12 = vld [vmem:[%s11880_s17 + $0x850] sm:$0xff]  }
0x2337   : > { %9167 = vmatprep.subr.bf16.mxu1 %v10560_v9  ;;  %v10594_v10 = vld [vmem:[%s11880_s17 + $0x7b8] sm:$0xff]   ;;  %v5283_v9 = vcombine.high %v5267_v22, %v5267_v22 }
0x2338   : > { %4502 = vst [vmem:[#allocation2] sm:$0x3] %v4501_v26  ;;  %9146 = vmatpush3.bf16.msra.mxu0 %v10561_v50  ;;  %v10602_v50 = vld [vmem:[%s11880_s17 + $0x808] sm:$0xff]   ;;  %v10610_v26 = vld [vmem:[%s11880_s17 + $0x818] sm:$0xff]  }
0x2339   : > { %9175 = vmatprep.subr.bf16.mxu0 %v10563_v8  ;;  %v10608_v8 = vld [vmem:[%s11880_s17 + $0x858] sm:$0xff]  }
0x233a   : > { %9168 = vmatpush3.bf16.msra.mxu1 %v10562_v24  ;;  %v10605_v24 = vld [vmem:[%s11880_s17 + $0x8d0] sm:$0xff]  }
0x233b   : > { %7587 = vmatmul.mubr.bf16.vlgmr.msra.gmra.mrb[32].mxu0 %v5260_v16  ;;  %9197 = vmatprep.subr.bf16.mxu1 %v10564_v35  ;;  %v10607_v16 = vld [vmem:[%s11880_s17 + $0x890] sm:$0xff]   ;;  %v10612_v35 = vld [vmem:[%s11880_s17 + $0x860] sm:$0xff]  }
0x233c   : > { %9176 = vmatpush3.bf16.msra.mxu0 %v10565_v28  ;;  %7666 = vmatprep.mubr.bf16.mxu0 %v5281_v0  ;;  %v10613_v28 = vld [vmem:[%s11880_s17 + $0x8e0] sm:$0xff]  }
0x233d   : > { %7627 = vmatmul.mubr.bf16.vlgmr.msra.gmra.mrb[32].mxu1 %v5282_v20  ;;  %9177 = vmatprep.subr.bf16.mxu0 %v10567_v29  ;;  %v10614_v0 = vld [vmem:[%s11880_s17 + $0x820] sm:$0xff]   ;;  %v10616_v20 = vld [vmem:[%s11880_s17 + $0x868] sm:$0xff]  }
0x233e   : > { %9198 = vmatpush3.bf16.msra.mxu1 %v10566_v19  ;;  %7706 = vmatprep.mubr.bf16.mxu1 %v5285_v25  ;;  %v10615_v19 = vld [vmem:[%s11880_s17 + $0x8a0] sm:$0xff]   ;;  %v10617_v29 = vld [vmem:[%s11880_s17 + $0x8e8] sm:$0xff]  }
0x233f   : > { %9199 = vmatprep.subr.bf16.mxu1 %v10568_v48  ;;  %v10618_v48 = vld [vmem:[%s11880_s17 + $0x828] sm:$0xff]  }
0x2340   : > { %9178 = vmatpush3.bf16.msra.mxu0 %v10569_v4  ;;  %v10619_v25 = vld [vmem:[%s11880_s17 + $0x8a8] sm:$0xff]   ;;  %v10620_v4 = vld [vmem:[%s11880_s17 + $0x870] sm:$0xff]  }
0x2341   : > { %9179 = vmatprep.subr.bf16.mxu0 %v10571_v27  ;;  %v10621_v27 = vld [vmem:[%s11880_s17 + $0x8f0] sm:$0xff]  }
0x2342   : > { %9200 = vmatpush3.bf16.msra.mxu1 %v10570_v21 }
0x2343   : > { %9201 = vmatprep.subr.bf16.mxu1 %v10572_v61 }
0x2344   : > { %9180 = vmatpush3.bf16.msra.mxu0 %v10573_v36  ;;  %v10622_v36 = vld [vmem:[%s11880_s17 + $0x830] sm:$0xff]  }
0x2345   : > { %9181 = vmatprep.subr.bf16.mxu0 %v10575_v59 }
0x2346   : > { %9202 = vmatpush3.bf16.msra.mxu1 %v10574_v43 }
0x2347   : > { %9203 = vmatprep.subr.bf16.mxu1 %v10576_v31 }
0x2348   : > { %9182 = vmatpush3.bf16.msra.mxu0 %v10577_v32  ;;  %v8408_v32 = vld.sshfl [vmem:[%s11905_s29 + $0x20] sm:$0x33 pattern:$0x75316420] }
0x2349   : > { %9183 = vmatprep.subr.bf16.mxu0 %v10579_v6 }
0x234a   : > { %9204 = vmatpush3.bf16.msra.mxu1 %v10578_v34 }
0x234b   : > { %9205 = vmatprep.subr.bf16.mxu1 %v10580_v11  ;;  %v10624_v11 = vld [vmem:[%s11880_s17 + $0x878] sm:$0xff]  }
0x234c   : > { %9184 = vmatpush3.bf16.msra.mxu0 %v10581_v38  ;;  %v5293_v38 = vcombine.high %v8408_v32, %v8408_v32 }
0x234d   : > { %9185 = vmatprep.subr.bf16.mxu0 %v10583_v40 }
0x234e   : > { %9206 = vmatpush3.bf16.msra.mxu1 %v10582_v39  ;;  %v8883_v56 = vpop.f32.mrb[8].mxu0 }
0x234f   : > { %v8884_v3 = vpop.f32.mrb[9].mxu0  ;;  %9207 = vmatprep.subr.bf16.mxu1 %v10584_v63 }
0x2350   : > { %v8905_v1 = vpop.f32.mrb[8].mxu1  ;;  %v8885_v47 = vadd.f32 %v8884_v3, %v8883_v56  ;;  %v8886_v49 = vpop.f32.mrb[10].mxu0  ;;  %9186 = vmatpush3.bf16.msra.mxu0 %v10585_v52  ;;  %v10623_v52 = vld [vmem:[%s11880_s17 + $0x8b0] sm:$0xff]   ;;  %v5307_v56 = vrot.slane %v5293_v38, %v12464_v51  ;;  %v10626_v3 = vld [vmem:[%s11880_s17 + $0x838] sm:$0xff]  }
0x2351   : > { %v8906_v53 = vpop.f32.mrb[9].mxu1  ;;  %v8887_v30 = vpop.f32.mrb[11].mxu0  ;;  %9187 = vmatprep.subr.bf16.mxu0 %v10587_v42  ;;  %v10625_v42 = vld [vmem:[%s11880_s17 + $0x8f8] sm:$0xff]  }
0x2352   : > { %v8907_v5 = vadd.f32 %v8906_v53, %v8905_v1  ;;  %v8908_v54 = vpop.f32.mrb[10].mxu1  ;;  %9208 = vmatpush3.bf16.msra.mxu1 %v10586_v41  ;;  %v5300_v1 = vrot.slane %v8408_v32, %v12464_v51 }
0x2353   : > { %v8909_v46 = vpop.f32.mrb[11].mxu1  ;;  %9209 = vmatprep.subr.bf16.mxu1 %v10588_v44 }
0x2354   : > { %v12811_v2 = vadd.f32 %v8907_v5, %v8885_v47  ;;  %9188 = vmatpush3.bf16.msra.mxu0 %v10589_v45  ;;  %v5309_v45 = vcombine.high %v5307_v56, %v5307_v56  ;;  %v10627_v47 = vld [vmem:[%s11880_s17 + $0x8b8] sm:$0xff]   ;;  %v5308_v49 = vcombine.high %v5300_v1, %v5300_v1 }
0x2355   : > { %9189 = vmatprep.subr.bf16.mxu0 %v10591_v62 }
0x2356   : > { %9210 = vmatpush3.bf16.msra.mxu1 %v10590_v7 }
0x2357   : > { %9211 = vmatprep.subr.bf16.mxu1 %v10592_v55 }
0x2358   : > { %9190 = vmatpush3.bf16.msra.mxu0 %v10593_v23 }
0x2359   : > { %9219 = vmatprep.subr.bf16.mxu0 %v10596_v58 }
0x235a   : > { %9212 = vmatpush3.bf16.msra.mxu1 %v10594_v10 }
0x235b   : > { %7667 = vmatmul.mubr.bf16.vlgmr.msra.gmra.mrb[36].mxu0 %v5267_v22  ;;  %9241 = vmatprep.subr.bf16.mxu1 %v10597_v57 }
0x235c   : > { %9220 = vmatpush3.bf16.msra.mxu0 %v10598_v33  ;;  %7746 = vmatprep.mubr.bf16.mxu0 %v5307_v56 }
0x235d   : > { %7707 = vmatmul.mubr.bf16.vlgmr.msra.gmra.mrb[36].mxu1 %v5283_v9  ;;  %9221 = vmatprep.subr.bf16.mxu0 %v10600_v14 }
0x235e   : > { %9242 = vmatpush3.bf16.msra.mxu1 %v10599_v60  ;;  %7786 = vmatprep.mubr.bf16.mxu1 %v5309_v45 }
0x235f   : > { %9243 = vmatprep.subr.bf16.mxu1 %v10601_v37 }
0x2360   : > { %9222 = vmatpush3.bf16.msra.mxu0 %v10602_v50 }
0x2361   : > { %9223 = vmatprep.subr.bf16.mxu0 %v10604_v12 }
0x2362   : > { %9244 = vmatpush3.bf16.msra.mxu1 %v10603_v15 }
0x2363   : > { %9245 = vmatprep.subr.bf16.mxu1 %v10605_v24 }
0x2364   : > { %9224 = vmatpush3.bf16.msra.mxu0 %v10606_v13 }
0x2365   : > { %9225 = vmatprep.subr.bf16.mxu0 %v10608_v8 }
0x2366   : > { %9246 = vmatpush3.bf16.msra.mxu1 %v10607_v16 }
0x2367   : > { %9247 = vmatprep.subr.bf16.mxu1 %v10609_v17 }
0x2368   : > { %9226 = vmatpush3.bf16.msra.mxu0 %v10610_v26 }
0x2369   : > { %9227 = vmatprep.subr.bf16.mxu0 %v10612_v35 }
0x236a   : > { %9248 = vmatpush3.bf16.msra.mxu1 %v10611_v18 }
0x236b   : > { %9249 = vmatprep.subr.bf16.mxu1 %v10613_v28 }
0x236c   : > { %9228 = vmatpush3.bf16.msra.mxu0 %v10614_v0 }
0x236d   : > { %9229 = vmatprep.subr.bf16.mxu0 %v10616_v20 }
0x236e   : > { %9250 = vmatpush3.bf16.msra.mxu1 %v10615_v19  ;;  %v8927_v21 = vpop.f32.mrb[12].mxu0 }
0x236f   : > { %v8928_v61 = vpop.f32.mrb[13].mxu0  ;;  %9251 = vmatprep.subr.bf16.mxu1 %v10617_v29 }
0x2370   : > { %v8949_v43 = vpop.f32.mrb[12].mxu1  ;;  %v8929_v59 = vadd.f32 %v8928_v61, %v8927_v21  ;;  %v8930_v31 = vpop.f32.mrb[14].mxu0  ;;  %9230 = vmatpush3.bf16.msra.mxu0 %v10618_v48 }
0x2371   : > { %v8950_v34 = vpop.f32.mrb[13].mxu1  ;;  %v8931_v6 = vpop.f32.mrb[15].mxu0  ;;  %9231 = vmatprep.subr.bf16.mxu0 %v10620_v4 }
0x2372   : > { %v7189_v39 = vadd.f32 %v8929_v59, %v12811_v2  ;;  %v8951_v40 = vadd.f32 %v8950_v34, %v8949_v43  ;;  %v8952_v63 = vpop.f32.mrb[14].mxu1  ;;  %9252 = vmatpush3.bf16.msra.mxu1 %v10619_v25 }
0x2373   : > { %v8953_v41 = vpop.f32.mrb[15].mxu1  ;;  %9253 = vmatprep.subr.bf16.mxu1 %v10621_v27 }
0x2374   : > { %v7229_v44 = vadd.f32 %v8951_v40, %v7189_v39  ;;  %9232 = vmatpush3.bf16.msra.mxu0 %v10622_v36 }
0x2375   : > { %9233 = vmatprep.subr.bf16.mxu0 %v10624_v11 }
0x2376   : > { %9254 = vmatpush3.bf16.msra.mxu1 %v10623_v52 }
0x2377   : > { %9255 = vmatprep.subr.bf16.mxu1 %v10625_v42 }
0x2378   : > { %9234 = vmatpush3.bf16.msra.mxu0 %v10626_v3 }
0x237a   : > { %9256 = vmatpush3.bf16.msra.mxu1 %v10627_v47 }
0x237b   : > { %7747 = vmatmul.mubr.bf16.vlgmr.msra.gmra.mrb[40].mxu0 %v5300_v1 }
0x237d   : > { %7787 = vmatmul.mubr.bf16.vlgmr.msra.gmra.mrb[40].mxu1 %v5308_v49 }
0x238e   : > { %v8971_v7 = vpop.f32.mrb[16].mxu0 }
0x238f   : > { %v8972_v62 = vpop.f32.mrb[17].mxu0 }
0x2390   : > { %v8993_v53 = vpop.f32.mrb[16].mxu1  ;;  %v8973_v30 = vadd.f32 %v8972_v62, %v8971_v7  ;;  %v8974_v5 = vpop.f32.mrb[18].mxu0 }
0x2391   : > { %v8994_v54 = vpop.f32.mrb[17].mxu1  ;;  %v8975_v55 = vpop.f32.mrb[19].mxu0 }
0x2392   : > { %v7269_v46 = vadd.f32 %v8973_v30, %v7229_v44  ;;  %v8995_v23 = vadd.f32 %v8994_v54, %v8993_v53  ;;  %v8996_v2 = vpop.f32.mrb[18].mxu1 }
0x2393   : > { %v8997_v51 = vpop.f32.mrb[19].mxu1 }
0x2394   : > { %v7309_v10 = vadd.f32 %v8995_v23, %v7269_v46 }
0x23ae   : > { %v9015_v22 = vpop.f32.mrb[20].mxu0 }
0x23af   : > { %v9016_v58 = vpop.f32.mrb[21].mxu0 }
0x23b0   : > { %v9037_v57 = vpop.f32.mrb[20].mxu1  ;;  %v9017_v33 = vadd.f32 %v9016_v58, %v9015_v22  ;;  %v9018_v60 = vpop.f32.mrb[22].mxu0 }
0x23b1   : > { %v9038_v9 = vpop.f32.mrb[21].mxu1  ;;  %v9019_v14 = vpop.f32.mrb[23].mxu0 }
0x23b2   : > { %v7349_v37 = vadd.f32 %v9017_v33, %v7309_v10  ;;  %v9039_v50 = vadd.f32 %v9038_v9, %v9037_v57  ;;  %v9040_v15 = vpop.f32.mrb[22].mxu1  ;;  %v4503_v14 = vld [vmem:[#allocation3] sm:$0x3] }
0x23b3   : > { %v9041_v12 = vpop.f32.mrb[23].mxu1 }
0x23b4   : > { %v7389_v24 = vadd.f32 %v9039_v50, %v7349_v37  ;;  %v7837_v12 = vld [vmem:[%s13176_s27 + $0x80] sm:$0xff] (!%p8697_p7) }
0x23ce   : > { %v9059_v13 = vpop.f32.mrb[24].mxu0 }
0x23cf   : > { %v9060_v16 = vpop.f32.mrb[25].mxu0 }
0x23d0   : > { %v9081_v8 = vpop.f32.mrb[24].mxu1  ;;  %v9061_v17 = vadd.f32 %v9060_v16, %v9059_v13  ;;  %v9062_v26 = vpop.f32.mrb[26].mxu0  ;;  %v7821_v13 = vld [vmem:[%s13176_s27] sm:$0xff] (!%p8697_p7) }
0x23d1   : > { %v9082_v18 = vpop.f32.mrb[25].mxu1  ;;  %v9063_v35 = vpop.f32.mrb[27].mxu0  ;;  %v7840_v26 = vld [vmem:[%s13176_s27 + $0x98] sm:$0xff] (!%p8697_p7) }
0x23d2   : > { %v7429_v28 = vadd.f32 %v9061_v17, %v7389_v24  ;;  %v9083_v0 = vadd.f32 %v9082_v18, %v9081_v8  ;;  %v9084_v19 = vpop.f32.mrb[26].mxu1  ;;  %v7838_v24 = vld [vmem:[%s13176_s27 + $0x88] sm:$0xff] (!%p8697_p7)  ;;  %v7839_v17 = vld [vmem:[%s13176_s27 + $0x90] sm:$0xff] (!%p8697_p7)  ;;  %v11248_v18 = vmov (!%p8697_p7), 0.0|0.0   ;;  %v11250_v35 = vmov (!%p8697_p7), 0.0  }
0x23d3   : > { %v9085_v20 = vpop.f32.mrb[27].mxu1  ;;  %v9876_v16 = vpack.c.bf16 (!%p8697_p7), %v7838_v24, %v7837_v12  ;;  %v7822_v8 = vld [vmem:[%s13176_s27 + $0x8] sm:$0xff] (!%p8697_p7)  ;;  %9908 = vmatprep.subr.bf16.mxu1 (!%p8697_p7), %v11248_v18  ;;  %9499 = vmatprep.mubr.msk.f32.mxu1 (!%p8697_p7), %vm11249_vm4, %v11250_v35  ;;  %v7823_v19 = vld [vmem:[%s13176_s27 + $0x10] sm:$0xff] (!%p8697_p7)  ;;  %v7865_v12 = vld [vmem:[%s13176_s27 + $0x160] sm:$0xff] (!%p8697_p7) }
0x23d4   : > { %v7469_v29 = vadd.f32 %v9083_v0, %v7429_v28  ;;  %v9878_v28 = vpack.c.bf16 (!%p8697_p7), %v7822_v8, %v7821_v13  ;;  %v9880_v0 = vpack.c.bf16 (!%p8697_p7), %v7840_v26, %v7839_v17  ;;  %v7824_v20 = vld [vmem:[%s13176_s27 + $0x18] sm:$0xff] (!%p8697_p7)  ;;  %v7866_v24 = vld [vmem:[%s13176_s27 + $0x168] sm:$0xff] (!%p8697_p7)  ;;  %v8698_v8 = vld [vmem:[#allocation28] ss:$0 sm:$0xff] (!%p8697_p7) }
0x23d5   : > { %9877 = vmatprep.subr.bf16.mxu0 (!%p8697_p7), %v9876_v16  ;;  %v7800_v16 = vld [vmem:[#allocation2] sm:$0x3] (!%p8697_p7)  ;;  %v7836_v35 = vld [vmem:[%s13176_s27 + $0x78] sm:$0xff] (!%p8697_p7) }
0x23d6   : > { %9879 = vmatpush3.bf16.msra.mxu0 (!%p8697_p7), %v9878_v28  ;;  %v7835_v26 = vld [vmem:[%s13176_s27 + $0x70] sm:$0xff] (!%p8697_p7)  ;;  %v9927_v28 = vpack.c.bf16 (!%p8697_p7), %v7866_v24, %v7865_v12 }
0x23d7   : > { %9881 = vmatprep.subr.bf16.mxu0 (!%p8697_p7), %v9880_v0 }
0x23ee   : > { %v9103_v48 = vpop.f32.mrb[28].mxu0 }
0x23ef   : > { %v9104_v25 = vpop.f32.mrb[29].mxu0 }
0x23f0   : > { %v9125_v4 = vpop.f32.mrb[28].mxu1  ;;  %v9105_v21 = vadd.f32 %v9104_v25, %v9103_v48  ;;  %v9106_v27 = vpop.f32.mrb[30].mxu0  ;;  %v7854_v48 = vld [vmem:[%s13176_s27 + $0x108] sm:$0xff] (!%p8697_p7)  ;;  %v7841_v25 = vld [vmem:[%s13176_s27 + $0xa0] sm:$0xff] (!%p8697_p7) }
0x23f1   : > { %v9126_v61 = vpop.f32.mrb[29].mxu1  ;;  %v9107_v36 = vpop.f32.mrb[31].mxu0 }
0x23f2   : > { %v7509_v43 = vadd.f32 %v9105_v21, %v7469_v29  ;;  %v9127_v59 = vadd.f32 %v9126_v61, %v9125_v4  ;;  %v9128_v31 = vpop.f32.mrb[30].mxu1  ;;  %v7853_v29 = vld [vmem:[%s13176_s27 + $0x100] sm:$0xff] (!%p8697_p7)  ;;  %v7842_v4 = vld [vmem:[%s13176_s27 + $0xa8] sm:$0xff] (!%p8697_p7)  ;;  %v9882_v21 = vpack.c.bf16 (!%p8697_p7), %v7824_v20, %v7823_v19  ;;  %v7855_v61 = vld [vmem:[%s13176_s27 + $0x110] sm:$0xff] (!%p8697_p7)  ;;  %v7808_v20 = vadd.f32 (!%p8697_p7), %v8698_v8, %v7800_v16 }
0x23f3   : > { %v9129_v32 = vpop.f32.mrb[31].mxu1  ;;  %v9909_v27 = vpack.c.bf16 (!%p8697_p7), %v7854_v48, %v7853_v29  ;;  %v9884_v36 = vpack.c.bf16 (!%p8697_p7), %v7842_v4, %v7841_v25  ;;  %v7856_v31 = vld [vmem:[%s13176_s27 + $0x118] sm:$0xff] (!%p8697_p7)  ;;  %v8699_v19 = vld [vmem:[#allocation30] ss:$0 sm:$0xff] (!%p8697_p7)  ;;  %v9906_v25 = vpack.c.bf16 (!%p8697_p7), %v7836_v35, %v7835_v26 }
0x23f4   : > { %v7549_v34 = vadd.f32 %v9127_v59, %v7509_v43  ;;  %v7825_v43 = vld [vmem:[%s13176_s27 + $0x20] sm:$0xff] (!%p8697_p7)  ;;  %v7826_v59 = vld [vmem:[%s13176_s27 + $0x28] sm:$0xff] (!%p8697_p7)  ;;  %v9912_v32 = vpack.c.bf16 (!%p8697_p7), %v7856_v31, %v7855_v61  ;;  %9883 = vmatpush3.bf16.msra.mxu0 (!%p8697_p7), %v9882_v21  ;;  %v7867_v29 = vld [vmem:[%s13176_s27 + $0x170] sm:$0xff] (!%p8697_p7) }
0x23f5   : > { %9910 = vmatpush3.bf16.msra.mxu1 (!%p8697_p7), %v9909_v27  ;;  %9885 = vmatprep.subr.bf16.mxu0 (!%p8697_p7), %v9884_v36  ;;  %v7868_v48 = vld [vmem:[%s13176_s27 + $0x178] sm:$0xff] (!%p8697_p7)  ;;  %v7809_v27 = vmax.f32 (!%p8697_p7), %v7808_v20, 0.0 }
0x23f6   : > { %9911 = vmatprep.subr.bf16.mxu1 (!%p8697_p7), %v11248_v18  ;;  %v9930_v21 = vpack.c.bf16 (!%p8697_p7), %v7868_v48, %v7867_v29 }
0x23f9   : > { %9913 = vmatpush3.bf16.msra.mxu1 (!%p8697_p7), %v9912_v32 }
0x23fa   : > { %9914 = vmatprep.subr.bf16.mxu1 (!%p8697_p7), %v11248_v18 }
0x240e   : > { %v9147_v6 = vpop.f32.mrb[32].mxu0 }
0x240f   : > { %v9148_v11 = vpop.f32.mrb[33].mxu0 }
0x2410   : > { %v9169_v38 = vpop.f32.mrb[32].mxu1  ;;  %v9149_v39 = vadd.f32 %v9148_v11, %v9147_v6  ;;  %v9150_v40 = vpop.f32.mrb[34].mxu0  ;;  %v7844_v6 = vld [vmem:[%s13176_s27 + $0xb8] sm:$0xff] (!%p8697_p7)  ;;  %v7857_v11 = vld [vmem:[%s13176_s27 + $0x120] sm:$0xff] (!%p8697_p7) }
0x2411   : > { %v9170_v63 = vpop.f32.mrb[33].mxu1  ;;  %v9151_v52 = vpop.f32.mrb[35].mxu0 }
0x2412   : > { %v7589_v41 = vadd.f32 %v9149_v39, %v7549_v34  ;;  %v9171_v42 = vadd.f32 %v9170_v63, %v9169_v38  ;;  %v9172_v56 = vpop.f32.mrb[34].mxu1  ;;  %v7843_v34 = vld [vmem:[%s13176_s27 + $0xb0] sm:$0xff] (!%p8697_p7)  ;;  %v7858_v38 = vld [vmem:[%s13176_s27 + $0x128] sm:$0xff] (!%p8697_p7)  ;;  %v9886_v39 = vpack.c.bf16 (!%p8697_p7), %v7826_v59, %v7825_v43  ;;  %v7828_v52 = vld [vmem:[%s13176_s27 + $0x38] sm:$0xff] (!%p8697_p7) }
0x2413   : > { %v9173_v44 = vpop.f32.mrb[35].mxu1  ;;  %v9888_v40 = vpack.c.bf16 (!%p8697_p7), %v7844_v6, %v7843_v34  ;;  %v7827_v63 = vld [vmem:[%s13176_s27 + $0x30] sm:$0xff] (!%p8697_p7)  ;;  %v7846_v56 = vld [vmem:[%s13176_s27 + $0xc8] sm:$0xff] (!%p8697_p7) }
0x2414   : > { %v7629_v3 = vadd.f32 %v9171_v42, %v7589_v41  ;;  %v9915_v41 = vpack.c.bf16 (!%p8697_p7), %v7858_v38, %v7857_v11  ;;  %v7845_v42 = vld [vmem:[%s13176_s27 + $0xc0] sm:$0xff] (!%p8697_p7)  ;;  %v7859_v44 = vld [vmem:[%s13176_s27 + $0x130] sm:$0xff] (!%p8697_p7)  ;;  %9887 = vmatpush3.bf16.msra.mxu0 (!%p8697_p7), %v9886_v39 }
0x2415   : > { %9889 = vmatprep.subr.bf16.mxu0 (!%p8697_p7), %v9888_v40  ;;  %v8700_v59 = vld [vmem:[#allocation31] ss:$0 sm:$0xff] (!%p8697_p7) }
0x2416   : > { %9916 = vmatpush3.bf16.msra.mxu1 (!%p8697_p7), %v9915_v41 }
0x2417   : > { %9917 = vmatprep.subr.bf16.mxu1 (!%p8697_p7), %v11248_v18 }
0x242e   : > { %v9191_v45 = vpop.f32.mrb[36].mxu0 }
0x242f   : > { %v9192_v1 = vpop.f32.mrb[37].mxu0 }
0x2430   : > { %v9213_v47 = vpop.f32.mrb[36].mxu1  ;;  %v9193_v49 = vadd.f32 %v9192_v1, %v9191_v45  ;;  %v9194_v7 = vpop.f32.mrb[38].mxu0  ;;  %v9890_v45 = vpack.c.bf16 (!%p8697_p7), %v7828_v52, %v7827_v63  ;;  %v9892_v1 = vpack.c.bf16 (!%p8697_p7), %v7846_v56, %v7845_v42 }
0x2431   : > { %v9214_v62 = vpop.f32.mrb[37].mxu1  ;;  %v9195_v53 = vpop.f32.mrb[39].mxu0 }
0x2432   : > { %v7669_v30 = vadd.f32 %v9193_v49, %v7629_v3  ;;  %v9215_v5 = vadd.f32 %v9214_v62, %v9213_v47  ;;  %v9216_v54 = vpop.f32.mrb[38].mxu1  ;;  %v7860_v3 = vld [vmem:[%s13176_s27 + $0x138] sm:$0xff] (!%p8697_p7)  ;;  %v7829_v47 = vld [vmem:[%s13176_s27 + $0x40] sm:$0xff] (!%p8697_p7)  ;;  %v7830_v49 = vld [vmem:[%s13176_s27 + $0x48] sm:$0xff] (!%p8697_p7)  ;;  %9891 = vmatpush3.bf16.msra.mxu0 (!%p8697_p7), %v9890_v45 }
0x2433   : > { %v9217_v55 = vpop.f32.mrb[39].mxu1  ;;  %v9918_v7 = vpack.c.bf16 (!%p8697_p7), %v7860_v3, %v7859_v44  ;;  %v7847_v62 = vld [vmem:[%s13176_s27 + $0xd0] sm:$0xff] (!%p8697_p7)  ;;  %v7848_v53 = vld [vmem:[%s13176_s27 + $0xd8] sm:$0xff] (!%p8697_p7)  ;;  %9893 = vmatprep.subr.bf16.mxu0 (!%p8697_p7), %v9892_v1 }
0x2434   : > { %v7709_v46 = vadd.f32 %v9215_v5, %v7669_v30  ;;  %v7861_v30 = vld [vmem:[%s13176_s27 + $0x140] sm:$0xff] (!%p8697_p7)  ;;  %v7862_v5 = vld [vmem:[%s13176_s27 + $0x148] sm:$0xff] (!%p8697_p7)  ;;  %v7820_v54 = vld [vmem:[#allocation4] sm:$0x3] (!%p8697_p7)  ;;  %v9894_v55 = vpack.c.bf16 (!%p8697_p7), %v7830_v49, %v7829_v47 }
0x2435   : > { %7940 = vmatprep.mubr.f32.mxu0 (!%p8697_p7), %v7820_v54  ;;  %9919 = vmatpush3.bf16.msra.mxu1 (!%p8697_p7), %v9918_v7 }
0x2436   : > { %9920 = vmatprep.subr.bf16.mxu1 (!%p8697_p7), %v11248_v18  ;;  %9895 = vmatpush3.bf16.msra.mxu0 (!%p8697_p7), %v9894_v55 }
0x244e   : > { %v9235_v23 = vpop.f32.mrb[40].mxu0 }
0x244f   : > { %v9236_v2 = vpop.f32.mrb[41].mxu0 }
0x2450   : > { %v9257_v51 = vpop.f32.mrb[40].mxu1  ;;  %v9237_v10 = vadd.f32 %v9236_v2, %v9235_v23  ;;  %v9238_v22 = vpop.f32.mrb[42].mxu0  ;;  %v7831_v23 = vld [vmem:[%s13176_s27 + $0x50] sm:$0xff] (!%p8697_p7)  ;;  %v7832_v2 = vld [vmem:[%s13176_s27 + $0x58] sm:$0xff] (!%p8697_p7) }
0x2451   : > { %v9258_v58 = vpop.f32.mrb[41].mxu1  ;;  %v9239_v57 = vpop.f32.mrb[43].mxu0  ;;  %v7850_v22 = vld [vmem:[%s13176_s27 + $0xe8] sm:$0xff] (!%p8697_p7) }
0x2452   : > { %v7749_v33 = vadd.f32 %v9237_v10, %v7709_v46  ;;  %v9259_v60 = vadd.f32 %v9258_v58, %v9257_v51  ;;  %v9260_v9 = vpop.f32.mrb[42].mxu1  ;;  %7799 = sbr.rel (%p8697_p7) target bundleno = 9533 (0x253d), region = 176  ;;  %v9896_v46 = vpack.c.bf16 (!%p8697_p7), %v7848_v53, %v7847_v62  ;;  %v9921_v51 = vpack.c.bf16 (!%p8697_p7), %v7862_v5, %v7861_v30  ;;  %v7849_v10 = vld [vmem:[%s13176_s27 + $0xe0] sm:$0xff] (!%p8697_p7)  ;;  %v7863_v58 = vld [vmem:[%s13176_s27 + $0x150] sm:$0xff] (!%p8697_p7)  ;;  %v7864_v57 = vld [vmem:[%s13176_s27 + $0x158] sm:$0xff] (!%p8697_p7) }
0x2453   : > { %v9261_v37 = vpop.f32.mrb[43].mxu1  ;;  %v7833_v9 = vld [vmem:[%s13176_s27 + $0x60] sm:$0xff] (!%p8697_p7) }
0x2454   : > { %v7789_v50 = vadd.f32 %v9259_v60, %v7749_v33  ;;  %v9898_v33 = vpack.c.bf16 (!%p8697_p7), %v7832_v2, %v7831_v23  ;;  %9897 = vmatprep.subr.bf16.mxu0 (!%p8697_p7), %v9896_v46  ;;  %v9900_v60 = vpack.c.bf16 (!%p8697_p7), %v7850_v22, %v7849_v10  ;;  %9922 = vmatpush3.bf16.msra.mxu1 (!%p8697_p7), %v9921_v51 }
0x2455   : > { %v9924_v37 = vpack.c.bf16 (!%p8697_p7), %v7864_v57, %v7863_v58  ;;  %9923 = vmatprep.subr.bf16.mxu1 (!%p8697_p7), %v11248_v18 }
0x2456   : > { %v7794_v15 = vadd.f32 %v7789_v50, %v4503_v14  ;;  %v7834_v14 = vld [vmem:[%s13176_s27 + $0x68] sm:$0xff] (!%p8697_p7)  ;;  %v7851_v50 = vld [vmem:[%s13176_s27 + $0xf0] sm:$0xff] (!%p8697_p7)  ;;  %9899 = vmatpush3.bf16.msra.mxu0 (!%p8697_p7), %v9898_v33 }
0x2457   : > { %v9902_v13 = vpack.c.bf16 (!%p8697_p7), %v7834_v14, %v7833_v9  ;;  %9901 = vmatprep.subr.bf16.mxu0 (!%p8697_p7), %v9900_v60 }
0x2458   : > { %7795 = vst [vmem:[#allocation3] sm:$0x3] %v7794_v15  ;;  %v7852_v15 = vld [vmem:[%s13176_s27 + $0xf8] sm:$0xff] (!%p8697_p7)  ;;  %9925 = vmatpush3.bf16.msra.mxu1 (!%p8697_p7), %v9924_v37 }
0x2459   : > { %v9904_v17 = vpack.c.bf16 %v7852_v15, %v7851_v50  ;;  %9926 = vmatprep.subr.bf16.mxu1 %v11248_v18 }
0x245a   : > { %9903 = vmatpush3.bf16.msra.mxu0 %v9902_v13 }
0x245b   : > { %9905 = vmatprep.subr.bf16.mxu0 %v9904_v17 }
0x245c   : > { %9928 = vmatpush3.bf16.msra.mxu1 %v9927_v28 }
0x245d   : > { %9929 = vmatprep.subr.bf16.mxu1 %v11248_v18 }
0x245e   : > { %9907 = vmatpush3.bf16.msra.mxu0 %v9906_v25 }
0x245f   : > { %v7810_v0 = vld [vmem:[#allocation3] sm:$0x3] }
0x2460   : > { %v7818_v4 = vadd.f32 %v8699_v19, %v7810_v0  ;;  %9931 = vmatpush3.bf16.msra.mxu1 %v9930_v21 }
0x2461   : > { %7941 = vmatmul.mubr.f32.vlgmr.msra.gmra.mrb[0].mxu0 %v7809_v27 }
0x2462   : > { %v7819_v61 = vmax.f32 %v7818_v4, 0.0 }
0x2464   : > { %9500 = vmatmul.mubr.f32.vlgmr.msra.gmra.mrb[0].mxu1 %v7819_v61 }
0x2534   : > { %v9295_v36 = vpop.f32.mrb[0].mxu0 }
0x2535   : > { %v9296_v43 = vpop.f32.mrb[1].mxu0 }
0x2536   : > { %v9297_v31 = vadd.f32 %v9296_v43, %v9295_v36 }
0x2537   : > { %v8012_v32 = vpop.f32.mrb[0].mxu1 }
0x2538   : > { %v9501_v34 = vpop.f32.mrb[1].mxu1  ;;  %v7943_v6 = vadd.f32 %v9297_v31, %v8700_v59 }
0x253a   : > { %v8013_v11 = vadd.f32 %v8012_v32, %v7943_v6 }
0x253c   : > { %8017 = vst.msk [vmem:[#allocation32] sm:$0x3] %vm8016_vm5, %v8013_v11 }
0x253d PF: > { %p10105_p13 = scmp.eq.s32.totalorder %s11378_s3, 1  ;;  %s11251_s4 = smov [#allocation32]  }
0x253e   : > { %s8025_s0 = sshll.u32 %s11251_s4, 4  ;;  %s8026_s0 = int_to_ptr.vmem [resolvable:$true] %s8025_s0 }
0x253f   : > { %s11108_s24 = scalar_lea.vmem %s8026_s0, 32  ;;  %p11115_p9 = scmp.lt.s32.totalorder %s8026_s0, %s8026_s0 }
0x2540   : > { %p11109_p0 = scmp.ne.s32.totalorder %s8026_s0, %s11108_s24  ;;  %p11116_p10 = scmp.lt.s32.totalorder %s11108_s24, %s11108_s24 }
0x2542   : > { %p11110_p1 = pnand %p11109_p0, %p10105_p13  ;;  %p11117_p4 = por %p11116_p10, %p11115_p9 }
0x2544   : > { %p11111_p5 = pneg %p11110_p1 }
0x2546   : > { %p11118_p11 = pnand %p11117_p4, %p11111_p5 }
0x2548   : > { %11121 = shalt.err (!%p11118_p11)
}
0x2549   : > { %s13177_s9 = sld [smem:[#allocation64_spill]] }
0x254f   : > { %s11122_s1 = scalar_lea.hbm %s13177_s9, 32 }
0x2550   : > { %p11123_p3 = scmp.ne.s32.totalorder %s13177_s9, %s11122_s1  ;;  %p11128_p8 = scmp.lt.u32.totalorder %s11122_s1, %s13177_s9 }
0x2552   : > { %p11124_p12 = pnand %p11123_p3, %p10105_p13 }
0x2554   : > { %p11125_p2 = pneg %p11124_p12 }
0x2556   : > { %p11130_p6 = pnand %p11128_p8, %p11125_p2 }
0x2558   : > { %11133 = shalt.err (!%p11130_p6)
}
0x2559   : > { %10018 = dma.vmem_to_hbm [thread:$0]  (%p10105_p13), %s8026_s0, 32, %s13177_s9, [#allocation9]  }
0x255a   : > { %11199 = dma.done.wait (%p10105_p13), [#allocation9], 32  }
0x255b   : > { %11201 = vsyncadd (%p10105_p13), [#allocation9], 4294967264 }
0x255c PF: > { %p35_p7 = scmp.ge.s32.totalorder %s11597_s13, 4   ;;  %s13178_s1 = smov %s11208_s22 }
0x255d   : > { %s13179_s22 = smov %s11212_s23  ;;  %s13180_s23 = smov %s11608_s12 }
0x255e   : > { %s13181_s24 = smov %s11597_s13  ;;  %37 = sbr.rel (!%p35_p7) target bundleno = 28 (0x1c), region = 228 }
0x2565   :  { %8038 = vsyncpa [#allocation8], 1 }
0x2566   :  { %8040 = vsyncpa [#allocation8 + $0x1], 1 }
0x2567   :  { %8041 = vsyncpa [#allocation11], 1 }
0x2568   :  { %8042 = vsyncpa [#allocation14], 1 }
0x2569   :  { %8043 = vsyncpa [#allocation17], 1 }
0x256a   :  { %8044 = vsyncpa [#allocation20], 1 }
0x256b   :  { %8045 = vsyncpa [#allocation23], 1 }
0x256c   :  { %8046 = vsyncpa [#allocation26], 1 }
0x256d   :  { %8047 = vsyncpa [#allocation9], 1 }
0x256e   :  { %8049 = vsyncpa [#allocation9 + $0x1], 1 }

</bundles_post_ra>
